<compile_context>
chip_gen: v7x
topology: tpu7x:2x2x1
jax: 0.10.0
libtpu: 0.0.40
codegen_flags: <defaults>
</compile_context>

<pallas_src>
import math
import functools

import jax
import jax.numpy as jnp
from jax.experimental import pallas as pl
from jax.experimental.pallas import tpu as pltpu

EPS = 1e-6


# ---------------------------------------------------------------------------
# shared math (used by the Pallas kernel AND the pure-JAX reference).
# `recip` is injected so the kernel can route 1/x to the EUP via pl.reciprocal
# while the reference uses plain reciprocal/division.
# ---------------------------------------------------------------------------
def _layer_norm(x, alpha, bias, recip, eps=EPS):
    d = x.shape[-1]
    mean = jnp.mean(x, axis=-1, keepdims=True)
    var = jnp.sum((x - mean) ** 2, axis=-1, keepdims=True) / (d - 1)  # unbiased
    std = jnp.sqrt(var)
    return alpha * (x - mean) * recip(std + eps) + bias


def _softmax_lastdim(s, recip):
    m = jnp.max(s, axis=-1, keepdims=True)
    e = jnp.exp(s - m)
    return e * recip(jnp.sum(e, axis=-1, keepdims=True))


def _split_heads(t, n_heads):
    # (S, D) -> (H, S, d_k) built from lane-aligned column slices (d_k multiple
    # of 128 in the demo) + a leading-axis stack: no minor-dim relayout needed.
    d_model = t.shape[-1]
    d_k = d_model // n_heads
    return jnp.stack([t[:, h * d_k:(h + 1) * d_k] for h in range(n_heads)], axis=0)


def _merge_heads(t):
    # (H, S, d_k) -> (S, D): lane-aligned concatenation of head outputs.
    return jnp.concatenate([t[h] for h in range(t.shape[0])], axis=-1)


def _attention(q_src, kv_src, wq, bq, wkv, bkv, wo, bo, n_heads, recip):
    """Multi-head attention; all heads contracted in one batched einsum pair.

    q_src: (Tq, D) f32, kv_src: (S, D) f32.
    wq: (D, D) bf16, wkv: (D, 2D) bf16 (fused K+V), wo: (D, D) bf16; biases f32.
    Returns (Tq, D) f32.
    """
    d_model = q_src.shape[-1]
    d_k = d_model // n_heads

    # Q projection for the query tile + fused K/V projection (one wide MXU push).
    q = jnp.dot(q_src.astype(jnp.bfloat16), wq,
                preferred_element_type=jnp.float32) + bq                 # (Tq, D)
    kv = jnp.dot(kv_src.astype(jnp.bfloat16), wkv,
                 preferred_element_type=jnp.float32) + bkv               # (S, 2D)
    k = kv[:, :d_model]
    v = kv[:, d_model:]

    # fold 1/sqrt(d_k) into Q once (single (Tq, D) VPU multiply, not per head)
    q = q * (1.0 / math.sqrt(d_k))

    qh = _split_heads(q, n_heads).astype(jnp.bfloat16)                   # (H, Tq, d_k)
    kh = _split_heads(k, n_heads).astype(jnp.bfloat16)                   # (H, S,  d_k)
    vh = _split_heads(v, n_heads).astype(jnp.bfloat16)

    s = jnp.einsum('hqd,hkd->hqk', qh, kh,
                   preferred_element_type=jnp.float32)                   # (H, Tq, S)
    # NOTE: src_mask / tgt_mask intentionally NOT applied (reference bug: the
    # non-in-place masked_fill result is discarded).
    p = _softmax_lastdim(s, recip)
    o = jnp.einsum('hqk,hkd->hqd', p.astype(jnp.bfloat16), vh,
                   preferred_element_type=jnp.float32)                   # (H, Tq, d_k)
    o = _merge_heads(o)                                                  # (Tq, D)
    return jnp.dot(o.astype(jnp.bfloat16), wo,
                   preferred_element_type=jnp.float32) + bo


# ---------------------------------------------------------------------------
# Pallas kernel: one fused decoder block, grid = (batch, query_tile)
# ---------------------------------------------------------------------------
def _decoder_block_kernel(
        x_ref, enc_ref,
        sa_wq_ref, sa_bq_ref, sa_wkv_ref, sa_bkv_ref, sa_wo_ref, sa_bo_ref,
        ca_wq_ref, ca_bq_ref, ca_wkv_ref, ca_bkv_ref, ca_wo_ref, ca_bo_ref,
        w1_ref, b1_ref, w2_ref, b2_ref, ln_ref,
        out_ref,
        *, n_heads, tq, apply_final_ln):
    recip = functools.partial(pl.reciprocal, approx=False)   # exact, EUP slot

    q0 = pl.multiple_of(pl.program_id(1) * tq, tq)

    x_full = x_ref[0]                         # (S_t, D)  K/V source for self-attn
    x = x_ref[0, pl.ds(q0, tq), :]            # (tq, D)   residual stream (q tile)
    enc = enc_ref[0]                          # (S_s, D)

    # --- residual 0: pre-norm self-attention (dropout p=0 -> identity) ---
    kv_src = _layer_norm(x_full, ln_ref[0, 0], ln_ref[0, 1], recip)
    q_src = _layer_norm(x, ln_ref[0, 0], ln_ref[0, 1], recip)  # == q-tile rows of kv_src
    x = x + _attention(q_src, kv_src,
                       sa_wq_ref[...], sa_bq_ref[...], sa_wkv_ref[...], sa_bkv_ref[...],
                       sa_wo_ref[...], sa_bo_ref[...], n_heads, recip)

    # --- residual 1: pre-norm cross-attention over the encoder output ---
    q_src = _layer_norm(x, ln_ref[1, 0], ln_ref[1, 1], recip)
    x = x + _attention(q_src, enc,
                       ca_wq_ref[...], ca_bq_ref[...], ca_wkv_ref[...], ca_bkv_ref[...],
                       ca_wo_ref[...], ca_bo_ref[...], n_heads, recip)

    # --- residual 2: pre-norm feed-forward (ReLU MLP) ---
    xn = _layer_norm(x, ln_ref[2, 0], ln_ref[2, 1], recip)
    h = jnp.maximum(
        jnp.dot(xn.astype(jnp.bfloat16), w1_ref[...],
                preferred_element_type=jnp.float32) + b1_ref[...], 0.0)
    x = x + jnp.dot(h.astype(jnp.bfloat16), w2_ref[...],
                    preferred_element_type=jnp.float32) + b2_ref[...]

    # --- Decoder-level final LayerNormalization, fused into the last block ---
    if apply_final_ln:
        x = _layer_norm(x, ln_ref[3, 0], ln_ref[3, 1], recip)

    out_ref[0] = x.astype(out_ref.dtype)


def _decoder_block_call(x, enc, p, ln_all, *, n_heads, tq, apply_final_ln):
    B, S_t, D = x.shape
    _, S_s, _ = enc.shape
    d_ff = p["w1"].shape[1]
    assert S_t % tq == 0, "S_t must be divisible by the query tile"
    n_q = S_t // tq

    def full(shape):
        nd = len(shape)
        return pl.BlockSpec(shape, lambda b, q, _nd=nd: (0,) * _nd)

    grid_spec = pltpu.PrefetchScalarGridSpec(
        num_scalar_prefetch=0,
        grid=(B, n_q),
        in_specs=[
            pl.BlockSpec((1, S_t, D), lambda b, q: (b, 0, 0)),   # x (full sequence)
            pl.BlockSpec((1, S_s, D), lambda b, q: (b, 0, 0)),   # encoder output
            full((D, D)), full((1, D)),          # sa_wq, sa_bq
            full((D, 2 * D)), full((1, 2 * D)),  # sa_wkv, sa_bkv (fused K+V)
            full((D, D)), full((1, D)),          # sa_wo, sa_bo
            full((D, D)), full((1, D)),          # ca_wq, ca_bq
            full((D, 2 * D)), full((1, 2 * D)),  # ca_wkv, ca_bkv
            full((D, D)), full((1, D)),          # ca_wo, ca_bo
            full((D, d_ff)), full((1, d_ff)),    # ffn w1, b1
            full((d_ff, D)), full((1, D)),       # ffn w2, b2
            pl.BlockSpec(memory_space=pltpu.MemorySpace.SMEM),   # ln scalars (4, 2)
        ],
        out_specs=pl.BlockSpec((1, tq, D), lambda b, q: (b, q, 0)),
    )

    # advisory scheduling hint for XLA around the custom call
    flops = int(2 * B * (
        S_t * D * D + n_q * S_t * 2 * D * D + 2 * S_t * S_t * D + S_t * D * D     # self-attn
        + S_t * D * D + n_q * S_s * 2 * D * D + 2 * S_t * S_s * D + S_t * D * D   # cross-attn
        + 2 * S_t * D * d_ff))                                                    # ffn
    transcendentals = int(B * n_heads * S_t * (S_t + S_s) + 8 * B * S_t)
    bytes_accessed = int(4 * B * D * (2 * S_t + S_s)            # x, out, enc (f32)
                         + 2 * (8 * D * D + 2 * D * d_ff)       # bf16 weights
                         + 4 * (10 * D + 2 * d_ff))             # f32 biases
    cost = pl.CostEstimate(flops=flops, transcendentals=transcendentals,
                           bytes_accessed=bytes_accessed)

    kernel = functools.partial(_decoder_block_kernel, n_heads=n_heads, tq=tq,
                               apply_final_ln=apply_final_ln)

    return pl.pallas_call(
        kernel,
        out_shape=jax.ShapeDtypeStruct((B, S_t, D), jnp.float32),
        grid_spec=grid_spec,
        compiler_params=pltpu.CompilerParams(
            # both axes independent -> lets v7x's two TensorCores split the grid
            dimension_semantics=("parallel", "parallel")),
        cost_estimate=cost,
    )(x, enc,
      p["sa_wq"], p["sa_bq"], p["sa_wkv"], p["sa_bkv"], p["sa_wo"], p["sa_bo"],
      p["ca_wq"], p["ca_bq"], p["ca_wkv"], p["ca_bkv"], p["ca_wo"], p["ca_bo"],
      p["w1"], p["b1"], p["w2"], p["b2"], ln_all)


def decoder_forward(x, encoder_output, layer_params, final_ln, *, n_heads, tq=None):
    """Decoder.forward: x -> [DecoderBlock] * N -> final LayerNormalization."""
    _, S_t, _ = x.shape
    if tq is None:
        tq = min(S_t, 128)
    n_layers = len(layer_params)
    for li, p in enumerate(layer_params):
        is_last = li == n_layers - 1
        # ln rows: 0=self-attn pre-norm, 1=cross-attn pre-norm, 2=ffn pre-norm,
        # 3=Decoder final norm (only used by the last layer's kernel).
        final_row = final_ln if is_last else jnp.ones((1, 2), jnp.float32)
        ln_all = jnp.concatenate([p["ln"], final_row], axis=0)     # (4, 2)
        x = _decoder_block_call(x, encoder_output, p, ln_all,
                                n_heads=n_heads, tq=tq, apply_final_ln=is_last)
    return x


# ---------------------------------------------------------------------------
# pure-JAX reference (identical bf16/f32 recipe, no Pallas) for verification
# ---------------------------------------------------------------------------
def decoder_forward_ref(x, encoder_output, layer_params, final_ln, *, n_heads):
    recip = lambda t: 1.0 / t

    def block_one(xb, encb, p):
        ln = p["ln"]
        xn = _layer_norm(xb, ln[0, 0], ln[0, 1], recip)
        xb = xb + _attention(xn, xn, p["sa_wq"], p["sa_bq"], p["sa_wkv"], p["sa_bkv"],
                             p["sa_wo"], p["sa_bo"], n_heads, recip)
        xn = _layer_norm(xb, ln[1, 0], ln[1, 1], recip)
        xb = xb + _attention(xn, encb, p["ca_wq"], p["ca_bq"], p["ca_wkv"], p["ca_bkv"],
                             p["ca_wo"], p["ca_bo"], n_heads, recip)
        xn = _layer_norm(xb, ln[2, 0], ln[2, 1], recip)
        h = jnp.maximum(jnp.dot(xn.astype(jnp.bfloat16), p["w1"],
                                preferred_element_type=jnp.float32) + p["b1"], 0.0)
        return xb + jnp.dot(h.astype(jnp.bfloat16), p["w2"],
                            preferred_element_type=jnp.float32) + p["b2"]

    for p in layer_params:
        x = jax.vmap(lambda xb, eb, _p=p: block_one(xb, eb, _p))(x, encoder_output)
    return _layer_norm(x, final_ln[0, 0], final_ln[0, 1], recip)


if __name__ == "__main__":
    # Small demo config.  d_model=256, heads=2 -> d_k=128 keeps every head slice
    # lane-aligned (per perf review: keep the lane dim dense).
    B, S, D, H, DFF, N_LAYERS = 2, 16, 256, 2, 512, 2
    TQ = 8   # query-tile size (exercises the tiling grid axis; production: 128)

    key = jax.random.PRNGKey(0)
    keys = iter(jax.random.split(key, 64))
    scale = 1.0 / math.sqrt(D)

    def nrm(shape, s, dtype):
        return (s * jax.random.normal(next(keys), shape, jnp.float32)).astype(dtype)

    def make_layer():
        return {
            "sa_wq":  nrm((D, D), scale, jnp.bfloat16),
            "sa_bq":  nrm((1, D), scale, jnp.float32),
            "sa_wkv": nrm((D, 2 * D), scale, jnp.bfloat16),
            "sa_bkv": nrm((1, 2 * D), scale, jnp.float32),
            "sa_wo":  nrm((D, D), scale, jnp.bfloat16),
            "sa_bo":  nrm((1, D), scale, jnp.float32),
            "ca_wq":  nrm((D, D), scale, jnp.bfloat16),
            "ca_bq":  nrm((1, D), scale, jnp.float32),
            "ca_wkv": nrm((D, 2 * D), scale, jnp.bfloat16),
            "ca_bkv": nrm((1, 2 * D), scale, jnp.float32),
            "ca_wo":  nrm((D, D), scale, jnp.bfloat16),
            "ca_bo":  nrm((1, D), scale, jnp.float32),
            "w1":     nrm((D, DFF), scale, jnp.bfloat16),
            "b1":     nrm((1, DFF), scale, jnp.float32),
            "w2":     nrm((DFF, D), 1.0 / math.sqrt(DFF), jnp.bfloat16),
            "b2":     nrm((1, D), scale, jnp.float32),
            # per-block LayerNormalizations (alpha, bias); torch init = ones(1)
            "ln":     jnp.ones((3, 2), jnp.float32),
        }

    layer_params = [make_layer() for _ in range(N_LAYERS)]
    final_ln = jnp.ones((1, 2), jnp.float32)   # Decoder.norm (alpha, bias)

    x = jax.random.normal(next(keys), (B, S, D), jnp.float32)
    encoder_output = jax.random.normal(next(keys), (B, S, D), jnp.float32)

    # src_mask / tgt_mask exist in the PyTorch signature but have no effect on the
    # output (non-in-place masked_fill discarded), so they are not kernel inputs.

    out = decoder_forward(x, encoder_output, layer_params, final_ln, n_heads=H, tq=TQ)
    out = jax.block_until_ready(out)

    ref = decoder_forward_ref(x, encoder_output, layer_params, final_ln, n_heads=H)
    ref = jax.block_until_ready(ref)

    assert out.shape == (B, S, D)
    max_err = float(jnp.max(jnp.abs(out - ref)))
    # kernel and reference use the identical bf16-matmul / f32-accumulate recipe;
    # remaining differences are accumulation-order level.
    assert jnp.allclose(out, ref, atol=1e-3, rtol=1e-3), f"mismatch vs reference: {max_err}"

    print("KERNEL_OK")
</pallas_src>

<mosaic_0001>
module attributes {stable_mosaic.version = 11 : i64} {
  func.func @_decoder_block_kernel(%arg0: i32, %arg1: i32, %arg2: memref<1x16x256xf32, #tpu.memory_space<vmem>>, %arg3: memref<1x16x256xf32, #tpu.memory_space<vmem>>, %arg4: memref<256x256xbf16, #tpu.memory_space<vmem>>, %arg5: memref<1x256xf32, #tpu.memory_space<vmem>>, %arg6: memref<256x512xbf16, #tpu.memory_space<vmem>>, %arg7: memref<1x512xf32, #tpu.memory_space<vmem>>, %arg8: memref<256x256xbf16, #tpu.memory_space<vmem>>, %arg9: memref<1x256xf32, #tpu.memory_space<vmem>>, %arg10: memref<256x256xbf16, #tpu.memory_space<vmem>>, %arg11: memref<1x256xf32, #tpu.memory_space<vmem>>, %arg12: memref<256x512xbf16, #tpu.memory_space<vmem>>, %arg13: memref<1x512xf32, #tpu.memory_space<vmem>>, %arg14: memref<256x256xbf16, #tpu.memory_space<vmem>>, %arg15: memref<1x256xf32, #tpu.memory_space<vmem>>, %arg16: memref<256x512xbf16, #tpu.memory_space<vmem>>, %arg17: memref<1x512xf32, #tpu.memory_space<vmem>>, %arg18: memref<512x256xbf16, #tpu.memory_space<vmem>>, %arg19: memref<1x256xf32, #tpu.memory_space<vmem>>, %arg20: memref<4x2xf32, #tpu.memory_space<smem>>, %arg21: memref<1x8x256xf32, #tpu.memory_space<vmem>>) attributes {dimension_semantics = [#tpu.dimension_semantics<parallel>, #tpu.dimension_semantics<parallel>], iteration_bounds = array<i64: 2, 2>, scalar_prefetch = 0 : i64, scratch_operands = 0 : i64, tpu.core_type = #tpu.core_type<tc>, window_params = [{transform_indices = @transform_0, window_bounds = array<i64: 1, 16, 256>}, {transform_indices = @transform_1, window_bounds = array<i64: 1, 16, 256>}, {pipeline_mode = #tpu.pipeline_mode<synchronous>, transform_indices = @transform_2, window_bounds = array<i64: 256, 256>}, {pipeline_mode = #tpu.pipeline_mode<synchronous>, transform_indices = @transform_3, window_bounds = array<i64: 1, 256>}, {pipeline_mode = #tpu.pipeline_mode<synchronous>, transform_indices = @transform_4, window_bounds = array<i64: 256, 512>}, {pipeline_mode = #tpu.pipeline_mode<synchronous>, transform_indices = @transform_5, window_bounds = array<i64: 1, 512>}, {pipeline_mode = #tpu.pipeline_mode<synchronous>, transform_indices = @transform_6, window_bounds = array<i64: 256, 256>}, {pipeline_mode = #tpu.pipeline_mode<synchronous>, transform_indices = @transform_7, window_bounds = array<i64: 1, 256>}, {pipeline_mode = #tpu.pipeline_mode<synchronous>, transform_indices = @transform_8, window_bounds = array<i64: 256, 256>}, {pipeline_mode = #tpu.pipeline_mode<synchronous>, transform_indices = @transform_9, window_bounds = array<i64: 1, 256>}, {pipeline_mode = #tpu.pipeline_mode<synchronous>, transform_indices = @transform_10, window_bounds = array<i64: 256, 512>}, {pipeline_mode = #tpu.pipeline_mode<synchronous>, transform_indices = @transform_11, window_bounds = array<i64: 1, 512>}, {pipeline_mode = #tpu.pipeline_mode<synchronous>, transform_indices = @transform_12, window_bounds = array<i64: 256, 256>}, {pipeline_mode = #tpu.pipeline_mode<synchronous>, transform_indices = @transform_13, window_bounds = array<i64: 1, 256>}, {pipeline_mode = #tpu.pipeline_mode<synchronous>, transform_indices = @transform_14, window_bounds = array<i64: 256, 512>}, {pipeline_mode = #tpu.pipeline_mode<synchronous>, transform_indices = @transform_15, window_bounds = array<i64: 1, 512>}, {pipeline_mode = #tpu.pipeline_mode<synchronous>, transform_indices = @transform_16, window_bounds = array<i64: 512, 256>}, {pipeline_mode = #tpu.pipeline_mode<synchronous>, transform_indices = @transform_17, window_bounds = array<i64: 1, 256>}, {transform_indices = @transform_18, window_bounds = array<i64: 4, 2>}, {transform_indices = @transform_19, window_bounds = array<i64: 1, 8, 256>}]} {
    %c8_i32 = arith.constant 8 : i32
    %0 = arith.muli %arg1, %c8_i32 : i32
    %1 = tpu.assume_multiple %0, 8 : i32
    %c0 = arith.constant 0 : index
    %c0_0 = arith.constant 0 : index
    %c0_1 = arith.constant 0 : index
    %2 = vector.load %arg2[%c0, %c0_0, %c0_1] : memref<1x16x256xf32, #tpu.memory_space<vmem>>, vector<1x16x256xf32>
    %3 = vector.shape_cast %2 : vector<1x16x256xf32> to vector<16x256xf32>
    %c0_2 = arith.constant 0 : index
    %4 = arith.index_cast %1 : i32 to index
    %c0_3 = arith.constant 0 : index
    %5 = vector.load %arg2[%c0_2, %4, %c0_3] : memref<1x16x256xf32, #tpu.memory_space<vmem>>, vector<1x8x256xf32>
    %6 = vector.shape_cast %5 : vector<1x8x256xf32> to vector<8x256xf32>
    %c0_4 = arith.constant 0 : index
    %c0_5 = arith.constant 0 : index
    %c0_6 = arith.constant 0 : index
    %7 = vector.load %arg3[%c0_4, %c0_5, %c0_6] : memref<1x16x256xf32, #tpu.memory_space<vmem>>, vector<1x16x256xf32>
    %8 = vector.shape_cast %7 : vector<1x16x256xf32> to vector<16x256xf32>
    %c0_7 = arith.constant 0 : index
    %c0_8 = arith.constant 0 : index
    %9 = memref.load %arg20[%c0_7, %c0_8] : memref<4x2xf32, #tpu.memory_space<smem>>
    %c0_9 = arith.constant 0 : index
    %c1 = arith.constant 1 : index
    %10 = memref.load %arg20[%c0_9, %c1] : memref<4x2xf32, #tpu.memory_space<smem>>
    %cst = arith.constant dense<0.000000e+00> : vector<16xf32>
    %11 = vector.multi_reduction <add>, %3, %cst [1] : vector<16x256xf32> to vector<16xf32>
    %12 = vector.shape_cast %11 : vector<16xf32> to vector<16x1xf32>
    %cst_10 = arith.constant 2.560000e+02 : f32
    %13 = vector.broadcast %cst_10 : f32 to vector<16x1xf32>
    %14 = arith.divf %12, %13 : vector<16x1xf32>
    %15 = vector.broadcast %14 : vector<16x1xf32> to vector<16x256xf32>
    %16 = arith.subf %3, %15 : vector<16x256xf32>
    %17 = arith.mulf %16, %16 : vector<16x256xf32>
    %cst_11 = arith.constant dense<0.000000e+00> : vector<16xf32>
    %18 = vector.multi_reduction <add>, %17, %cst_11 [1] : vector<16x256xf32> to vector<16xf32>
    %19 = vector.shape_cast %18 : vector<16xf32> to vector<16x1xf32>
    %cst_12 = arith.constant 2.550000e+02 : f32
    %20 = vector.broadcast %cst_12 : f32 to vector<16x1xf32>
    %21 = arith.divf %19, %20 : vector<16x1xf32>
    %22 = math.sqrt %21 : vector<16x1xf32>
    %23 = vector.broadcast %14 : vector<16x1xf32> to vector<16x256xf32>
    %24 = arith.subf %3, %23 : vector<16x256xf32>
    %25 = vector.broadcast %9 : f32 to vector<16x256xf32>
    %26 = arith.mulf %25, %24 : vector<16x256xf32>
    %cst_13 = arith.constant 9.99999997E-7 : f32
    %27 = vector.broadcast %cst_13 : f32 to vector<16x1xf32>
    %28 = arith.addf %22, %27 : vector<16x1xf32>
    %29 = tpu.reciprocal %28 : vector<16x1xf32> -> vector<16x1xf32>
    %30 = vector.broadcast %29 : vector<16x1xf32> to vector<16x256xf32>
    %31 = arith.mulf %26, %30 : vector<16x256xf32>
    %32 = vector.broadcast %10 : f32 to vector<16x256xf32>
    %33 = arith.addf %31, %32 : vector<16x256xf32>
    %c0_14 = arith.constant 0 : index
    %c0_15 = arith.constant 0 : index
    %34 = memref.load %arg20[%c0_14, %c0_15] : memref<4x2xf32, #tpu.memory_space<smem>>
    %c0_16 = arith.constant 0 : index
    %c1_17 = arith.constant 1 : index
    %35 = memref.load %arg20[%c0_16, %c1_17] : memref<4x2xf32, #tpu.memory_space<smem>>
    %cst_18 = arith.constant dense<0.000000e+00> : vector<8xf32>
    %36 = vector.multi_reduction <add>, %6, %cst_18 [1] : vector<8x256xf32> to vector<8xf32>
    %37 = vector.shape_cast %36 : vector<8xf32> to vector<8x1xf32>
    %cst_19 = arith.constant 2.560000e+02 : f32
    %38 = vector.broadcast %cst_19 : f32 to vector<8x1xf32>
    %39 = arith.divf %37, %38 : vector<8x1xf32>
    %40 = vector.broadcast %39 : vector<8x1xf32> to vector<8x256xf32>
    %41 = arith.subf %6, %40 : vector<8x256xf32>
    %42 = arith.mulf %41, %41 : vector<8x256xf32>
    %cst_20 = arith.constant dense<0.000000e+00> : vector<8xf32>
    %43 = vector.multi_reduction <add>, %42, %cst_20 [1] : vector<8x256xf32> to vector<8xf32>
    %44 = vector.shape_cast %43 : vector<8xf32> to vector<8x1xf32>
    %cst_21 = arith.constant 2.550000e+02 : f32
    %45 = vector.broadcast %cst_21 : f32 to vector<8x1xf32>
    %46 = arith.divf %44, %45 : vector<8x1xf32>
    %47 = math.sqrt %46 : vector<8x1xf32>
    %48 = vector.broadcast %39 : vector<8x1xf32> to vector<8x256xf32>
    %49 = arith.subf %6, %48 : vector<8x256xf32>
    %50 = vector.broadcast %34 : f32 to vector<8x256xf32>
    %51 = arith.mulf %50, %49 : vector<8x256xf32>
    %cst_22 = arith.constant 9.99999997E-7 : f32
    %52 = vector.broadcast %cst_22 : f32 to vector<8x1xf32>
    %53 = arith.addf %47, %52 : vector<8x1xf32>
    %54 = tpu.reciprocal %53 : vector<8x1xf32> -> vector<8x1xf32>
    %55 = vector.broadcast %54 : vector<8x1xf32> to vector<8x256xf32>
    %56 = arith.mulf %51, %55 : vector<8x256xf32>
    %57 = vector.broadcast %35 : f32 to vector<8x256xf32>
    %58 = arith.addf %56, %57 : vector<8x256xf32>
    %c0_23 = arith.constant 0 : index
    %c0_24 = arith.constant 0 : index
    %59 = vector.load %arg4[%c0_23, %c0_24] : memref<256x256xbf16, #tpu.memory_space<vmem>>, vector<256x256xbf16>
    %c0_25 = arith.constant 0 : index
    %c0_26 = arith.constant 0 : index
    %60 = vector.load %arg5[%c0_25, %c0_26] : memref<1x256xf32, #tpu.memory_space<vmem>>, vector<1x256xf32>
    %c0_27 = arith.constant 0 : index
    %c0_28 = arith.constant 0 : index
    %61 = vector.load %arg6[%c0_27, %c0_28] : memref<256x512xbf16, #tpu.memory_space<vmem>>, vector<256x512xbf16>
    %c0_29 = arith.constant 0 : index
    %c0_30 = arith.constant 0 : index
    %62 = vector.load %arg7[%c0_29, %c0_30] : memref<1x512xf32, #tpu.memory_space<vmem>>, vector<1x512xf32>
    %c0_31 = arith.constant 0 : index
    %c0_32 = arith.constant 0 : index
    %63 = vector.load %arg8[%c0_31, %c0_32] : memref<256x256xbf16, #tpu.memory_space<vmem>>, vector<256x256xbf16>
    %c0_33 = arith.constant 0 : index
    %c0_34 = arith.constant 0 : index
    %64 = vector.load %arg9[%c0_33, %c0_34] : memref<1x256xf32, #tpu.memory_space<vmem>>, vector<1x256xf32>
    %65 = arith.truncf %58 : vector<8x256xf32> to vector<8x256xbf16>
    %cst_35 = arith.constant dense<0.000000e+00> : vector<8x256xf32>
    %66 = tpu.matmul %65, %59, %cst_35 {dimension_numbers = #tpu.dot_dimension_numbers<[1], [0], [0], [1], [0, 0, 1, 1], [], []>} : vector<8x256xbf16>, vector<256x256xbf16>, vector<8x256xf32> -> vector<8x256xf32>
    %67 = vector.broadcast %60 : vector<1x256xf32> to vector<8x256xf32>
    %68 = arith.addf %66, %67 : vector<8x256xf32>
    %69 = arith.truncf %33 : vector<16x256xf32> to vector<16x256xbf16>
    %cst_36 = arith.constant dense<0.000000e+00> : vector<16x512xf32>
    %70 = tpu.matmul %69, %61, %cst_36 {dimension_numbers = #tpu.dot_dimension_numbers<[1], [0], [0], [1], [0, 0, 1, 1], [], []>} : vector<16x256xbf16>, vector<256x512xbf16>, vector<16x512xf32> -> vector<16x512xf32>
    %71 = vector.broadcast %62 : vector<1x512xf32> to vector<16x512xf32>
    %72 = arith.addf %70, %71 : vector<16x512xf32>
    %73 = vector.extract_strided_slice %72 {offsets = [0, 0], sizes = [16, 256], strides = [1, 1]} : vector<16x512xf32> to vector<16x256xf32>
    %74 = vector.extract_strided_slice %72 {offsets = [0, 256], sizes = [16, 256], strides = [1, 1]} : vector<16x512xf32> to vector<16x256xf32>
    %cst_37 = arith.constant 0.0883883461 : f32
    %75 = vector.broadcast %cst_37 : f32 to vector<8x256xf32>
    %76 = arith.mulf %68, %75 : vector<8x256xf32>
    %77 = vector.extract_strided_slice %76 {offsets = [0, 0], sizes = [8, 128], strides = [1, 1]} : vector<8x256xf32> to vector<8x128xf32>
    %78 = vector.extract_strided_slice %76 {offsets = [0, 128], sizes = [8, 128], strides = [1, 1]} : vector<8x256xf32> to vector<8x128xf32>
    %79 = vector.shape_cast %77 : vector<8x128xf32> to vector<1x8x128xf32>
    %80 = vector.shape_cast %78 : vector<8x128xf32> to vector<1x8x128xf32>
    %81 = tpu.concatenate %79, %80 in 0 : vector<1x8x128xf32>, vector<1x8x128xf32> -> vector<2x8x128xf32>
    %82 = arith.truncf %81 : vector<2x8x128xf32> to vector<2x8x128xbf16>
    %83 = vector.extract_strided_slice %73 {offsets = [0, 0], sizes = [16, 128], strides = [1, 1]} : vector<16x256xf32> to vector<16x128xf32>
    %84 = vector.extract_strided_slice %73 {offsets = [0, 128], sizes = [16, 128], strides = [1, 1]} : vector<16x256xf32> to vector<16x128xf32>
    %85 = vector.shape_cast %83 : vector<16x128xf32> to vector<1x16x128xf32>
    %86 = vector.shape_cast %84 : vector<16x128xf32> to vector<1x16x128xf32>
    %87 = tpu.concatenate %85, %86 in 0 : vector<1x16x128xf32>, vector<1x16x128xf32> -> vector<2x16x128xf32>
    %88 = arith.truncf %87 : vector<2x16x128xf32> to vector<2x16x128xbf16>
    %89 = vector.extract_strided_slice %74 {offsets = [0, 0], sizes = [16, 128], strides = [1, 1]} : vector<16x256xf32> to vector<16x128xf32>
    %90 = vector.extract_strided_slice %74 {offsets = [0, 128], sizes = [16, 128], strides = [1, 1]} : vector<16x256xf32> to vector<16x128xf32>
    %91 = vector.shape_cast %89 : vector<16x128xf32> to vector<1x16x128xf32>
    %92 = vector.shape_cast %90 : vector<16x128xf32> to vector<1x16x128xf32>
    %93 = tpu.concatenate %91, %92 in 0 : vector<1x16x128xf32>, vector<1x16x128xf32> -> vector<2x16x128xf32>
    %94 = arith.truncf %93 : vector<2x16x128xf32> to vector<2x16x128xbf16>
    "tpu.trace_start"() <{level = 10 : i32, message = "hqd,hkd->hqk"}> : () -> ()
    %cst_38 = arith.constant dense<0.000000e+00> : vector<2x8x16xf32>
    %95 = tpu.matmul %82, %88, %cst_38 {dimension_numbers = #tpu.dot_dimension_numbers<[2], [2], [1], [1], [0, 0, 0, 1, 1, 1], [0], [0]>} : vector<2x8x128xbf16>, vector<2x16x128xbf16>, vector<2x8x16xf32> -> vector<2x8x16xf32>
    "tpu.trace_stop"() : () -> ()
    %cst_39 = arith.constant dense<0xFF800000> : vector<2x8xf32>
    %96 = vector.multi_reduction <maximumf>, %95, %cst_39 [2] : vector<2x8x16xf32> to vector<2x8xf32>
    %97 = vector.shape_cast %96 : vector<2x8xf32> to vector<2x8x1xf32>
    %98 = vector.broadcast %97 : vector<2x8x1xf32> to vector<2x8x16xf32>
    %99 = arith.subf %95, %98 : vector<2x8x16xf32>
    %100 = math.exp %99 : vector<2x8x16xf32>
    %cst_40 = arith.constant dense<0.000000e+00> : vector<2x8xf32>
    %101 = vector.multi_reduction <add>, %100, %cst_40 [2] : vector<2x8x16xf32> to vector<2x8xf32>
    %102 = vector.shape_cast %101 : vector<2x8xf32> to vector<2x8x1xf32>
    %103 = tpu.reciprocal %102 : vector<2x8x1xf32> -> vector<2x8x1xf32>
    %104 = vector.broadcast %103 : vector<2x8x1xf32> to vector<2x8x16xf32>
    %105 = arith.mulf %100, %104 : vector<2x8x16xf32>
    %106 = arith.truncf %105 : vector<2x8x16xf32> to vector<2x8x16xbf16>
    "tpu.trace_start"() <{level = 10 : i32, message = "hqk,hkd->hqd"}> : () -> ()
    %cst_41 = arith.constant dense<0.000000e+00> : vector<2x8x128xf32>
    %107 = tpu.matmul %106, %94, %cst_41 {dimension_numbers = #tpu.dot_dimension_numbers<[2], [1], [1], [2], [0, 0, 0, 1, 1, 2], [0], [0]>} : vector<2x8x16xbf16>, vector<2x16x128xbf16>, vector<2x8x128xf32> -> vector<2x8x128xf32>
    "tpu.trace_stop"() : () -> ()
    %108 = vector.extract_strided_slice %107 {offsets = [0, 0, 0], sizes = [1, 8, 128], strides = [1, 1, 1]} : vector<2x8x128xf32> to vector<1x8x128xf32>
    %109 = vector.shape_cast %108 : vector<1x8x128xf32> to vector<8x128xf32>
    %110 = vector.extract_strided_slice %107 {offsets = [1, 0, 0], sizes = [1, 8, 128], strides = [1, 1, 1]} : vector<2x8x128xf32> to vector<1x8x128xf32>
    %111 = vector.shape_cast %110 : vector<1x8x128xf32> to vector<8x128xf32>
    %112 = tpu.concatenate %109, %111 in 1 : vector<8x128xf32>, vector<8x128xf32> -> vector<8x256xf32>
    %113 = arith.truncf %112 : vector<8x256xf32> to vector<8x256xbf16>
    %cst_42 = arith.constant dense<0.000000e+00> : vector<8x256xf32>
    %114 = tpu.matmul %113, %63, %cst_42 {dimension_numbers = #tpu.dot_dimension_numbers<[1], [0], [0], [1], [0, 0, 1, 1], [], []>} : vector<8x256xbf16>, vector<256x256xbf16>, vector<8x256xf32> -> vector<8x256xf32>
    %115 = vector.broadcast %64 : vector<1x256xf32> to vector<8x256xf32>
    %116 = arith.addf %114, %115 : vector<8x256xf32>
    %117 = arith.addf %6, %116 : vector<8x256xf32>
    %c1_43 = arith.constant 1 : index
    %c0_44 = arith.constant 0 : index
    %118 = memref.load %arg20[%c1_43, %c0_44] : memref<4x2xf32, #tpu.memory_space<smem>>
    %c1_45 = arith.constant 1 : index
    %c1_46 = arith.constant 1 : index
    %119 = memref.load %arg20[%c1_45, %c1_46] : memref<4x2xf32, #tpu.memory_space<smem>>
    %cst_47 = arith.constant dense<0.000000e+00> : vector<8xf32>
    %120 = vector.multi_reduction <add>, %117, %cst_47 [1] : vector<8x256xf32> to vector<8xf32>
    %121 = vector.shape_cast %120 : vector<8xf32> to vector<8x1xf32>
    %cst_48 = arith.constant 2.560000e+02 : f32
    %122 = vector.broadcast %cst_48 : f32 to vector<8x1xf32>
    %123 = arith.divf %121, %122 : vector<8x1xf32>
    %124 = vector.broadcast %123 : vector<8x1xf32> to vector<8x256xf32>
    %125 = arith.subf %117, %124 : vector<8x256xf32>
    %126 = arith.mulf %125, %125 : vector<8x256xf32>
    %cst_49 = arith.constant dense<0.000000e+00> : vector<8xf32>
    %127 = vector.multi_reduction <add>, %126, %cst_49 [1] : vector<8x256xf32> to vector<8xf32>
    %128 = vector.shape_cast %127 : vector<8xf32> to vector<8x1xf32>
    %cst_50 = arith.constant 2.550000e+02 : f32
    %129 = vector.broadcast %cst_50 : f32 to vector<8x1xf32>
    %130 = arith.divf %128, %129 : vector<8x1xf32>
    %131 = math.sqrt %130 : vector<8x1xf32>
    %132 = vector.broadcast %123 : vector<8x1xf32> to vector<8x256xf32>
    %133 = arith.subf %117, %132 : vector<8x256xf32>
    %134 = vector.broadcast %118 : f32 to vector<8x256xf32>
    %135 = arith.mulf %134, %133 : vector<8x256xf32>
    %cst_51 = arith.constant 9.99999997E-7 : f32
    %136 = vector.broadcast %cst_51 : f32 to vector<8x1xf32>
    %137 = arith.addf %131, %136 : vector<8x1xf32>
    %138 = tpu.reciprocal %137 : vector<8x1xf32> -> vector<8x1xf32>
    %139 = vector.broadcast %138 : vector<8x1xf32> to vector<8x256xf32>
    %140 = arith.mulf %135, %139 : vector<8x256xf32>
    %141 = vector.broadcast %119 : f32 to vector<8x256xf32>
    %142 = arith.addf %140, %141 : vector<8x256xf32>
    %c0_52 = arith.constant 0 : index
    %c0_53 = arith.constant 0 : index
    %143 = vector.load %arg10[%c0_52, %c0_53] : memref<256x256xbf16, #tpu.memory_space<vmem>>, vector<256x256xbf16>
    %c0_54 = arith.constant 0 : index
    %c0_55 = arith.constant 0 : index
    %144 = vector.load %arg11[%c0_54, %c0_55] : memref<1x256xf32, #tpu.memory_space<vmem>>, vector<1x256xf32>
    %c0_56 = arith.constant 0 : index
    %c0_57 = arith.constant 0 : index
    %145 = vector.load %arg12[%c0_56, %c0_57] : memref<256x512xbf16, #tpu.memory_space<vmem>>, vector<256x512xbf16>
    %c0_58 = arith.constant 0 : index
    %c0_59 = arith.constant 0 : index
    %146 = vector.load %arg13[%c0_58, %c0_59] : memref<1x512xf32, #tpu.memory_space<vmem>>, vector<1x512xf32>
    %c0_60 = arith.constant 0 : index
    %c0_61 = arith.constant 0 : index
    %147 = vector.load %arg14[%c0_60, %c0_61] : memref<256x256xbf16, #tpu.memory_space<vmem>>, vector<256x256xbf16>
    %c0_62 = arith.constant 0 : index
    %c0_63 = arith.constant 0 : index
    %148 = vector.load %arg15[%c0_62, %c0_63] : memref<1x256xf32, #tpu.memory_space<vmem>>, vector<1x256xf32>
    %149 = arith.truncf %142 : vector<8x256xf32> to vector<8x256xbf16>
    %cst_64 = arith.constant dense<0.000000e+00> : vector<8x256xf32>
    %150 = tpu.matmul %149, %143, %cst_64 {dimension_numbers = #tpu.dot_dimension_numbers<[1], [0], [0], [1], [0, 0, 1, 1], [], []>} : vector<8x256xbf16>, vector<256x256xbf16>, vector<8x256xf32> -> vector<8x256xf32>
    %151 = vector.broadcast %144 : vector<1x256xf32> to vector<8x256xf32>
    %152 = arith.addf %150, %151 : vector<8x256xf32>
    %153 = arith.truncf %8 : vector<16x256xf32> to vector<16x256xbf16>
    %cst_65 = arith.constant dense<0.000000e+00> : vector<16x512xf32>
    %154 = tpu.matmul %153, %145, %cst_65 {dimension_numbers = #tpu.dot_dimension_numbers<[1], [0], [0], [1], [0, 0, 1, 1], [], []>} : vector<16x256xbf16>, vector<256x512xbf16>, vector<16x512xf32> -> vector<16x512xf32>
    %155 = vector.broadcast %146 : vector<1x512xf32> to vector<16x512xf32>
    %156 = arith.addf %154, %155 : vector<16x512xf32>
    %157 = vector.extract_strided_slice %156 {offsets = [0, 0], sizes = [16, 256], strides = [1, 1]} : vector<16x512xf32> to vector<16x256xf32>
    %158 = vector.extract_strided_slice %156 {offsets = [0, 256], sizes = [16, 256], strides = [1, 1]} : vector<16x512xf32> to vector<16x256xf32>
    %cst_66 = arith.constant 0.0883883461 : f32
    %159 = vector.broadcast %cst_66 : f32 to vector<8x256xf32>
    %160 = arith.mulf %152, %159 : vector<8x256xf32>
    %161 = vector.extract_strided_slice %160 {offsets = [0, 0], sizes = [8, 128], strides = [1, 1]} : vector<8x256xf32> to vector<8x128xf32>
    %162 = vector.extract_strided_slice %160 {offsets = [0, 128], sizes = [8, 128], strides = [1, 1]} : vector<8x256xf32> to vector<8x128xf32>
    %163 = vector.shape_cast %161 : vector<8x128xf32> to vector<1x8x128xf32>
    %164 = vector.shape_cast %162 : vector<8x128xf32> to vector<1x8x128xf32>
    %165 = tpu.concatenate %163, %164 in 0 : vector<1x8x128xf32>, vector<1x8x128xf32> -> vector<2x8x128xf32>
    %166 = arith.truncf %165 : vector<2x8x128xf32> to vector<2x8x128xbf16>
    %167 = vector.extract_strided_slice %157 {offsets = [0, 0], sizes = [16, 128], strides = [1, 1]} : vector<16x256xf32> to vector<16x128xf32>
    %168 = vector.extract_strided_slice %157 {offsets = [0, 128], sizes = [16, 128], strides = [1, 1]} : vector<16x256xf32> to vector<16x128xf32>
    %169 = vector.shape_cast %167 : vector<16x128xf32> to vector<1x16x128xf32>
    %170 = vector.shape_cast %168 : vector<16x128xf32> to vector<1x16x128xf32>
    %171 = tpu.concatenate %169, %170 in 0 : vector<1x16x128xf32>, vector<1x16x128xf32> -> vector<2x16x128xf32>
    %172 = arith.truncf %171 : vector<2x16x128xf32> to vector<2x16x128xbf16>
    %173 = vector.extract_strided_slice %158 {offsets = [0, 0], sizes = [16, 128], strides = [1, 1]} : vector<16x256xf32> to vector<16x128xf32>
    %174 = vector.extract_strided_slice %158 {offsets = [0, 128], sizes = [16, 128], strides = [1, 1]} : vector<16x256xf32> to vector<16x128xf32>
    %175 = vector.shape_cast %173 : vector<16x128xf32> to vector<1x16x128xf32>
    %176 = vector.shape_cast %174 : vector<16x128xf32> to vector<1x16x128xf32>
    %177 = tpu.concatenate %175, %176 in 0 : vector<1x16x128xf32>, vector<1x16x128xf32> -> vector<2x16x128xf32>
    %178 = arith.truncf %177 : vector<2x16x128xf32> to vector<2x16x128xbf16>
    "tpu.trace_start"() <{level = 10 : i32, message = "hqd,hkd->hqk"}> : () -> ()
    %cst_67 = arith.constant dense<0.000000e+00> : vector<2x8x16xf32>
    %179 = tpu.matmul %166, %172, %cst_67 {dimension_numbers = #tpu.dot_dimension_numbers<[2], [2], [1], [1], [0, 0, 0, 1, 1, 1], [0], [0]>} : vector<2x8x128xbf16>, vector<2x16x128xbf16>, vector<2x8x16xf32> -> vector<2x8x16xf32>
    "tpu.trace_stop"() : () -> ()
    %cst_68 = arith.constant dense<0xFF800000> : vector<2x8xf32>
    %180 = vector.multi_reduction <maximumf>, %179, %cst_68 [2] : vector<2x8x16xf32> to vector<2x8xf32>
    %181 = vector.shape_cast %180 : vector<2x8xf32> to vector<2x8x1xf32>
    %182 = vector.broadcast %181 : vector<2x8x1xf32> to vector<2x8x16xf32>
    %183 = arith.subf %179, %182 : vector<2x8x16xf32>
    %184 = math.exp %183 : vector<2x8x16xf32>
    %cst_69 = arith.constant dense<0.000000e+00> : vector<2x8xf32>
    %185 = vector.multi_reduction <add>, %184, %cst_69 [2] : vector<2x8x16xf32> to vector<2x8xf32>
    %186 = vector.shape_cast %185 : vector<2x8xf32> to vector<2x8x1xf32>
    %187 = tpu.reciprocal %186 : vector<2x8x1xf32> -> vector<2x8x1xf32>
    %188 = vector.broadcast %187 : vector<2x8x1xf32> to vector<2x8x16xf32>
    %189 = arith.mulf %184, %188 : vector<2x8x16xf32>
    %190 = arith.truncf %189 : vector<2x8x16xf32> to vector<2x8x16xbf16>
    "tpu.trace_start"() <{level = 10 : i32, message = "hqk,hkd->hqd"}> : () -> ()
    %cst_70 = arith.constant dense<0.000000e+00> : vector<2x8x128xf32>
    %191 = tpu.matmul %190, %178, %cst_70 {dimension_numbers = #tpu.dot_dimension_numbers<[2], [1], [1], [2], [0, 0, 0, 1, 1, 2], [0], [0]>} : vector<2x8x16xbf16>, vector<2x16x128xbf16>, vector<2x8x128xf32> -> vector<2x8x128xf32>
    "tpu.trace_stop"() : () -> ()
    %192 = vector.extract_strided_slice %191 {offsets = [0, 0, 0], sizes = [1, 8, 128], strides = [1, 1, 1]} : vector<2x8x128xf32> to vector<1x8x128xf32>
    %193 = vector.shape_cast %192 : vector<1x8x128xf32> to vector<8x128xf32>
    %194 = vector.extract_strided_slice %191 {offsets = [1, 0, 0], sizes = [1, 8, 128], strides = [1, 1, 1]} : vector<2x8x128xf32> to vector<1x8x128xf32>
    %195 = vector.shape_cast %194 : vector<1x8x128xf32> to vector<8x128xf32>
    %196 = tpu.concatenate %193, %195 in 1 : vector<8x128xf32>, vector<8x128xf32> -> vector<8x256xf32>
    %197 = arith.truncf %196 : vector<8x256xf32> to vector<8x256xbf16>
    %cst_71 = arith.constant dense<0.000000e+00> : vector<8x256xf32>
    %198 = tpu.matmul %197, %147, %cst_71 {dimension_numbers = #tpu.dot_dimension_numbers<[1], [0], [0], [1], [0, 0, 1, 1], [], []>} : vector<8x256xbf16>, vector<256x256xbf16>, vector<8x256xf32> -> vector<8x256xf32>
    %199 = vector.broadcast %148 : vector<1x256xf32> to vector<8x256xf32>
    %200 = arith.addf %198, %199 : vector<8x256xf32>
    %201 = arith.addf %117, %200 : vector<8x256xf32>
    %c2 = arith.constant 2 : index
    %c0_72 = arith.constant 0 : index
    %202 = memref.load %arg20[%c2, %c0_72] : memref<4x2xf32, #tpu.memory_space<smem>>
    %c2_73 = arith.constant 2 : index
    %c1_74 = arith.constant 1 : index
    %203 = memref.load %arg20[%c2_73, %c1_74] : memref<4x2xf32, #tpu.memory_space<smem>>
    %cst_75 = arith.constant dense<0.000000e+00> : vector<8xf32>
    %204 = vector.multi_reduction <add>, %201, %cst_75 [1] : vector<8x256xf32> to vector<8xf32>
    %205 = vector.shape_cast %204 : vector<8xf32> to vector<8x1xf32>
    %cst_76 = arith.constant 2.560000e+02 : f32
    %206 = vector.broadcast %cst_76 : f32 to vector<8x1xf32>
    %207 = arith.divf %205, %206 : vector<8x1xf32>
    %208 = vector.broadcast %207 : vector<8x1xf32> to vector<8x256xf32>
    %209 = arith.subf %201, %208 : vector<8x256xf32>
    %210 = arith.mulf %209, %209 : vector<8x256xf32>
    %cst_77 = arith.constant dense<0.000000e+00> : vector<8xf32>
    %211 = vector.multi_reduction <add>, %210, %cst_77 [1] : vector<8x256xf32> to vector<8xf32>
    %212 = vector.shape_cast %211 : vector<8xf32> to vector<8x1xf32>
    %cst_78 = arith.constant 2.550000e+02 : f32
    %213 = vector.broadcast %cst_78 : f32 to vector<8x1xf32>
    %214 = arith.divf %212, %213 : vector<8x1xf32>
    %215 = math.sqrt %214 : vector<8x1xf32>
    %216 = vector.broadcast %207 : vector<8x1xf32> to vector<8x256xf32>
    %217 = arith.subf %201, %216 : vector<8x256xf32>
    %218 = vector.broadcast %202 : f32 to vector<8x256xf32>
    %219 = arith.mulf %218, %217 : vector<8x256xf32>
    %cst_79 = arith.constant 9.99999997E-7 : f32
    %220 = vector.broadcast %cst_79 : f32 to vector<8x1xf32>
    %221 = arith.addf %215, %220 : vector<8x1xf32>
    %222 = tpu.reciprocal %221 : vector<8x1xf32> -> vector<8x1xf32>
    %223 = vector.broadcast %222 : vector<8x1xf32> to vector<8x256xf32>
    %224 = arith.mulf %219, %223 : vector<8x256xf32>
    %225 = vector.broadcast %203 : f32 to vector<8x256xf32>
    %226 = arith.addf %224, %225 : vector<8x256xf32>
    %227 = arith.truncf %226 : vector<8x256xf32> to vector<8x256xbf16>
    %c0_80 = arith.constant 0 : index
    %c0_81 = arith.constant 0 : index
    %228 = vector.load %arg16[%c0_80, %c0_81] : memref<256x512xbf16, #tpu.memory_space<vmem>>, vector<256x512xbf16>
    %cst_82 = arith.constant dense<0.000000e+00> : vector<8x512xf32>
    %229 = tpu.matmul %227, %228, %cst_82 {dimension_numbers = #tpu.dot_dimension_numbers<[1], [0], [0], [1], [0, 0, 1, 1], [], []>} : vector<8x256xbf16>, vector<256x512xbf16>, vector<8x512xf32> -> vector<8x512xf32>
    %c0_83 = arith.constant 0 : index
    %c0_84 = arith.constant 0 : index
    %230 = vector.load %arg17[%c0_83, %c0_84] : memref<1x512xf32, #tpu.memory_space<vmem>>, vector<1x512xf32>
    %231 = vector.broadcast %230 : vector<1x512xf32> to vector<8x512xf32>
    %232 = arith.addf %229, %231 : vector<8x512xf32>
    %cst_85 = arith.constant 0.000000e+00 : f32
    %233 = vector.broadcast %cst_85 : f32 to vector<8x512xf32>
    %234 = arith.maximumf %232, %233 : vector<8x512xf32>
    %235 = arith.truncf %234 : vector<8x512xf32> to vector<8x512xbf16>
    %c0_86 = arith.constant 0 : index
    %c0_87 = arith.constant 0 : index
    %236 = vector.load %arg18[%c0_86, %c0_87] : memref<512x256xbf16, #tpu.memory_space<vmem>>, vector<512x256xbf16>
    %cst_88 = arith.constant dense<0.000000e+00> : vector<8x256xf32>
    %237 = tpu.matmul %235, %236, %cst_88 {dimension_numbers = #tpu.dot_dimension_numbers<[1], [0], [0], [1], [0, 0, 1, 1], [], []>} : vector<8x512xbf16>, vector<512x256xbf16>, vector<8x256xf32> -> vector<8x256xf32>
    %238 = arith.addf %201, %237 : vector<8x256xf32>
    %c0_89 = arith.constant 0 : index
    %c0_90 = arith.constant 0 : index
    %239 = vector.load %arg19[%c0_89, %c0_90] : memref<1x256xf32, #tpu.memory_space<vmem>>, vector<1x256xf32>
    %240 = vector.broadcast %239 : vector<1x256xf32> to vector<8x256xf32>
    %241 = arith.addf %238, %240 : vector<8x256xf32>
    %c0_91 = arith.constant 0 : index
    %c0_92 = arith.constant 0 : index
    %c0_93 = arith.constant 0 : index
    %242 = vector.load %arg21[%c0_91, %c0_92, %c0_93] : memref<1x8x256xf32, #tpu.memory_space<vmem>>, vector<1x8x256xf32>
    %243 = vector.shape_cast %242 : vector<1x8x256xf32> to vector<8x256xf32>
    %244 = vector.shape_cast %241 : vector<8x256xf32> to vector<1x8x256xf32>
    tpu.vector_store %arg21[%c0_91, %c0_92, %c0_93], %244 {strides = array<i32>} : memref<1x8x256xf32, #tpu.memory_space<vmem>>, vector<1x8x256xf32>,
    return
  }
  func.func @transform_0(%arg0: i32, %arg1: i32) -> (i32, i32, i32) {
    %c0_i32 = arith.constant 0 : i32
    %c0_i32_0 = arith.constant 0 : i32
    %c0_i32_1 = arith.constant 0 : i32
    return %arg0, %c0_i32, %c0_i32_0 : i32, i32, i32
  }
  func.func @transform_1(%arg0: i32, %arg1: i32) -> (i32, i32, i32) {
    %c0_i32 = arith.constant 0 : i32
    %c0_i32_0 = arith.constant 0 : i32
    %c0_i32_1 = arith.constant 0 : i32
    return %arg0, %c0_i32, %c0_i32_0 : i32, i32, i32
  }
  func.func @transform_2(%arg0: i32, %arg1: i32) -> (i32, i32) {
    %c0_i32 = arith.constant 0 : i32
    %c0_i32_0 = arith.constant 0 : i32
    %c0_i32_1 = arith.constant 0 : i32
    return %c0_i32, %c0_i32_0 : i32, i32
  }
  func.func @transform_3(%arg0: i32, %arg1: i32) -> (i32, i32) {
    %c0_i32 = arith.constant 0 : i32
    %c0_i32_0 = arith.constant 0 : i32
    %c0_i32_1 = arith.constant 0 : i32
    return %c0_i32, %c0_i32_0 : i32, i32
  }
  func.func @transform_4(%arg0: i32, %arg1: i32) -> (i32, i32) {
    %c0_i32 = arith.constant 0 : i32
    %c0_i32_0 = arith.constant 0 : i32
    %c0_i32_1 = arith.constant 0 : i32
    return %c0_i32, %c0_i32_0 : i32, i32
  }
  func.func @transform_5(%arg0: i32, %arg1: i32) -> (i32, i32) {
    %c0_i32 = arith.constant 0 : i32
    %c0_i32_0 = arith.constant 0 : i32
    %c0_i32_1 = arith.constant 0 : i32
    return %c0_i32, %c0_i32_0 : i32, i32
  }
  func.func @transform_6(%arg0: i32, %arg1: i32) -> (i32, i32) {
    %c0_i32 = arith.constant 0 : i32
    %c0_i32_0 = arith.constant 0 : i32
    %c0_i32_1 = arith.constant 0 : i32
    return %c0_i32, %c0_i32_0 : i32, i32
  }
  func.func @transform_7(%arg0: i32, %arg1: i32) -> (i32, i32) {
    %c0_i32 = arith.constant 0 : i32
    %c0_i32_0 = arith.constant 0 : i32
    %c0_i32_1 = arith.constant 0 : i32
    return %c0_i32, %c0_i32_0 : i32, i32
  }
  func.func @transform_8(%arg0: i32, %arg1: i32) -> (i32, i32) {
    %c0_i32 = arith.constant 0 : i32
    %c0_i32_0 = arith.constant 0 : i32
    %c0_i32_1 = arith.constant 0 : i32
    return %c0_i32, %c0_i32_0 : i32, i32
  }
  func.func @transform_9(%arg0: i32, %arg1: i32) -> (i32, i32) {
    %c0_i32 = arith.constant 0 : i32
    %c0_i32_0 = arith.constant 0 : i32
    %c0_i32_1 = arith.constant 0 : i32
    return %c0_i32, %c0_i32_0 : i32, i32
  }
  func.func @transform_10(%arg0: i32, %arg1: i32) -> (i32, i32) {
    %c0_i32 = arith.constant 0 : i32
    %c0_i32_0 = arith.constant 0 : i32
    %c0_i32_1 = arith.constant 0 : i32
    return %c0_i32, %c0_i32_0 : i32, i32
  }
  func.func @transform_11(%arg0: i32, %arg1: i32) -> (i32, i32) {
    %c0_i32 = arith.constant 0 : i32
    %c0_i32_0 = arith.constant 0 : i32
    %c0_i32_1 = arith.constant 0 : i32
    return %c0_i32, %c0_i32_0 : i32, i32
  }
  func.func @transform_12(%arg0: i32, %arg1: i32) -> (i32, i32) {
    %c0_i32 = arith.constant 0 : i32
    %c0_i32_0 = arith.constant 0 : i32
    %c0_i32_1 = arith.constant 0 : i32
    return %c0_i32, %c0_i32_0 : i32, i32
  }
  func.func @transform_13(%arg0: i32, %arg1: i32) -> (i32, i32) {
    %c0_i32 = arith.constant 0 : i32
    %c0_i32_0 = arith.constant 0 : i32
    %c0_i32_1 = arith.constant 0 : i32
    return %c0_i32, %c0_i32_0 : i32, i32
  }
  func.func @transform_14(%arg0: i32, %arg1: i32) -> (i32, i32) {
    %c0_i32 = arith.constant 0 : i32
    %c0_i32_0 = arith.constant 0 : i32
    %c0_i32_1 = arith.constant 0 : i32
    return %c0_i32, %c0_i32_0 : i32, i32
  }
  func.func @transform_15(%arg0: i32, %arg1: i32) -> (i32, i32) {
    %c0_i32 = arith.constant 0 : i32
    %c0_i32_0 = arith.constant 0 : i32
    %c0_i32_1 = arith.constant 0 : i32
    return %c0_i32, %c0_i32_0 : i32, i32
  }
  func.func @transform_16(%arg0: i32, %arg1: i32) -> (i32, i32) {
    %c0_i32 = arith.constant 0 : i32
    %c0_i32_0 = arith.constant 0 : i32
    %c0_i32_1 = arith.constant 0 : i32
    return %c0_i32, %c0_i32_0 : i32, i32
  }
  func.func @transform_17(%arg0: i32, %arg1: i32) -> (i32, i32) {
    %c0_i32 = arith.constant 0 : i32
    %c0_i32_0 = arith.constant 0 : i32
    %c0_i32_1 = arith.constant 0 : i32
    return %c0_i32, %c0_i32_0 : i32, i32
  }
  func.func @transform_18(%arg0: i32, %arg1: i32) -> (i32, i32) {
    %c0_i32 = arith.constant 0 : i32
    %c0_i32_0 = arith.constant 0 : i32
    %c0_i32_1 = arith.constant 0 : i32
    return %c0_i32, %c0_i32_0 : i32, i32
  }
  func.func @transform_19(%arg0: i32, %arg1: i32) -> (i32, i32, i32) {
    %c0_i32 = arith.constant 0 : i32
    %c0_i32_0 = arith.constant 0 : i32
    return %arg0, %arg1, %c0_i32 : i32, i32, i32
  }
}

</mosaic_0001>

<bundles_post_ra>
// kernel: tpu_custom_call.1
= control target key start
LH: loop header
LB: loop body
LE: loop exit
PB: predicated region body
PF: predicated region fallthrough
CT: control target
= control target key end

     0   :  { %s7193_s0 = inlined_call_operand.hbm [shape: f32[2,16,256], index: 0, kind: input, shape index: {}]   ;;  %s7194_s1 = inlined_call_operand.hbm [shape: f32[2,16,256], index: 1, kind: input, shape index: {}]   ;;  %s7195_s2 = inlined_call_operand.hbm [shape: bf16[256,256], index: 2, kind: input, shape index: {}]   ;;  %s7196_s3 = inlined_call_operand.vmem [shape: f32[1,256], index: 3, kind: input, shape index: {}]   ;;  %s7197_s4 = inlined_call_operand.hbm [shape: bf16[256,512], index: 4, kind: input, shape index: {}]   ;;  %s7198_s5 = inlined_call_operand.vmem [shape: f32[1,512], index: 5, kind: input, shape index: {}]   ;;  %s7199_s6 = inlined_call_operand.hbm [shape: bf16[256,256], index: 6, kind: input, shape index: {}]   ;;  %s7200_s7 = inlined_call_operand.vmem [shape: f32[1,256], index: 7, kind: input, shape index: {}]   ;;  %s7201_s8 = inlined_call_operand.hbm [shape: bf16[256,256], index: 8, kind: input, shape index: {}]   ;;  %s7202_s9 = inlined_call_operand.vmem [shape: f32[1,256], index: 9, kind: input, shape index: {}]   ;;  %s7203_s10 = inlined_call_operand.hbm [shape: bf16[256,512], index: 10, kind: input, shape index: {}]   ;;  %s7204_s11 = inlined_call_operand.vmem [shape: f32[1,512], index: 11, kind: input, shape index: {}]   ;;  %s7205_s12 = inlined_call_operand.hbm [shape: bf16[256,256], index: 12, kind: input, shape index: {}]   ;;  %s7206_s13 = inlined_call_operand.vmem [shape: f32[1,256], index: 13, kind: input, shape index: {}]   ;;  %s7207_s14 = inlined_call_operand.hbm [shape: bf16[256,512], index: 14, kind: input, shape index: {}]   ;;  %s7208_s15 = inlined_call_operand.vmem [shape: f32[1,512], index: 15, kind: input, shape index: {}]   ;;  %s7209_s16 = inlined_call_operand.hbm [shape: bf16[512,256], index: 16, kind: input, shape index: {}]   ;;  %s7210_s17 = inlined_call_operand.vmem [shape: f32[1,256], index: 17, kind: input, shape index: {}]   ;;  %s7211_s18 = inlined_call_operand.vmem [shape: f32[4,2], index: 18, kind: input, shape index: {}]   ;;  %s7212_s19 = inlined_call_operand.hbm [shape: f32[2,16,256], index: 19, kind: output, shape index: {}]  }
   0x1   :  { %7235 = sst [smem:[#allocation37_spill]] %s7193_s0 }
   0x2   :  { %7236 = sst [smem:[#allocation38_spill]] %s7194_s1 }
   0x3   :  { %7237 = sst [smem:[#allocation39_spill]] %s7195_s2 }
   0x4   :  { %7238 = sst [smem:[#allocation40_spill]] %s7196_s3 }
   0x5   :  { %7239 = sst [smem:[#allocation41_spill]] %s7197_s4 }
   0x6   :  { %7240 = sst [smem:[#allocation42_spill]] %s7198_s5 }
   0x7   :  { %7241 = sst [smem:[#allocation43_spill]] %s7199_s6 }
   0x8   :  { %7242 = sst [smem:[#allocation44_spill]] %s7200_s7 }
   0x9   :  { %7243 = sst [smem:[#allocation45_spill]] %s7201_s8 }
   0xa   :  { %7244 = sst [smem:[#allocation46_spill]] %s7202_s9 }
   0xb   :  { %7245 = sst [smem:[#allocation47_spill]] %s7203_s10 }
   0xc   :  { %7246 = sst [smem:[#allocation48_spill]] %s7204_s11 }
   0xd   :  { %7247 = sst [smem:[#allocation49_spill]] %s7205_s12 }
   0xe   :  { %7248 = sst [smem:[#allocation50_spill]] %s7206_s13 }
   0xf   :  { %7249 = sst [smem:[#allocation51_spill]] %s7207_s14 }
  0x10   :  { %7250 = sst [smem:[#allocation52_spill]] %s7208_s15 }
  0x11   :  { %7251 = sst [smem:[#allocation53_spill]] %s7209_s16 }
  0x12   :  { %7252 = sst [smem:[#allocation54_spill]] %s7210_s17 }
  0x13   :  { %7253 = sst [smem:[#allocation55_spill]] %s7211_s18 }
  0x14   :  { %7254 = sst [smem:[#allocation56_spill]] %s7212_s19 }
  0x15   :  { %24 = vsyncpa [#allocation3], 0 }
  0x16   :  { %26 = vsyncpa [#allocation3 + $0x1], 0 }
  0x17   :  { %27 = vsyncpa [#allocation7], 0 }
  0x18   :  { %29 = vsyncpa [#allocation7 + $0x1], 0 }
  0x19   :  { %30 = vsyncpa [#allocation10], 0 }
  0x1a   :  { %31 = vsyncpa [#allocation13], 0 }
  0x1b   :  { %32 = vsyncpa [#allocation16], 0 }
  0x1c   :  { %33 = vsyncpa [#allocation19], 0 }
  0x1d   :  { %34 = vsyncpa [#allocation5], 0 }
  0x1e   :  { %35 = vsyncpa [#allocation4], 0 }
  0x1f   :  { %37 = vsyncpa [#allocation4 + $0x1], 0  ;;  %s6432_s0 = smov 0   ;;  %s6434_s30 = smov 0  }
  0x20   :  { %s6436_s20 = smov 0   ;;  %s6438_s21 = smov 0  }
  0x21   :  { %s6440_s1 = smov 0   ;;  %s6442_s22 = smov 0  }
  0x22   :  { %s6444_s2 = smov 0   ;;  %s6446_s23 = smov 0  }
  0x23   :  { %s6448_s24 = smov 0   ;;  %s6450_s25 = smov 0  }
  0x24   :  { %s6452_s3 = smov 0  }
  0x25 LB: > { %7255 = sst [smem:[#allocation31_spill]] %s6272_s0  ;;  %s6488_s26 = sadd.s32 4294967295, %s6312_s3   ;;  %s6312_s3 = sphi %s6452_s3, %s43_s3   ;;  %s6308_s25 = sphi %s6450_s25, %s7329_s25   ;;  %s6304_s24 = sphi %s6448_s24, %s7328_s24   ;;  %s6300_s23 = sphi %s6446_s23, %s7327_s23   ;;  %s6296_s2 = sphi %s6444_s2, %s7326_s2   ;;  %s6292_s22 = sphi %s6442_s22, %s7325_s22   ;;  %s6288_s1 = sphi %s6440_s1, %s7324_s1   ;;  %s6284_s21 = sphi %s6438_s21, %s7323_s21   ;;  %s6280_s20 = sphi %s6436_s20, %s7322_s20   ;;  %s6276_s30 = sphi %s6434_s30, %s7321_s30   ;;  %s6272_s0 = sphi %s6432_s0, %s7320_s0  }
  0x26   : > { %7256 = sst [smem:[#allocation32_spill]] %s6276_s30  ;;  %p4546_p0 = scmp.ge.s32.totalorder %s6312_s3, 1 }
  0x27   : > { %7257 = sst [smem:[#allocation33_spill]] %s6280_s20  ;;  %p7218_p1 = scmp.eq.s32.totalorder %s6488_s26, 0 }
  0x28   : > { %7258 = sst [smem:[#allocation34_spill]] %s6296_s2  ;;  %p497_p2 = scmp.lt.s32.totalorder %s6312_s3, 5 }
  0x29   : > { %7259 = sst [smem:[#allocation35_spill]] %s6300_s23  ;;  %s6314_s28 = smov [#allocation8]  }
  0x2a   : > { %p6493_p3 = pnand %p4546_p0, %p497_p2  ;;  %s509_s29 = sshll.u32 %s6314_s28, 4  ;;  %s510_s29 = int_to_ptr.vmem [resolvable:$true] %s509_s29 }
  0x2b   : > { %s6315_s17 = smov [#allocation9]   ;;  %s7263_s9 = sld [smem:[#allocation39_spill]] }
  0x2c   : > { %s7260_s27 = scalar_select %p6493_p3, 1, 0 }
  0x2d   : > { %p5087_p4 = pneg %p6493_p3  ;;  %s525_s23 = sshll.u32 %s6315_s17, 4  ;;  %s6505_s23 = int_to_ptr.vmem [resolvable:$true] %s525_s23 }
  0x2e   : > { %7261 = sst [smem:[#allocation36_spill]] %s7260_s27 }
  0x2f   : > { %p6501_p5 = pnand %p5087_p4, %p7218_p1 }
  0x31   : > { %s5863_s11 = scalar_lea.hbm %s7263_s9, 4096  ;;  %p6515_p7 = pneg %p6501_p5 }
  0x32   : > { %p5864_p6 = scmp.ne.s32.totalorder %s7263_s9, %s5863_s11  ;;  %p5870_p10 = scmp.lt.u32.totalorder %s5863_s11, %s7263_s9 }
  0x34   : > { %p5866_p8 = pnand %p6515_p7, %p5864_p6 }
  0x36   : > { %p5867_p9 = pneg %p5866_p8 }
  0x38   : > { %p5872_p11 = pnand %p5870_p10, %p5867_p9 }
  0x3a   : > { %5875 = shalt.err (!%p5872_p11)
}
  0x3b   : > { %s5876_s13 = scalar_lea.vmem %s510_s29, 4096  ;;  %p5884_p2 = scmp.lt.s32.totalorder %s510_s29, %s510_s29 }
  0x3c   : > { %p5877_p12 = scmp.ne.s32.totalorder %s510_s29, %s5876_s13  ;;  %p5885_p4 = scmp.lt.s32.totalorder %s5876_s13, %s5876_s13 }
  0x3e   : > { %p5879_p13 = pnand %p5877_p12, %p6515_p7  ;;  %p5886_p1 = por %p5885_p4, %p5884_p2 }
  0x40   : > { %p5880_p0 = pneg %p5879_p13 }
  0x42   : > { %p5887_p3 = pnand %p5886_p1, %p5880_p0 }
  0x44   : > { %5890 = shalt.err (!%p5887_p3)
}
  0x45   : > { %s7223_s5 = smov 128   ;;  %s7225_s7 = smov 8  }
  0x46   : > { %5090 = dma.hbm_to_vmem [thread:$0]  (!%p6501_p5), %s7263_s9, 4096, %s510_s29, [#allocation7], %s7223_s5, %s7223_s5, %s7225_s7  }
  0x47   : > { %s7265_s4 = sld [smem:[#allocation41_spill]] }
  0x4d   : > { %s5891_s27 = scalar_lea.hbm %s7265_s4, 8192 }
  0x4e   : > { %p5892_p1 = scmp.ne.s32.totalorder %s7265_s4, %s5891_s27  ;;  %p5898_p8 = scmp.lt.u32.totalorder %s5891_s27, %s7265_s4 }
  0x50   : > { %p5894_p3 = pnand %p5892_p1, %p6515_p7 }
  0x52   : > { %p5895_p6 = pneg %p5894_p3 }
  0x54   : > { %p5900_p9 = pnand %p5898_p8, %p5895_p6 }
  0x56   : > { %5903 = shalt.err (!%p5900_p9)
}
  0x57   : > { %s5904_s29 = scalar_lea.vmem %s6505_s23, 8192  ;;  %p5912_p13 = scmp.lt.s32.totalorder %s6505_s23, %s6505_s23 }
  0x58   : > { %p5905_p10 = scmp.ne.s32.totalorder %s6505_s23, %s5904_s29  ;;  %p5913_p0 = scmp.lt.s32.totalorder %s5904_s29, %s5904_s29 }
  0x5a   : > { %p5907_p11 = pnand %p5905_p10, %p6515_p7  ;;  %p5914_p2 = por %p5913_p0, %p5912_p13 }
  0x5c   : > { %p5908_p12 = pneg %p5907_p11 }
  0x5e   : > { %p5915_p4 = pnand %p5914_p2, %p5908_p12 }
  0x60   : > { %5918 = shalt.err (!%p5915_p4)
}
  0x61   : > { %s7228_s0 = smov 256   ;;  %s7230_s30 = smov 16  }
  0x62   : > { %5093 = dma.hbm_to_vmem [thread:$0]  (!%p6501_p5), %s7265_s4, 8192, %s6505_s23, [#allocation10], %s7228_s0, %s7228_s0, %s7230_s30  }
  0x63   : > { %s6320_s11 = smov [#allocation12]   ;;  %s6321_s2 = smov [#allocation15]  }
  0x64   : > { %s557_s15 = sshll.u32 %s6320_s11, 4  ;;  %s589_s17 = sshll.u32 %s6321_s2, 4  ;;  %s558_s15 = int_to_ptr.vmem [resolvable:$true] %s557_s15  ;;  %s6560_s17 = int_to_ptr.vmem [resolvable:$true] %s589_s17 }
  0x65   : > { %s7266_s8 = sld [smem:[#allocation45_spill]] }
  0x6b   : > { %s5919_s5 = scalar_lea.hbm %s7266_s8, 4096 }
  0x6c   : > { %p5920_p1 = scmp.ne.s32.totalorder %s7266_s8, %s5919_s5  ;;  %p5926_p8 = scmp.lt.u32.totalorder %s5919_s5, %s7266_s8 }
  0x6e   : > { %p5922_p3 = pnand %p5920_p1, %p6515_p7 }
  0x70   : > { %p5923_p6 = pneg %p5922_p3 }
  0x72   : > { %p5928_p9 = pnand %p5926_p8, %p5923_p6 }
  0x74   : > { %5931 = shalt.err (!%p5928_p9)
}
  0x75   : > { %s5932_s27 = scalar_lea.vmem %s558_s15, 4096  ;;  %p5940_p13 = scmp.lt.s32.totalorder %s558_s15, %s558_s15 }
  0x76   : > { %p5933_p10 = scmp.ne.s32.totalorder %s558_s15, %s5932_s27  ;;  %p5941_p0 = scmp.lt.s32.totalorder %s5932_s27, %s5932_s27 }
  0x78   : > { %p5935_p11 = pnand %p5933_p10, %p6515_p7  ;;  %p5942_p2 = por %p5941_p0, %p5940_p13 }
  0x7a   : > { %p5936_p12 = pneg %p5935_p11 }
  0x7c   : > { %p5943_p4 = pnand %p5942_p2, %p5936_p12 }
  0x7e   : > { %5946 = shalt.err (!%p5943_p4)
}
  0x7f   : > { %s7267_s9 = smov 8   ;;  %s7268_s7 = smov 128  }
  0x80   : > { %5099 = dma.hbm_to_vmem [thread:$0]  (!%p6501_p5), %s7266_s8, 4096, %s558_s15, [#allocation13], %s7268_s7, %s7268_s7, %s7267_s9  }
  0x81   : > { %s7269_s12 = sld [smem:[#allocation49_spill]] }
  0x87   : > { %s5947_s29 = scalar_lea.hbm %s7269_s12, 4096 }
  0x88   : > { %p5948_p1 = scmp.ne.s32.totalorder %s7269_s12, %s5947_s29  ;;  %p5954_p8 = scmp.lt.u32.totalorder %s5947_s29, %s7269_s12 }
  0x8a   : > { %p5950_p3 = pnand %p5948_p1, %p6515_p7 }
  0x8c   : > { %p5951_p6 = pneg %p5950_p3 }
  0x8e   : > { %p5956_p9 = pnand %p5954_p8, %p5951_p6 }
  0x90   : > { %5959 = shalt.err (!%p5956_p9)
}
  0x91   : > { %s5960_s15 = scalar_lea.vmem %s6560_s17, 4096  ;;  %p5968_p13 = scmp.lt.s32.totalorder %s6560_s17, %s6560_s17 }
  0x92   : > { %p5961_p10 = scmp.ne.s32.totalorder %s6560_s17, %s5960_s15  ;;  %p5969_p0 = scmp.lt.s32.totalorder %s5960_s15, %s5960_s15 }
  0x94   : > { %p5963_p11 = pnand %p5961_p10, %p6515_p7  ;;  %p5970_p2 = por %p5969_p0, %p5968_p13 }
  0x96   : > { %p5964_p12 = pneg %p5963_p11 }
  0x98   : > { %p5971_p4 = pnand %p5970_p2, %p5964_p12 }
  0x9a   : > { %5974 = shalt.err (!%p5971_p4)
}
  0x9b   : > { %5105 = dma.hbm_to_vmem [thread:$0]  (!%p6501_p5), %s7269_s12, 4096, %s6560_s17, [#allocation16], %s7268_s7, %s7268_s7, %s7267_s9  }
  0x9c   : > { %s6322_s5 = smov [#allocation11]   ;;  %s6323_s13 = smov [#allocation14]  }
  0x9d   : > { %s541_s2 = sshll.u32 %s6322_s5, 4  ;;  %s573_s29 = sshll.u32 %s6323_s13, 4  ;;  %s542_s2 = int_to_ptr.vmem [resolvable:$true] %s541_s2  ;;  %s6609_s29 = int_to_ptr.vmem [resolvable:$true] %s573_s29 }
  0x9e   : > { %s7270_s6 = sld [smem:[#allocation43_spill]] }
  0xa4   : > { %s5975_s27 = scalar_lea.hbm %s7270_s6, 4096 }
  0xa5   : > { %p5976_p1 = scmp.ne.s32.totalorder %s7270_s6, %s5975_s27  ;;  %p5982_p8 = scmp.lt.u32.totalorder %s5975_s27, %s7270_s6 }
  0xa7   : > { %p5978_p3 = pnand %p5976_p1, %p6515_p7 }
  0xa9   : > { %p5979_p6 = pneg %p5978_p3 }
  0xab   : > { %p5984_p9 = pnand %p5982_p8, %p5979_p6 }
  0xad   : > { %5987 = shalt.err (!%p5984_p9)
}
  0xae   : > { %s5988_s11 = scalar_lea.vmem %s542_s2, 4096  ;;  %p5996_p13 = scmp.lt.s32.totalorder %s542_s2, %s542_s2 }
  0xaf   : > { %p5989_p10 = scmp.ne.s32.totalorder %s542_s2, %s5988_s11  ;;  %p5997_p0 = scmp.lt.s32.totalorder %s5988_s11, %s5988_s11 }
  0xb1   : > { %p5991_p11 = pnand %p5989_p10, %p6515_p7  ;;  %p5998_p2 = por %p5997_p0, %p5996_p13 }
  0xb3   : > { %p5992_p12 = pneg %p5991_p11 }
  0xb5   : > { %p5999_p4 = pnand %p5998_p2, %p5992_p12 }
  0xb7   : > { %6002 = shalt.err (!%p5999_p4)
}
  0xb8   : > { %5096 = dma.hbm_to_vmem [thread:$0]  (!%p6501_p5), %s7270_s6, 4096, %s542_s2, [#allocation10], %s7268_s7, %s7268_s7, %s7267_s9  }
  0xb9   : > { %s7271_s10 = sld [smem:[#allocation47_spill]] }
  0xbf   : > { %s6003_s23 = scalar_lea.hbm %s7271_s10, 8192 }
  0xc0   : > { %p6004_p1 = scmp.ne.s32.totalorder %s7271_s10, %s6003_s23  ;;  %p6010_p8 = scmp.lt.u32.totalorder %s6003_s23, %s7271_s10 }
  0xc2   : > { %p6006_p3 = pnand %p6004_p1, %p6515_p7 }
  0xc4   : > { %p6007_p6 = pneg %p6006_p3 }
  0xc6   : > { %p6012_p9 = pnand %p6010_p8, %p6007_p6 }
  0xc8   : > { %6015 = shalt.err (!%p6012_p9)
}
  0xc9   : > { %s6016_s2 = scalar_lea.vmem %s6609_s29, 8192  ;;  %p6024_p13 = scmp.lt.s32.totalorder %s6609_s29, %s6609_s29 }
  0xca   : > { %p6017_p10 = scmp.ne.s32.totalorder %s6609_s29, %s6016_s2  ;;  %p6025_p0 = scmp.lt.s32.totalorder %s6016_s2, %s6016_s2 }
  0xcc   : > { %p6019_p11 = pnand %p6017_p10, %p6515_p7  ;;  %p6026_p2 = por %p6025_p0, %p6024_p13 }
  0xce   : > { %p6020_p12 = pneg %p6019_p11 }
  0xd0   : > { %p6027_p4 = pnand %p6026_p2, %p6020_p12 }
  0xd2   : > { %6030 = shalt.err (!%p6027_p4)
}
  0xd3   : > { %s7272_s11 = smov 16   ;;  %s7273_s30 = smov 256  }
  0xd4   : > { %5102 = dma.hbm_to_vmem [thread:$0]  (!%p6501_p5), %s7271_s10, 8192, %s6609_s29, [#allocation13], %s7273_s30, %s7273_s30, %s7272_s11  }
  0xd5   : > { %s6324_s20 = smov [#allocation17]   ;;  %s6325_s27 = smov [#allocation18]  }
  0xd6   : > { %s605_s23 = sshll.u32 %s6324_s20, 4  ;;  %s621_s15 = sshll.u32 %s6325_s27, 4  ;;  %s606_s23 = int_to_ptr.vmem [resolvable:$true] %s605_s23  ;;  %s6658_s15 = int_to_ptr.vmem [resolvable:$true] %s621_s15 }
  0xd7   : > { %s7274_s14 = sld [smem:[#allocation51_spill]] }
  0xdd   : > { %s6031_s2 = scalar_lea.hbm %s7274_s14, 8192 }
  0xde   : > { %p6032_p1 = scmp.ne.s32.totalorder %s7274_s14, %s6031_s2  ;;  %p6038_p8 = scmp.lt.u32.totalorder %s6031_s2, %s7274_s14 }
  0xe0   : > { %p6034_p3 = pnand %p6032_p1, %p6515_p7 }
  0xe2   : > { %p6035_p6 = pneg %p6034_p3 }
  0xe4   : > { %p6040_p9 = pnand %p6038_p8, %p6035_p6 }
  0xe6   : > { %6043 = shalt.err (!%p6040_p9)
}
  0xe7   : > { %s6044_s13 = scalar_lea.vmem %s606_s23, 8192  ;;  %p6052_p13 = scmp.lt.s32.totalorder %s606_s23, %s606_s23 }
  0xe8   : > { %p6045_p10 = scmp.ne.s32.totalorder %s606_s23, %s6044_s13  ;;  %p6053_p0 = scmp.lt.s32.totalorder %s6044_s13, %s6044_s13 }
  0xea   : > { %p6047_p11 = pnand %p6045_p10, %p6515_p7  ;;  %p6054_p2 = por %p6053_p0, %p6052_p13 }
  0xec   : > { %p6048_p12 = pneg %p6047_p11 }
  0xee   : > { %p6055_p4 = pnand %p6054_p2, %p6048_p12 }
  0xf0   : > { %6058 = shalt.err (!%p6055_p4)
}
  0xf1   : > { %5108 = dma.hbm_to_vmem [thread:$0]  (!%p6501_p5), %s7274_s14, 8192, %s606_s23, [#allocation16], %s7273_s30, %s7273_s30, %s7272_s11  }
  0xf2   : > { %s7275_s16 = sld [smem:[#allocation53_spill]] }
  0xf8   : > { %s6059_s0 = scalar_lea.hbm %s7275_s16, 8192 }
  0xf9   : > { %p6060_p1 = scmp.ne.s32.totalorder %s7275_s16, %s6059_s0  ;;  %p6066_p8 = scmp.lt.u32.totalorder %s6059_s0, %s7275_s16 }
  0xfb   : > { %p6062_p3 = pnand %p6060_p1, %p6515_p7 }
  0xfd   : > { %p6063_p6 = pneg %p6062_p3 }
  0xff   : > { %p6068_p9 = pnand %p6066_p8, %p6063_p6 }
 0x101   : > { %6071 = shalt.err (!%p6068_p9)
}
 0x102   : > { %s6072_s23 = scalar_lea.vmem %s6658_s15, 8192  ;;  %p6080_p13 = scmp.lt.s32.totalorder %s6658_s15, %s6658_s15 }
 0x103   : > { %p6073_p10 = scmp.ne.s32.totalorder %s6658_s15, %s6072_s23  ;;  %p6081_p0 = scmp.lt.s32.totalorder %s6072_s23, %s6072_s23 }
 0x105   : > { %p6075_p11 = pnand %p6073_p10, %p6515_p7  ;;  %p6082_p2 = por %p6081_p0, %p6080_p13 }
 0x107   : > { %p6076_p12 = pneg %p6075_p11 }
 0x109   : > { %p6083_p4 = pnand %p6082_p2, %p6076_p12 }
 0x10b   : > { %6086 = shalt.err (!%p6083_p4)
}
 0x10c   : > { %5111 = dma.hbm_to_vmem [thread:$0]  (!%p6501_p5), %s7275_s16, 8192, %s6658_s15, [#allocation19], %s7268_s7, %s7268_s7, %s7267_s9  }
 0x10d   : > { %s7276_s18 = sld [smem:[#allocation55_spill]] }
 0x113   : > { %s638_s27 = sshll.u32 %s7276_s18, 4  ;;  %s639_s27 = int_to_ptr.vmem [resolvable:$true] %s638_s27 }
 0x114   : > { %s6087_s0 = scalar_lea.vmem %s639_s27, 64  ;;  %p6095_p8 = scmp.lt.s32.totalorder %s639_s27, %s639_s27 }
 0x115   : > { %p6088_p1 = scmp.ne.s32.totalorder %s639_s27, %s6087_s0  ;;  %p6096_p9 = scmp.lt.s32.totalorder %s6087_s0, %s6087_s0 }
 0x117   : > { %p6090_p3 = pnand %p6088_p1, %p6515_p7  ;;  %p6097_p10 = por %p6096_p9, %p6095_p8 }
 0x119   : > { %p6091_p6 = pneg %p6090_p3 }
 0x11b   : > { %p6098_p11 = pnand %p6097_p10, %p6091_p6 }
 0x11d   : > { %6101 = shalt.err (!%p6098_p11)
}
 0x11e   : > { %s6326_s17 = smov [#allocation20]   ;;  %s7277_s28 = sld [smem:[#allocation33_spill]] }
 0x11f   : > { %5114 = dma.vmem_to_smem (!%p6501_p5), %s639_s27, 64, %s6326_s17, [#allocation5]  }
 0x120   : > { %s4545_s9 = sadd.s32 4294967294, %s6312_s3   ;;  %s7278_s7 = sld [smem:[#allocation32_spill]] }
 0x121   : > { %s52_s15 = sadd.s32 1, %s6304_s24  ;;  %s55_s19 = sadd.s32 1, %s6308_s25 }
 0x122   : > { %p53_p7 = scmp.ge.s32.totalorder %s52_s15, 2  ;;  %s7279_s2 = sld [smem:[#allocation31_spill]] }
 0x123   : > { %s62_s5 = sadd.s32 1, %s6292_s22  ;;  %p69_p12 = scmp.ne.s32.totalorder %s6292_s22, %s6288_s1 }
 0x124   : > { %p70_p13 = scmp.eq.s32.totalorder %s6312_s3, 0  ;;  %s7331_s15 = smov (%p53_p7, %s52_s15), 0 }
 0x125   : > { %s7333_s19 = smov (!%p53_p7, %s55_s19), %s6308_s25  ;;  %p75_p5 = scmp.ne.s32.totalorder %s6288_s1, %s6284_s21 }
 0x126   : > { %p6724_p0 = por %p70_p13, %p69_p12  ;;  %p57_p2 = scmp.ge.s32.totalorder %s7333_s19, 2 }
 0x127   : > { %s469_s23 = ssub.s32 %s6304_s24, %s7331_s15  ;;  %p7281_p4 = scmp.eq.s32.totalorder %s6488_s26, 0 }
 0x128   : > { %s473_s4 = sadd.s32 1, %s7277_s28  ;;  %s7335_s19 = smov (%p57_p2, %s7333_s19), 0 }
 0x129   : > { %p6734_p1 = por %p7281_p4, %p75_p5  ;;  %p483_p3 = scmp.ne.s32.totalorder %s7277_s28, %s7278_s7 }
 0x12a   : > { %p484_p6 = scmp.eq.s32.totalorder %s6488_s26, 3  ;;  %s59_s6 = ssub.s32 %s6308_s25, %s7335_s19 }
 0x12b   : > { %p489_p8 = scmp.ne.s32.totalorder %s7278_s7, %s7279_s2  ;;  %p60_p9 = scmp.eq.s32.totalorder %s59_s6, 0 }
 0x12c   : > { %s470_s21 = sor.u32 %s469_s23, %s59_s6  ;;  %p6748_p11 = por %p484_p6, %p483_p3 }
 0x12d   : > { %p471_p10 = scmp.eq.s32.totalorder %s470_s21, 0  ;;  %p490_p7 = scmp.eq.s32.totalorder %s4545_s9, 3 }
 0x12e   : > { %s7283_s20 = scalar_select %p6748_p11, 1, 0 }
 0x12f   : > { %s6753_s27 = scalar_select %p60_p9, %s6292_s22, %s62_s5  }
 0x130   : > { %s7337_s28 = smov (!%p471_p10, %s7277_s28), %s473_s4  ;;  %p5135_p12 = scmp.lt.s32.totalorder %s6312_s3, 4 }
 0x131   : > { %s649_s0 = sand.u32 1, %s6292_s22   ;;  %s7232_s17 = sshll.u32 %s6308_s25, 9 }
 0x132   : > { %p6761_p13 = por %p490_p7, %p489_p8  ;;  %s6765_s7 = sshll.u32 %s649_s0, 5 }
 0x133   : > { %s7285_s6 = sld [smem:[#allocation37_spill]]  ;;  %p6776_p5 = pnand %p5135_p12, %p6724_p0 }
 0x134   : > { %s7284_s8 = scalar_select %p6761_p13, 1, 0 }
 0x135   : > { %s653_s5 = scalar_lea.vmem [#allocation2], %s6765_s7  ;;  %s6783_s10 = scalar_lea.sflag [#allocation3], %s649_s0 }
 0x136   : > { %s660_s4 = sshll.u32 %s653_s5, 4  ;;  %p6104_p4 = pneg %p6776_p5  ;;  %s6781_s4 = int_to_ptr.vmem [resolvable:$true] %s660_s4 }
 0x139   : > { %s6772_s21 = scalar_lea.hbm %s7285_s6, %s7232_s17  ;;  %s6107_s17 = scalar_lea.hbm %s7285_s6, 1024 }
 0x13a   : > { %s6102_s2 = scalar_lea.hbm %s6772_s21, 512  ;;  %p6108_p0 = scmp.lt.u32.totalorder %s6772_s21, %s7285_s6 }
 0x13b   : > { %p6103_p2 = scmp.ne.s32.totalorder %s6772_s21, %s6102_s2  ;;  %p6109_p8 = scmp.lt.u32.totalorder %s6107_s17, %s6102_s2 }
 0x13c   : > { %p6111_p10 = scmp.lt.u32.totalorder %s6102_s2, %s6772_s21 }
 0x13d   : > { %p6105_p3 = pnand %p6104_p4, %p6103_p2  ;;  %p6110_p9 = por %p6109_p8, %p6108_p0 }
 0x13f   : > { %p6106_p6 = pneg %p6105_p3  ;;  %p6112_p7 = por %p6111_p10, %p6110_p9 }
 0x141   : > { %p6113_p12 = pnand %p6112_p7, %p6106_p6 }
 0x143   : > { %6116 = shalt.err (!%p6113_p12)
}
 0x144   : > { %s6117_s0 = scalar_lea.vmem %s6781_s4, 512  ;;  %s6327_s5 = smov [#allocation2]  }
 0x145   : > { %p6118_p2 = scmp.ne.s32.totalorder %s6781_s4, %s6117_s0  ;;  %s6122_s29 = sshll.u32 %s6327_s5, 4  ;;  %s6123_s29 = int_to_ptr.vmem [resolvable:$false] %s6122_s29 }
 0x146   : > { %s6124_s12 = scalar_lea.vmem %s6123_s29, 1024  ;;  %p6125_p11 = scmp.lt.s32.totalorder %s6781_s4, %s6123_s29 }
 0x147   : > { %p6120_p3 = pnand %p6118_p2, %p6104_p4  ;;  %p6126_p0 = scmp.lt.s32.totalorder %s6124_s12, %s6117_s0 }
 0x149   : > { %p6121_p13 = pneg %p6120_p3  ;;  %p6127_p8 = por %p6126_p0, %p6125_p11 }
 0x14b   : > { %p6128_p9 = pnand %p6127_p8, %p6121_p13 }
 0x14d   : > { %6131 = shalt.err (!%p6128_p9)
}
 0x14e   : > { %5118 = dma.hbm_to_vmem [thread:$0]  (!%p6776_p5), %s6772_s21, 512, %s6781_s4, %s6783_s10, %s7273_s30, %s7273_s30, %s7272_s11  }
 0x14f   : > { %s7287_s14 = sshll.u32 %s6308_s25, 9  ;;  %s7288_s23 = sld [smem:[#allocation38_spill]] }
 0x150   : > { %s674_s29 = scalar_lea.vmem [#allocation6], %s6765_s7  ;;  %s670_s6 = sand.u32 1, %s6312_s3  }
 0x151   : > { %s681_s12 = sshll.u32 %s674_s29, 4  ;;  %s6825_s16 = scalar_lea.sflag [#allocation7], %s670_s6  ;;  %s6822_s12 = int_to_ptr.vmem [resolvable:$true] %s681_s12 }
 0x155   : > { %s7289_s5 = smov %s7288_s23  ;;  %s6819_s0 = scalar_lea.hbm %s7288_s23, %s7287_s14 }
 0x156   : > { %s6132_s18 = scalar_lea.hbm %s6819_s0, 512  ;;  %s6137_s4 = scalar_lea.hbm %s7289_s5, 1024 }
 0x157   : > { %p6133_p11 = scmp.ne.s32.totalorder %s6819_s0, %s6132_s18  ;;  %p6138_p10 = scmp.lt.u32.totalorder %s6819_s0, %s7289_s5 }
 0x158   : > { %p6139_p7 = scmp.lt.u32.totalorder %s6137_s4, %s6132_s18  ;;  %p6141_p2 = scmp.lt.u32.totalorder %s6132_s18, %s6819_s0 }
 0x159   : > { %p6135_p13 = pnand %p6133_p11, %p6104_p4 }
 0x15a   : > { %p6140_p12 = por %p6139_p7, %p6138_p10 }
 0x15b   : > { %p6136_p6 = pneg %p6135_p13 }
 0x15c   : > { %p6142_p3 = por %p6141_p2, %p6140_p12 }
 0x15e   : > { %p6143_p0 = pnand %p6142_p3, %p6136_p6 }
 0x160   : > { %6146 = shalt.err (!%p6143_p0)
}
 0x161   : > { %s6147_s7 = scalar_lea.vmem %s6822_s12, 512  ;;  %s6328_s6 = smov [#allocation6]  }
 0x162   : > { %p6148_p8 = scmp.ne.s32.totalorder %s6822_s12, %s6147_s7  ;;  %s6152_s2 = sshll.u32 %s6328_s6, 4  ;;  %s6153_s2 = int_to_ptr.vmem [resolvable:$false] %s6152_s2 }
 0x163   : > { %s6154_s23 = scalar_lea.vmem %s6153_s2, 1024  ;;  %p6155_p13 = scmp.lt.s32.totalorder %s6822_s12, %s6153_s2 }
 0x164   : > { %p6150_p9 = pnand %p6148_p8, %p6104_p4  ;;  %p6156_p10 = scmp.lt.s32.totalorder %s6154_s23, %s6147_s7 }
 0x166   : > { %p6151_p11 = pneg %p6150_p9  ;;  %p6157_p7 = por %p6156_p10, %p6155_p13 }
 0x168   : > { %p6158_p12 = pnand %p6157_p7, %p6151_p11 }
 0x16a   : > { %6161 = shalt.err (!%p6158_p12)
}
 0x16b   : > { %5121 = dma.hbm_to_vmem [thread:$0]  (!%p6776_p5), %s6819_s0, 512, %s6822_s12, %s6825_s16, %s7273_s30, %s7273_s30, %s7272_s11  }
 0x16c   : > { %s7290_s18 = sld [smem:[#allocation36_spill]] }
 0x172   : > { %p7291_p4 = scmp.ne.s32.totalorder %s7290_s18, 0 }
 0x173   : > { %s695_s29 = sand.u32 (!%p7291_p4), 1, %s6288_s1  }
 0x174   : > { %693 = sbr.rel (%p7291_p4) target bundleno = 4234 (0x108a), region = 96  ;;  %s4564_s10 = sshll.u32 (!%p7291_p4), %s695_s29, 5 }
 0x175   : > { %s696_s21 = scalar_lea.sflag (!%p7291_p4), [#allocation3], %s695_s29  ;;  %s6857_s4 = scalar_lea.vmem (!%p7291_p4), [#allocation2], %s4564_s10 }
 0x17b   : > { %6235 = dma.done.wait (%p6734_p1), %s696_s21, 512  }
 0x17c   : > { %6237 = vsyncadd (%p6734_p1), %s696_s21, 4294966784  ;;  %s704_s9 = sand.u32 1, %s6488_s26   ;;  %s6864_s16 = scalar_lea.vmem [#allocation6], %s4564_s10 }
 0x17d   : > { %s705_s14 = scalar_lea.sflag [#allocation7], %s704_s9 }
 0x17e   : > { %6239 = dma.done.wait (%p6734_p1), %s705_s14, 512  }
 0x17f   : > { %6241 = vsyncadd (%p6734_p1), %s705_s14, 4294966784  ;;  %p7292_p5 = scmp.eq.s32.totalorder %s6488_s26, 0 }
 0x181   : > { %6243 = dma.done.wait (%p7292_p5), [#allocation7], 4096   ;;  %p7293_p6 = pmov %p7292_p5 }
 0x182   : > { %p7294_p2 = pmov %p7292_p5 }
 0x183   : > { %6245 = vsyncadd (%p7293_p6), [#allocation7], 4294963200 }
 0x184   : > { %6247 = dma.done.wait (%p7294_p2), [#allocation10], 12288   ;;  %p7295_p3 = pmov %p7294_p2 }
 0x185   : > { %p7296_p0 = pmov %p7294_p2 }
 0x186   : > { %6249 = vsyncadd (%p7295_p3), [#allocation10], 4294955008 }
 0x187   : > { %6251 = dma.done.wait (%p7296_p0), [#allocation13], 12288   ;;  %p7297_p8 = pmov %p7296_p0 }
 0x188   : > { %p7298_p1 = pmov %p7296_p0 }
 0x189   : > { %6253 = vsyncadd (%p7297_p8), [#allocation13], 4294955008 }
 0x18a   : > { %6255 = dma.done.wait (%p7298_p1), [#allocation16], 12288   ;;  %p7299_p9 = pmov %p7296_p0 }
 0x18b   : > { %p7300_p11 = pmov %p7296_p0 }
 0x18c   : > { %6257 = vsyncadd (%p7299_p9), [#allocation16], 4294955008 }
 0x18d   : > { %6259 = dma.done.wait (%p7300_p11), [#allocation19], 8192   ;;  %p7301_p13 = pmov %p7296_p0 }
 0x18e   : > { %p7302_p10 = pmov %p7296_p0 }
 0x18f   : > { %6261 = vsyncadd (%p7301_p13), [#allocation19], 4294959104 }
 0x190   : > { %6263 = dma.done.wait (%p7302_p10), [#allocation5], 64   ;;  %p7303_p7 = pmov %p7296_p0 }
 0x192   : > { %6265 = vsyncadd (%p7303_p7), [#allocation5], 4294967232 }
 0x193   : > { %749 = sfence }
 0x194   : > { %s7304_s11 = sld [smem:[#allocation34_spill]]  ;;  %v6895_v0 = vld [vmem:[%s6857_s4] sm:$0xff]  ;;  %v6898_v1 = vld [vmem:[%s6857_s4 + $0x8] sm:$0xff]  ;;  %v6901_v2 = vld [vmem:[%s6857_s4 + $0x10] sm:$0xff]  ;;  %s822_s12 = sld [smem:[#allocation20]]  ;;  %vm6330_vm6 = vmmov 0  }
 0x195   : > { %v824_v3 = vadd.f32 %v6898_v1, %v6895_v0  ;;  %v6907_v4 = vld [vmem:[%s6857_s4 + $0x18] sm:$0xff]  ;;  %v5249_v9 = vld [vmem:[#allocation8 + $0x4] ss:$8 sps:$4 sm:$0xff]   ;;  %v5251_v10 = vld [vmem:[#allocation8] ss:$8 sps:$4 sm:$0xff]   ;;  %s4579_s17 = sld [smem:[#allocation20 + $0x1]] }
 0x196   : > { %v827_v5 = vadd.f32 %v6907_v4, %v6901_v2  ;;  %v5252_v11 = vld [vmem:[#allocation9 + $0x4] ss:$16 sps:$4 sm:$0xff]   ;;  %v5254_v12 = vld [vmem:[#allocation9] ss:$16 sps:$4 sm:$0xff]   ;;  %1213 = vmatprep.subr.bf16.mxu0 %v5249_v9  ;;  %s7305_s2 = sld [smem:[#allocation42_spill]]  ;;  %s7306_s29 = sld [smem:[#allocation40_spill]] }
 0x197   : > { %825 = vadd.xlane.f32.xlu0 %v824_v3  ;;  %v5255_v13 = vld [vmem:[#allocation8 + $0x14] ss:$8 sps:$4 sm:$0xff]   ;;  %1597 = vmatprep.subr.bf16.mxu1 %v5252_v11  ;;  %v5257_v15 = vld [vmem:[#allocation8 + $0x10] ss:$8 sps:$4 sm:$0xff]   ;;  %v5261_v17 = vld [vmem:[#allocation8 + $0x24] ss:$8 sps:$4 sm:$0xff]  }
 0x198   : > { %v5258_v14 = vld [vmem:[#allocation9 + $0x24] ss:$16 sps:$4 sm:$0xff]   ;;  %1214 = vmatpush1.bf16.msra.mxu0 %v5251_v10  ;;  %1598 = vmatpush1.bf16.msra.mxu1 %v5254_v12  ;;  %v5260_v16 = vld [vmem:[#allocation9 + $0x20] ss:$16 sps:$4 sm:$0xff]   ;;  %vm1771_vm7 = vcmask 130048   ;;  %s4710_s9 = sld [smem:[#allocation20 + $0x80]] }
 0x199   : > { %1215 = vmatprep.subr.bf16.mxu0 %v5255_v13  ;;  %1599 = vmatprep.subr.bf16.mxu1 %v5258_v14  ;;  %v5264_v18 = vld [vmem:[#allocation9 + $0x44] ss:$16 sps:$4 sm:$0xff]   ;;  %v5263_v19 = vld [vmem:[#allocation8 + $0x20] ss:$8 sps:$4 sm:$0xff]   ;;  %v5269_v23 = vld [vmem:[#allocation8 + $0x30] ss:$8 sps:$4 sm:$0xff]  }
 0x19a   : > { %s4576_s30 = sshll.u32 %s7304_s11, 3  ;;  %v5266_v20 = vld [vmem:[#allocation9 + $0x40] ss:$16 sps:$4 sm:$0xff]   ;;  %v5267_v21 = vld [vmem:[#allocation8 + $0x34] ss:$8 sps:$4 sm:$0xff]   ;;  %s4711_s14 = sld [smem:[#allocation20 + $0x81]] }
 0x19b   : > { %s811_s26 = sshra.s32 %s4576_s30, 3  ;;  %828 = vadd.xlane.f32.xlu0 %v827_v5  ;;  %v5270_v22 = vld [vmem:[#allocation9 + $0x64] ss:$16 sps:$4 sm:$0xff]   ;;  %v5272_v24 = vld [vmem:[#allocation9 + $0x60] ss:$16 sps:$4 sm:$0xff]   ;;  %s7310_s6 = sld [smem:[#allocation50_spill]] }
 0x19c   : > { %s4980_s13 = sshll.u32 %s811_s26, 4  ;;  %1216 = vmatpush1.bf16.msra.mxu0 %v5257_v15  ;;  %1600 = vmatpush1.bf16.msra.mxu1 %v5260_v16  ;;  %v5273_v25 = vld [vmem:[#allocation8 + $0x44] ss:$8 sps:$4 sm:$0xff]   ;;  %v5275_v27 = vld [vmem:[#allocation8 + $0x40] ss:$8 sps:$4 sm:$0xff]   ;;  %s7308_s26 = sld [smem:[#allocation48_spill]] }
 0x19d   : > { %s6912_s0 = scalar_lea.vmem %s6857_s4, %s4980_s13 [#allocation2]  ;;  %1217 = vmatprep.subr.bf16.mxu0 %v5261_v17  ;;  %1601 = vmatprep.subr.bf16.mxu1 %v5264_v18  ;;  %v5276_v26 = vld [vmem:[#allocation9 + $0x84] ss:$16 sps:$4 sm:$0xff]   ;;  %v5278_v28 = vld [vmem:[#allocation9 + $0x80] ss:$16 sps:$4 sm:$0xff]   ;;  %s7307_s4 = sld [smem:[#allocation44_spill]] }
 0x19e   : > { %v6915_v6 = vld [vmem:[%s6912_s0] sm:$0xff]  ;;  %v6918_v7 = vld [vmem:[%s6912_s0 + $0x8] sm:$0xff]  ;;  %v5279_v29 = vld [vmem:[#allocation8 + $0x54] ss:$8 sps:$4 sm:$0xff]   ;;  %s4843_s23 = sld [smem:[#allocation20 + $0x101]]  ;;  %s7311_s10 = sld [smem:[#allocation52_spill]] }
 0x19f   : > { %v882_v8 = vadd.f32 %v6918_v7, %v6915_v6  ;;  %v5282_v30 = vld [vmem:[#allocation9 + $0xa4] ss:$16 sps:$4 sm:$0xff]   ;;  %v5281_v31 = vld [vmem:[#allocation8 + $0x50] ss:$8 sps:$4 sm:$0xff]   ;;  %v5287_v55 = vld [vmem:[#allocation8 + $0x60] ss:$8 sps:$4 sm:$0xff]  }
 0x1a0   : > { %1218 = vmatpush1.bf16.msra.mxu0 %v5263_v19  ;;  %1602 = vmatpush1.bf16.msra.mxu1 %v5266_v20  ;;  %v5284_v32 = vld [vmem:[#allocation9 + $0xa0] ss:$16 sps:$4 sm:$0xff]   ;;  %v5285_v54 = vld [vmem:[#allocation8 + $0x64] ss:$8 sps:$4 sm:$0xff]   ;;  %v5291_v58 = vld [vmem:[#allocation8 + $0x74] ss:$8 sps:$4 sm:$0xff]  }
 0x1a1   : > { %883 = vadd.xlane.f32.xlu1 %v882_v8  ;;  %1219 = vmatprep.subr.bf16.mxu0 %v5267_v21  ;;  %v5288_v56 = vld [vmem:[#allocation9 + $0xc4] ss:$16 sps:$4 sm:$0xff]   ;;  %v5290_v57 = vld [vmem:[#allocation9 + $0xc0] ss:$16 sps:$4 sm:$0xff]   ;;  %s7312_s21 = sld [smem:[#allocation32_spill]]  ;;  %p7317_p4 = scmp.ne.s32.totalorder %s7283_s20, 0 }
 0x1a2   : > { %1603 = vmatprep.subr.bf16.mxu1 %v5270_v22  ;;  %v5293_v59 = vld [vmem:[#allocation8 + $0x70] ss:$8 sps:$4 sm:$0xff]   ;;  %v5294_v60 = vld [vmem:[#allocation9 + $0xe4] ss:$16 sps:$4 sm:$0xff]   ;;  %v5299_v63 = vld [vmem:[#allocation8 + $0x80] ss:$8 sps:$4 sm:$0xff]  }
 0x1a3   : > { %v5296_v61 = vld [vmem:[#allocation9 + $0xe0] ss:$16 sps:$4 sm:$0xff]   ;;  %v5297_v62 = vld [vmem:[#allocation8 + $0x84] ss:$8 sps:$4 sm:$0xff]   ;;  %v5315_v10 = vld [vmem:[#allocation8 + $0xb4] ss:$8 sps:$4 sm:$0xff]  }
 0x1a4   : > { %1220 = vmatpush1.bf16.msra.mxu0 %v5269_v23  ;;  %1604 = vmatpush1.bf16.msra.mxu1 %v5272_v24  ;;  %v5305_v3 = vld [vmem:[#allocation8 + $0x90] ss:$8 sps:$4 sm:$0xff]   ;;  %v5312_v8 = vld [vmem:[#allocation9 + $0x144] ss:$16 sps:$4 sm:$0xff]   ;;  %v5323_v16 = vld [vmem:[#allocation8 + $0xc0] ss:$8 sps:$4 sm:$0xff]  }
 0x1a5   : > { %1221 = vmatprep.subr.bf16.mxu0 %v5273_v25  ;;  %1605 = vmatprep.subr.bf16.mxu1 %v5276_v26  ;;  %v5308_v5 = vld [vmem:[#allocation9 + $0x120] ss:$16 sps:$4 sm:$0xff]   ;;  %v5318_v12 = vld [vmem:[#allocation9 + $0x164] ss:$16 sps:$4 sm:$0xff]  }
 0x1a6   : > { %v5314_v9 = vld [vmem:[#allocation9 + $0x140] ss:$16 sps:$4 sm:$0xff]   ;;  %v5321_v14 = vld [vmem:[#allocation8 + $0xc4] ss:$8 sps:$4 sm:$0xff]   ;;  %v5327_v18 = vld [vmem:[#allocation8 + $0xd4] ss:$8 sps:$4 sm:$0xff]  }
 0x1a7   : > { %v5317_v11 = vld [vmem:[#allocation8 + $0xb0] ss:$8 sps:$4 sm:$0xff]   ;;  %v5324_v15 = vld [vmem:[#allocation9 + $0x184] ss:$16 sps:$4 sm:$0xff]   ;;  %v5335_v24 = vld [vmem:[#allocation8 + $0xe0] ss:$8 sps:$4 sm:$0xff]  }
 0x1a8   : > { %1222 = vmatpush1.bf16.msra.mxu0 %v5275_v27  ;;  %1606 = vmatpush1.bf16.msra.mxu1 %v5278_v28  ;;  %v5320_v13 = vld [vmem:[#allocation9 + $0x160] ss:$16 sps:$4 sm:$0xff]   ;;  %v5330_v19 = vld [vmem:[#allocation9 + $0x1a4] ss:$16 sps:$4 sm:$0xff]  }
 0x1a9   : > { %1223 = vmatprep.subr.bf16.mxu0 %v5279_v29  ;;  %1607 = vmatprep.subr.bf16.mxu1 %v5282_v30  ;;  %v5326_v17 = vld [vmem:[#allocation9 + $0x180] ss:$16 sps:$4 sm:$0xff]   ;;  %v5333_v22 = vld [vmem:[#allocation8 + $0xe4] ss:$8 sps:$4 sm:$0xff]   ;;  %v5339_v26 = vld [vmem:[#allocation8 + $0xf4] ss:$8 sps:$4 sm:$0xff]  }
 0x1aa   : > { %v5329_v20 = vld [vmem:[#allocation8 + $0xd0] ss:$8 sps:$4 sm:$0xff]   ;;  %v5336_v23 = vld [vmem:[#allocation9 + $0x1c4] ss:$16 sps:$4 sm:$0xff]   ;;  %v5347_v30 = vld [vmem:[#allocation9 + $0xc] ss:$16 sps:$4 sm:$0xff]  }
 0x1ab   : > { %v5332_v21 = vld [vmem:[#allocation9 + $0x1a0] ss:$16 sps:$4 sm:$0xff]   ;;  %v5342_v27 = vld [vmem:[#allocation9 + $0x1e4] ss:$16 sps:$4 sm:$0xff]  }
 0x1ac   : > { %1224 = vmatpush1.bf16.msra.mxu0 %v5281_v31  ;;  %1608 = vmatpush1.bf16.msra.mxu1 %v5284_v32  ;;  %v5338_v25 = vld [vmem:[#allocation9 + $0x1c0] ss:$16 sps:$4 sm:$0xff]  }
 0x1ad   : > { %1225 = vmatprep.subr.bf16.mxu0 %v5285_v54  ;;  %1609 = vmatprep.subr.bf16.mxu1 %v5288_v56  ;;  %v5341_v28 = vld [vmem:[#allocation8 + $0xf0] ss:$8 sps:$4 sm:$0xff]  }
 0x1ae   : > { %v5344_v29 = vld [vmem:[#allocation9 + $0x1e0] ss:$16 sps:$4 sm:$0xff]  }
 0x1b0   : > { %1226 = vmatpush1.bf16.msra.mxu0 %v5287_v55  ;;  %1610 = vmatpush1.bf16.msra.mxu1 %v5290_v57 }
 0x1b1   : > { %1227 = vmatprep.subr.bf16.mxu0 %v5291_v58  ;;  %1611 = vmatprep.subr.bf16.mxu1 %v5294_v60 }
 0x1b4   : > { %1228 = vmatpush1.bf16.msra.mxu0 %v5293_v59  ;;  %1612 = vmatpush1.bf16.msra.mxu1 %v5296_v61  ;;  %v864_v61 = vstv %s822_s12  ;;  %s7309_s12 = sld [smem:[#allocation46_spill]] }
 0x1b5   : > { %1229 = vmatprep.subr.bf16.mxu0 %v5297_v62 }
 0x1b8   : > { %1230 = vmatpush1.bf16.msra.mxu0 %v5299_v63 }
 0x224   : > { %v826_v33 = vpop.xlane.xlu0 %825 }
 0x225   : > { %v831_v34 = vmul.f32 0.00390625, %v826_v33 }
 0x227   : > { %v6923_v35 = vsub.f32 %v6895_v0, %v831_v34  ;;  %v6926_v36 = vsub.f32 %v6898_v1, %v831_v34  ;;  %v5300_v0 = vld [vmem:[#allocation9 + $0x104] ss:$16 sps:$4 sm:$0xff]   ;;  %v5302_v1 = vld [vmem:[#allocation9 + $0x100] ss:$16 sps:$4 sm:$0xff]  }
 0x228   : > { %v829_v37 = vpop.xlane.xlu0 %828  ;;  %1613 = vmatprep.subr.bf16.mxu1 %v5300_v0 }
 0x229   : > { %v832_v39 = vmul.f32 0.00390625, %v829_v37  ;;  %v837_v41 = vmul.f32 %v6923_v35, %v6923_v35  ;;  %v838_v42 = vmul.f32 %v6926_v36, %v6926_v36  ;;  %1614 = vmatpush1.bf16.msra.mxu1 %v5302_v1  ;;  %v865_v63 = vmul.f32 %v864_v61, %v6923_v35 }
 0x22a   : > { %v866_v0 = vmul.f32 %v864_v61, %v6926_v36 }
 0x22b   : > { %v6933_v43 = vsub.f32 %v6901_v2, %v832_v39  ;;  %v6936_v44 = vsub.f32 %v6907_v4, %v832_v39  ;;  %v841_v47 = vadd.f32 %v838_v42, %v837_v41  ;;  %v5303_v2 = vld [vmem:[#allocation8 + $0x94] ss:$8 sps:$4 sm:$0xff]  }
 0x22c   : > { %v5306_v4 = vld [vmem:[#allocation9 + $0x124] ss:$16 sps:$4 sm:$0xff]   ;;  %1231 = vmatprep.subr.bf16.mxu0 %v5303_v2 }
 0x22d   : > { %v839_v48 = vmul.f32 %v6933_v43, %v6933_v43  ;;  %842 = vadd.xlane.f32.xlu1 %v841_v47  ;;  %v840_v49 = vmul.f32 %v6936_v44, %v6936_v44  ;;  %1232 = vmatpush1.bf16.msra.mxu0 %v5305_v3  ;;  %v867_v1 = vmul.f32 %v864_v61, %v6933_v43 }
 0x22e   : > { %v884_v38 = vpop.xlane.xlu1 %883  ;;  %1615 = vmatprep.subr.bf16.mxu1 %v5306_v4  ;;  %v868_v2 = vmul.f32 %v864_v61, %v6936_v44 }
 0x22f   : > { %v885_v40 = vmul.f32 0.00390625, %v884_v38  ;;  %v844_v52 = vadd.f32 %v840_v49, %v839_v48  ;;  %1616 = vmatpush1.bf16.msra.mxu1 %v5308_v5 }
 0x230   : > { %1617 = vmatprep.subr.bf16.mxu1 %v5312_v8 }
 0x231   : > { %v6939_v45 = vsub.f32 %v6915_v6, %v885_v40  ;;  %v6942_v46 = vsub.f32 %v6918_v7, %v885_v40  ;;  %845 = vadd.xlane.f32.xlu0 %v844_v52  ;;  %v5309_v6 = vld [vmem:[#allocation8 + $0xa4] ss:$8 sps:$4 sm:$0xff]   ;;  %v5311_v7 = vld [vmem:[#allocation8 + $0xa0] ss:$8 sps:$4 sm:$0xff]  }
 0x232   : > { %1233 = vmatprep.subr.bf16.mxu0 %v5309_v6 }
 0x233   : > { %v888_v50 = vmul.f32 %v6939_v45, %v6939_v45  ;;  %v889_v51 = vmul.f32 %v6942_v46, %v6942_v46  ;;  %1234 = vmatpush1.bf16.msra.mxu0 %v5311_v7  ;;  %1618 = vmatpush1.bf16.msra.mxu1 %v5314_v9  ;;  %v901_v6 = vmul.f32 %v6939_v45, %v864_v61  ;;  %v877_v7 = vstv %s4579_s17 }
 0x234   : > { %1235 = vmatprep.subr.bf16.mxu0 %v5315_v10  ;;  %1619 = vmatprep.subr.bf16.mxu1 %v5318_v12  ;;  %v902_v8 = vmul.f32 %v6942_v46, %v864_v61  ;;  %v5348_v46 = vld [vmem:[#allocation9 + $0x28] ss:$16 sps:$4 sm:$0xff]   ;;  %v941_v61 = vld [vmem:[%s7306_s29] sm:$0x3] }
 0x235   : > { %v890_v53 = vadd.f32 %v889_v51, %v888_v50 }
 0x237   : > { %891 = vadd.xlane.f32.xlu1 %v890_v53  ;;  %1236 = vmatpush1.bf16.msra.mxu0 %v5317_v11 }
 0x238   : > { %1620 = vmatpush1.bf16.msra.mxu1 %v5320_v13  ;;  %1237 = vmatprep.subr.bf16.mxu0 %v5321_v14 }
 0x239   : > { %1621 = vmatprep.subr.bf16.mxu1 %v5324_v15 }
 0x23b   : > { %1238 = vmatpush1.bf16.msra.mxu0 %v5323_v16 }
 0x23c   : > { %1622 = vmatpush1.bf16.msra.mxu1 %v5326_v17  ;;  %1239 = vmatprep.subr.bf16.mxu0 %v5327_v18 }
 0x23d   : > { %1623 = vmatprep.subr.bf16.mxu1 %v5330_v19  ;;  %v5345_v19 = vld [vmem:[#allocation9 + $0x8] ss:$16 sps:$4 sm:$0xff]  }
 0x23f   : > { %1240 = vmatpush1.bf16.msra.mxu0 %v5329_v20  ;;  %v5350_v20 = vld [vmem:[#allocation9 + $0x2c] ss:$16 sps:$4 sm:$0xff]  }
 0x240   : > { %1624 = vmatpush1.bf16.msra.mxu1 %v5332_v21  ;;  %1241 = vmatprep.subr.bf16.mxu0 %v5333_v22  ;;  %v5353_v21 = vld [vmem:[#allocation9 + $0x4c] ss:$16 sps:$4 sm:$0xff]   ;;  %v5351_v22 = vld [vmem:[#allocation9 + $0x48] ss:$16 sps:$4 sm:$0xff]  }
 0x241   : > { %1625 = vmatprep.subr.bf16.mxu1 %v5336_v23  ;;  %v5356_v23 = vld [vmem:[#allocation9 + $0x6c] ss:$16 sps:$4 sm:$0xff]  }
 0x243   : > { %1242 = vmatpush1.bf16.msra.mxu0 %v5335_v24  ;;  %v5354_v24 = vld [vmem:[#allocation9 + $0x68] ss:$16 sps:$4 sm:$0xff]  }
 0x244   : > { %1626 = vmatpush1.bf16.msra.mxu1 %v5338_v25  ;;  %1243 = vmatprep.subr.bf16.mxu0 %v5339_v26  ;;  %v5359_v25 = vld [vmem:[#allocation9 + $0x8c] ss:$16 sps:$4 sm:$0xff]   ;;  %v5357_v26 = vld [vmem:[#allocation9 + $0x88] ss:$16 sps:$4 sm:$0xff]  }
 0x245   : > { %1627 = vmatprep.subr.bf16.mxu1 %v5342_v27  ;;  %v5362_v27 = vld [vmem:[#allocation9 + $0xac] ss:$16 sps:$4 sm:$0xff]  }
 0x247   : > { %1244 = vmatpush1.bf16.msra.mxu0 %v5341_v28  ;;  %v5360_v28 = vld [vmem:[#allocation9 + $0xa8] ss:$16 sps:$4 sm:$0xff]  }
 0x248   : > { %1628 = vmatpush1.bf16.msra.mxu1 %v5344_v29  ;;  %1640 = vmatprep.subr.bf16.mxu0 %v5347_v30  ;;  %v5365_v29 = vld [vmem:[#allocation9 + $0xcc] ss:$16 sps:$4 sm:$0xff]   ;;  %v5363_v30 = vld [vmem:[#allocation9 + $0xc8] ss:$16 sps:$4 sm:$0xff]  }
 0x2ba   : > { %v843_v31 = vpop.xlane.xlu1 %842 }
 0x2bb   : > { %v848_v32 = vmul.f32 0.003921569, %v843_v31  ;;  %v5368_v31 = vld [vmem:[#allocation9 + $0xec] ss:$16 sps:$4 sm:$0xff]  }
 0x2bd   : > { %5825 = vrsqrt.f32 %v848_v32  ;;  %vm852_vm0 = vcmp.eq.f32.partialorder %v848_v32, inf  ;;  %v855_v41 = vand.u32 2147483648, %v848_v32  ;;  %vm854_vm1 = vcmp.eq.f32.partialorder %v848_v32, 0.0 }
 0x2be   : > { %v846_v33 = vpop.xlane.xlu0 %845 }
 0x2bf   : > { %v849_v37 = vmul.f32 0.003921569, %v846_v33  ;;  %v5371_v33 = vld [vmem:[#allocation9 + $0x10c] ss:$16 sps:$4 sm:$0xff]  }
 0x2c1   : > { %5827 = vrsqrt.f32 %v849_v37  ;;  %vm859_vm2 = vcmp.eq.f32.partialorder %v849_v37, inf  ;;  %vm861_vm3 = vcmp.eq.f32.partialorder %v849_v37, 0.0  ;;  %v862_v52 = vand.u32 2147483648, %v849_v37 }
 0x2c4   : > { %v892_v34 = vpop.xlane.xlu1 %891 }
 0x2c5   : > { %v893_v38 = vmul.f32 0.003921569, %v892_v34  ;;  %v5369_v34 = vld [vmem:[#allocation9 + $0x108] ss:$16 sps:$4 sm:$0xff]  }
 0x2c7   : > { %5829 = vrsqrt.f32 %v893_v38  ;;  %v5826_v39 = vpop.eup %5825  ;;  %vm896_vm4 = vcmp.eq.f32.partialorder %v893_v38, inf  ;;  %v899_v55 = vand.u32 2147483648, %v893_v38  ;;  %vm898_vm5 = vcmp.eq.f32.partialorder %v893_v38, 0.0 }
 0x2c8   : > { %v851_v40 = vmul.f32 %v5826_v39, %v848_v32  ;;  %v5377_v39 = vld [vmem:[#allocation9 + $0x14c] ss:$16 sps:$4 sm:$0xff]  }
 0x2ca   : > { %v853_v42 = vsel %vm852_vm0, %v848_v32, %v851_v40  ;;  %v5366_v32 = vld [vmem:[#allocation9 + $0xe8] ss:$16 sps:$4 sm:$0xff]  }
 0x2cb   : > { %v5828_v47 = vpop.eup %5827  ;;  %v856_v48 = vsel %vm854_vm1, %v855_v41, %v853_v42  ;;  %v5375_v40 = vld [vmem:[#allocation9 + $0x148] ss:$16 sps:$4 sm:$0xff]   ;;  %v5380_v41 = vld [vmem:[#allocation9 + $0x16c] ss:$16 sps:$4 sm:$0xff]  }
 0x2cc   : > { %v858_v50 = vmul.f32 %v5828_v47, %v849_v37  ;;  %v869_v51 = vadd.f32 1e-06, %v856_v48  ;;  %v5378_v42 = vld [vmem:[#allocation9 + $0x168] ss:$16 sps:$4 sm:$0xff]   ;;  %v5383_v47 = vld [vmem:[#allocation9 + $0x18c] ss:$16 sps:$4 sm:$0xff]  }
 0x2cd   : > { %v5381_v48 = vld [vmem:[#allocation9 + $0x188] ss:$16 sps:$4 sm:$0xff]  }
 0x2ce   : > { %v860_v54 = vsel %vm859_vm2, %v849_v37, %v858_v50  ;;  %5831 = vrcp.f32 %v869_v51  ;;  %v5374_v37 = vld [vmem:[#allocation9 + $0x12c] ss:$16 sps:$4 sm:$0xff]   ;;  %v5384_v50 = vld [vmem:[#allocation9 + $0x1a8] ss:$16 sps:$4 sm:$0xff]  }
 0x2cf   : > { %v863_v57 = vsel %vm861_vm3, %v862_v52, %v860_v54  ;;  %v5389_v51 = vld [vmem:[#allocation9 + $0x1cc] ss:$16 sps:$4 sm:$0xff]   ;;  %v5387_v52 = vld [vmem:[#allocation9 + $0x1c8] ss:$16 sps:$4 sm:$0xff]  }
 0x2d0   : > { %v870_v59 = vadd.f32 1e-06, %v863_v57  ;;  %v5390_v54 = vld [vmem:[#allocation9 + $0x1e8] ss:$16 sps:$4 sm:$0xff]  }
 0x2d1   : > { %v5830_v49 = vpop.eup %5829 }
 0x2d2   : > { %v895_v53 = vmul.f32 %v5830_v49, %v893_v38  ;;  %5833 = vrcp.f32 %v870_v59  ;;  %v5386_v49 = vld [vmem:[#allocation9 + $0x1ac] ss:$16 sps:$4 sm:$0xff]   ;;  %v1006_v59 = vld [vmem:[%s7305_s2] sm:$0xf]  ;;  %s4842_s2 = sld [smem:[#allocation20 + $0x100]] }
 0x2d4   : > { %v897_v56 = vsel %vm896_vm4, %v893_v38, %v895_v53  ;;  %v5372_v38 = vld [vmem:[#allocation9 + $0x128] ss:$16 sps:$4 sm:$0xff]   ;;  %v5392_v53 = vld [vmem:[#allocation9 + $0x1ec] ss:$16 sps:$4 sm:$0xff]  }
 0x2d5   : > { %v900_v58 = vsel %vm898_vm5, %v899_v55, %v897_v56  ;;  %v6329_v55 = vmov 0.0   ;;  %v1043_v56 = vlaneseq }
 0x2d6   : > { %v903_v60 = vadd.f32 1e-06, %v900_v58  ;;  %4997 = vmatprep.subr.bf16.mxu1 %v6329_v55 }
 0x2d7   : > { %v1044_v57 = vshrl.u32 %v1043_v56, 7 }
 0x2d8   : > { %5835 = vrcp.f32 %v903_v60  ;;  %v5832_v62 = vpop.eup %5831 }
 0x2d9   : > { %v874_v3 = vmul.f32 %v5832_v62, %v866_v0  ;;  %v873_v4 = vmul.f32 %v5832_v62, %v865_v63  ;;  %v6965_v58 = vsub.s32 0, %v1044_v57  ;;  %v6970_v60 = vsub.s32 1, %v1044_v57 }
 0x2db   : > { %v879_v35 = vadd.f32 %v877_v7, %v874_v3  ;;  %v878_v36 = vadd.f32 %v877_v7, %v873_v4  ;;  %v1260_v62 = vrot.slane %v1006_v59, %v6965_v58  ;;  %v1046_v63 = vrot.slane %v941_v61, %v6965_v58 }
 0x2dc   : > { %v5834_v5 = vpop.eup %5833 }
 0x2dd   : > { %v876_v10 = vmul.f32 %v5834_v5, %v868_v2  ;;  %v875_v11 = vmul.f32 %v5834_v5, %v867_v1  ;;  %v1264_v1 = vrot.slane %v1006_v59, %v6970_v60 }
 0x2df   : > { %v881_v14 = vadd.f32 %v877_v7, %v876_v10  ;;  %v880_v15 = vadd.f32 %v877_v7, %v875_v11 }
 0x2e1   : > { %v1255_v44 = vpack.c.bf16 %v881_v14, %v879_v35  ;;  %v6958_v17 = vpack.c.bf16 %v880_v15, %v878_v36  ;;  %v1050_v15 = vrot.slane %v941_v61, %v6970_v60 }
 0x2e2   : > { %v5836_v9 = vpop.eup %5835 }
 0x2e3   : > { %v906_v12 = vmul.f32 %v5836_v9, %v902_v8  ;;  %v905_v13 = vmul.f32 %v5836_v9, %v901_v6  ;;  %1629 = vmatprep.mubr.bf16.mxu1 %v1255_v44 }
 0x2e4   : > { %1630 = vmatmul.mubr.bf16.vlgmr.msra.gmra.mrb[0].mxu1 %v6958_v17 }
 0x2e5   : > { %v908_v43 = vadd.f32 %v906_v12, %v877_v7  ;;  %v907_v16 = vadd.f32 %v905_v13, %v877_v7  ;;  %4999 = vmatprep.mubr.msk.bf16.mxu1 %vm6330_vm6, %v6329_v55 }
 0x2e7   : > { %v1041_v18 = vpack.c.bf16 %v908_v43, %v908_v43  ;;  %v1040_v45 = vpack.c.bf16 %v907_v16, %v907_v16 }
 0x2e9   : > { %1245 = vmatprep.mubr.bf16.mxu0 %v1041_v18  ;;  %v6985_v18 = vsub.s32 2, %v1044_v57 }
 0x2ea   : > { %1246 = vmatmul.mubr.bf16.vlgmr.msra.gmra.mrb[0].mxu0 %v1040_v45 }
 0x2eb   : > { %1641 = vmatpush1.bf16.msra.mxu0 %v5345_v19  ;;  %1672 = vmatprep.mubr.bf16.mxu0 %v1255_v44  ;;  %v6987_v19 = vsub.s32 3, %v1044_v57  ;;  %v1268_v45 = vrot.slane %v1006_v59, %v6985_v18 }
 0x2ec   : > { %1642 = vmatprep.subr.bf16.mxu0 %v5350_v20 }
 0x2ed   : > { %v1272_v20 = vrot.slane %v1006_v59, %v6987_v19 }
 0x2ef   : > { %1643 = vmatpush1.bf16.msra.mxu0 %v5348_v46 }
 0x2f0   : > { %1644 = vmatprep.subr.bf16.mxu0 %v5353_v21 }
 0x2f3   : > { %1645 = vmatpush1.bf16.msra.mxu0 %v5351_v22 }
 0x2f4   : > { %1646 = vmatprep.subr.bf16.mxu0 %v5356_v23 }
 0x2f7   : > { %1647 = vmatpush1.bf16.msra.mxu0 %v5354_v24 }
 0x2f8   : > { %1648 = vmatprep.subr.bf16.mxu0 %v5359_v25 }
 0x2fb   : > { %1649 = vmatpush1.bf16.msra.mxu0 %v5357_v26 }
 0x2fc   : > { %1650 = vmatprep.subr.bf16.mxu0 %v5362_v27 }
 0x2ff   : > { %1651 = vmatpush1.bf16.msra.mxu0 %v5360_v28 }
 0x300   : > { %1652 = vmatprep.subr.bf16.mxu0 %v5365_v29 }
 0x303   : > { %1653 = vmatpush1.bf16.msra.mxu0 %v5363_v30 }
 0x304   : > { %1654 = vmatprep.subr.bf16.mxu0 %v5368_v31 }
 0x307   : > { %1655 = vmatpush1.bf16.msra.mxu0 %v5366_v32 }
 0x308   : > { %1656 = vmatprep.subr.bf16.mxu0 %v5371_v33 }
 0x30b   : > { %1657 = vmatpush1.bf16.msra.mxu0 %v5369_v34 }
 0x30c   : > { %1658 = vmatprep.subr.bf16.mxu0 %v5374_v37 }
 0x30f   : > { %1659 = vmatpush1.bf16.msra.mxu0 %v5372_v38 }
 0x310   : > { %1660 = vmatprep.subr.bf16.mxu0 %v5377_v39 }
 0x313   : > { %1661 = vmatpush1.bf16.msra.mxu0 %v5375_v40 }
 0x314   : > { %1662 = vmatprep.subr.bf16.mxu0 %v5380_v41 }
 0x317   : > { %1663 = vmatpush1.bf16.msra.mxu0 %v5378_v42 }
 0x318   : > { %1664 = vmatprep.subr.bf16.mxu0 %v5383_v47 }
 0x31b   : > { %1665 = vmatpush1.bf16.msra.mxu0 %v5381_v48 }
 0x31c   : > { %1666 = vmatprep.subr.bf16.mxu0 %v5386_v49 }
 0x31f   : > { %1667 = vmatpush1.bf16.msra.mxu0 %v5384_v50 }
 0x320   : > { %1668 = vmatprep.subr.bf16.mxu0 %v5389_v51 }
 0x323   : > { %1669 = vmatpush1.bf16.msra.mxu0 %v5387_v52 }
 0x324   : > { %1670 = vmatprep.subr.bf16.mxu0 %v5392_v53 }
 0x327   : > { %1671 = vmatpush1.bf16.msra.mxu0 %v5390_v54 }
 0x32a   : > { %1673 = vmatmul.mubr.bf16.vlgmr.msra.gmra.mrb[4].mxu0 %v6958_v17 }
 0x3b7   : > { %v1631_v0 = vpop.f32.mrb[0].mxu1 }
 0x3b8   : > { %v1633_v3 = vpop.f32.mrb[1].mxu1  ;;  %v1632_v6 = vadd.f32 %v1631_v0, %v1260_v62  ;;  %v5395_v0 = vld [vmem:[#allocation11 + $0x4] ss:$8 sps:$4 sm:$0xff]  }
 0x3b9   : > { %v1635_v5 = vpop.f32.mrb[2].mxu1  ;;  %v1634_v11 = vadd.f32 %v1633_v3, %v1264_v1  ;;  %v5393_v3 = vld [vmem:[#allocation11] ss:$8 sps:$4 sm:$0xff]  }
 0x3ba   : > { %v1636_v8 = vadd.f32 %v1635_v5, %v1260_v62  ;;  %v1637_v9 = vpop.f32.mrb[3].mxu1  ;;  %v5398_v5 = vld [vmem:[#allocation11 + $0x14] ss:$8 sps:$4 sm:$0xff]  }
 0x3bb   : > { %v1638_v13 = vadd.f32 %v1637_v9, %v1264_v1  ;;  %v5404_v9 = vld [vmem:[#allocation11 + $0x34] ss:$8 sps:$4 sm:$0xff]  }
 0x3bc   : > { %v1687_v35 = vpack.c.bf16 %v1636_v8, %v1632_v6  ;;  %v5396_v6 = vld [vmem:[#allocation11 + $0x10] ss:$8 sps:$4 sm:$0xff]   ;;  %v5399_v8 = vld [vmem:[#allocation11 + $0x20] ss:$8 sps:$4 sm:$0xff]  }
 0x3bd   : > { %v1247_v2 = vpop.f32.mrb[0].mxu0  ;;  %v1688_v14 = vpack.c.bf16 %v1638_v13, %v1634_v11  ;;  %v5407_v11 = vld [vmem:[#allocation11 + $0x44] ss:$8 sps:$4 sm:$0xff]   ;;  %v5410_v13 = vld [vmem:[#allocation11 + $0x54] ss:$8 sps:$4 sm:$0xff]  }
 0x3be   : > { %v1249_v4 = vpop.f32.mrb[1].mxu0  ;;  %v1248_v10 = vadd.f32 %v1247_v2, %v1046_v63  ;;  %4998 = vmatpush3.bf16.xpose.msra.mxu1 %v1687_v35  ;;  %v5408_v35 = vld [vmem:[#allocation11 + $0x50] ss:$8 sps:$4 sm:$0xff]  }
 0x3bf   : > { %v1251_v7 = vpop.f32.mrb[2].mxu0  ;;  %5003 = vmatprep.subr.bf16.mxu1 %v6329_v55  ;;  %v1250_v16 = vadd.f32 %v1249_v4, %v1050_v15  ;;  %v5416_v15 = vld [vmem:[#allocation11 + $0x74] ss:$8 sps:$4 sm:$0xff]  }
 0x3c0   : > { %v1252_v12 = vpop.f32.mrb[3].mxu0  ;;  %v1683_v36 = vmul.f32 0.088388346, %v1248_v10  ;;  %v5401_v7 = vld [vmem:[#allocation11 + $0x24] ss:$8 sps:$4 sm:$0xff]  }
 0x3c1   : > { %v1684_v44 = vmul.f32 0.088388346, %v1250_v16  ;;  %v5402_v10 = vld [vmem:[#allocation11 + $0x30] ss:$8 sps:$4 sm:$0xff]   ;;  %v5405_v12 = vld [vmem:[#allocation11 + $0x40] ss:$8 sps:$4 sm:$0xff]  }
 0x3c2   : > { %v1685_v43 = vpack.c.bf16 %v1683_v36, %v1683_v36  ;;  %v5411_v36 = vld [vmem:[#allocation11 + $0x60] ss:$8 sps:$4 sm:$0xff]   ;;  %v5419_v16 = vld [vmem:[#allocation11 + $0x84] ss:$8 sps:$4 sm:$0xff]  }
 0x3c3   : > { %v1686_v17 = vpack.c.bf16 %v1684_v44, %v1684_v44  ;;  %v5417_v44 = vld [vmem:[#allocation11 + $0x80] ss:$8 sps:$4 sm:$0xff]  }
 0x3c5   : > { %5000 = vmatmul.mubr.bf16.vlgmr.msra.gmra.mrb[4].mxu1 %v1685_v43  ;;  %v5414_v43 = vld [vmem:[#allocation11 + $0x70] ss:$8 sps:$4 sm:$0xff]  }
 0x3c6   : > { %5004 = vmatpush3.bf16.xpose.msra.mxu1 %v1688_v14  ;;  %5005 = vmatprep.mubr.msk.bf16.mxu1 %vm6330_vm6, %v6329_v55  ;;  %v5413_v14 = vld [vmem:[#allocation11 + $0x64] ss:$8 sps:$4 sm:$0xff]  }
 0x3c7   : > { %5009 = vmatprep.subr.bf16.mxu1 %v6329_v55 }
 0x3cd   : > { %5006 = vmatmul.mubr.bf16.vlgmr.msra.gmra.mrb[8].mxu1 %v1686_v17  ;;  %v5422_v17 = vld [vmem:[#allocation11 + $0x94] ss:$8 sps:$4 sm:$0xff]  }
 0x3ce   : > { %5011 = vmatprep.mubr.msk.bf16.mxu1 %vm6330_vm6, %v6329_v55 }
 0x3fd   : > { %v1674_v46 = vpop.f32.mrb[4].mxu0 }
 0x3fe   : > { %v1675_v21 = vadd.f32 %v1674_v46, %v1268_v45  ;;  %v1676_v22 = vpop.f32.mrb[5].mxu0  ;;  %v5423_v46 = vld [vmem:[#allocation11 + $0xa0] ss:$8 sps:$4 sm:$0xff]  }
 0x3ff   : > { %v1677_v23 = vadd.f32 %v1676_v22, %v1272_v20  ;;  %v1678_v24 = vpop.f32.mrb[6].mxu0  ;;  %v5426_v22 = vld [vmem:[#allocation11 + $0xb0] ss:$8 sps:$4 sm:$0xff]  }
 0x400   : > { %v1679_v25 = vadd.f32 %v1678_v24, %v1268_v45  ;;  %v1680_v26 = vpop.f32.mrb[7].mxu0  ;;  %v5420_v45 = vld [vmem:[#allocation11 + $0x90] ss:$8 sps:$4 sm:$0xff]   ;;  %v5429_v24 = vld [vmem:[#allocation11 + $0xc0] ss:$8 sps:$4 sm:$0xff]  }
 0x401   : > { %v1681_v27 = vadd.f32 %v1680_v26, %v1272_v20  ;;  %v5425_v20 = vld [vmem:[#allocation11 + $0xa4] ss:$8 sps:$4 sm:$0xff]   ;;  %v5432_v26 = vld [vmem:[#allocation11 + $0xd0] ss:$8 sps:$4 sm:$0xff]  }
 0x402   : > { %v1689_v28 = vpack.c.bf16 %v1679_v25, %v1675_v21  ;;  %v5428_v21 = vld [vmem:[#allocation11 + $0xb4] ss:$8 sps:$4 sm:$0xff]  }
 0x403   : > { %v1690_v29 = vpack.c.bf16 %v1681_v27, %v1677_v23  ;;  %v5431_v23 = vld [vmem:[#allocation11 + $0xc4] ss:$8 sps:$4 sm:$0xff]   ;;  %v5434_v25 = vld [vmem:[#allocation11 + $0xd4] ss:$8 sps:$4 sm:$0xff]   ;;  %v5435_v27 = vld [vmem:[#allocation11 + $0xe0] ss:$8 sps:$4 sm:$0xff]  }
 0x404   : > { %5010 = vmatpush3.bf16.msra.mxu1 %v1689_v28  ;;  %v5437_v28 = vld [vmem:[#allocation11 + $0xe4] ss:$8 sps:$4 sm:$0xff]  }
 0x405   : > { %5015 = vmatprep.subr.bf16.mxu1 %v6329_v55 }
 0x498   : > { %v1725_v30 = vpop.f32.mrb[4].mxu1 }
 0x499   : > { %v5001_v31 = vpop.f32.mrb[5].mxu1  ;;  %v1772_v32 = vsel %vm1771_vm7, %v1725_v30, -inf }
 0x49a   : > { %1773 = vmax.xlane.f32.xlu0 %v1772_v32  ;;  %v1728_v33 = vpop.f32.mrb[6].mxu1 }
 0x49b   : > { %v5002_v34 = vpop.f32.mrb[7].mxu1 }
 0x4a0   : > { %v1765_v37 = vpop.f32.mrb[8].mxu1 }
 0x4a1   : > { %v5007_v38 = vpop.f32.mrb[9].mxu1  ;;  %v1775_v39 = vsel %vm1771_vm7, %v1765_v37, -inf }
 0x4a2   : > { %1776 = vmax.xlane.f32.xlu1 %v1775_v39  ;;  %v1768_v40 = vpop.f32.mrb[10].mxu1 }
 0x4a3   : > { %v5008_v41 = vpop.f32.mrb[11].mxu1 }
 0x527   : > { %v1774_v42 = vpop.xlane.xlu0 %1773 }
 0x528   : > { %v1778_v47 = vsub.f32 %v1725_v30, %v1774_v42  ;;  %v5438_v30 = vld [vmem:[#allocation11 + $0xf0] ss:$8 sps:$4 sm:$0xff]  }
 0x52a   : > { %v1780_v48 = vmul.f32 1.442695, %v1778_v47  ;;  %v1039_v47 = vld [vmem:[%s7307_s4] sm:$0x3]  ;;  %s7313_s4 = sld [smem:[#allocation35_spill]] }
 0x52c   : > { %5837 = vpow2.f32 %v1780_v48  ;;  %v1888_v48 = vrot.slane %v1039_v47, %v6965_v58 }
 0x52f   : > { %v1777_v49 = vpop.xlane.xlu1 %1776 }
 0x530   : > { %v1779_v50 = vsub.f32 %v1765_v37, %v1777_v49  ;;  %v1892_v49 = vrot.slane %v1039_v47, %v6970_v60  ;;  %v5500_v47 = vld [vmem:[#allocation12 + $0x84] ss:$8 sps:$4 sm:$0xff]   ;;  %s4974_s30 = sshll.u32 %s7313_s4, 2  ;;  %s6331_s4 = smov [#allocation21]  }
 0x532   : > { %v1782_v51 = vmul.f32 1.442695, %v1779_v50 }
 0x534   : > { %5839 = vpow2.f32 %v1782_v51 }
 0x536   : > { %v5838_v52 = vpop.eup %5837 }
 0x537   : > { %v1784_v53 = vsel %vm1771_vm7, %v5838_v52, 0.0 }
 0x538   : > { %1785 = vadd.xlane.f32.xlu0 %v1784_v53 }
 0x53e   : > { %v5840_v54 = vpop.eup %5839 }
 0x53f   : > { %v1787_v56 = vsel %vm1771_vm7, %v5840_v54, 0.0 }
 0x540   : > { %1788 = vadd.xlane.f32.xlu1 %v1787_v56  ;;  %v5861_v56 = vld [vmem:[%s6912_s0] sm:$0xff] }
 0x5c5   : > { %v1786_v57 = vpop.xlane.xlu0 %1785 }
 0x5c6   : > { %5841 = vrcp.f32 %v1786_v57 }
 0x5cd   : > { %v1789_v59 = vpop.xlane.xlu1 %1788 }
 0x5ce   : > { %5843 = vrcp.f32 %v1789_v59 }
 0x5d0   : > { %v5842_v61 = vpop.eup %5841 }
 0x5d1   : > { %v1792_v62 = vmul.f32 %v5842_v61, %v5838_v52  ;;  %v5862_v61 = vld [vmem:[%s6912_s0 + $0x8] sm:$0xff]  ;;  %s7314_s0 = sld [smem:[#allocation54_spill]] }
 0x5d3   : > { %v1794_v63 = vpack.c.bf16 %v1792_v62, %v1792_v62 }
 0x5d5   : > { %5012 = vmatmul.mubr.msk.bf16.vlgmr.msra.gmra.mrb[12].mxu1 %vm1771_vm7, %v1794_v63 }
 0x5d6   : > { %5016 = vmatpush3.bf16.msra.mxu1 %v1690_v29  ;;  %5017 = vmatprep.mubr.msk.bf16.mxu1 %vm6330_vm6, %v6329_v55  ;;  %v5440_v29 = vld [vmem:[#allocation11 + $0xf4] ss:$8 sps:$4 sm:$0xff]  }
 0x5d7   : > { %2055 = vmatprep.subr.bf16.mxu1 %v5395_v0  ;;  %v5441_v0 = vld [vmem:[#allocation14] ss:$16 sps:$4 sm:$0xff]  }
 0x5d8   : > { %v5844_v1 = vpop.eup %5843 }
 0x5d9   : > { %v1793_v2 = vmul.f32 %v5844_v1, %v5840_v54  ;;  %v5443_v1 = vld [vmem:[#allocation14 + $0x4] ss:$16 sps:$4 sm:$0xff]  }
 0x5db   : > { %v1795_v4 = vpack.c.bf16 %v1793_v2, %v1793_v2  ;;  %v5446_v2 = vld [vmem:[#allocation14 + $0x24] ss:$16 sps:$4 sm:$0xff]  }
 0x5dd   : > { %5018 = vmatmul.mubr.msk.bf16.vlgmr.msra.gmra.mrb[16].mxu1 %vm1771_vm7, %v1795_v4  ;;  %v5452_v4 = vld [vmem:[#allocation12 + $0x4] ss:$8 sps:$4 sm:$0xff]  }
 0x5de   : > { %2056 = vmatpush1.bf16.msra.mxu1 %v5393_v3  ;;  %v5450_v3 = vld [vmem:[#allocation12] ss:$8 sps:$4 sm:$0xff]   ;;  %2433 = vmatprep.subr.bf16.mxu0 %v5452_v4 }
 0x5df   : > { %2057 = vmatprep.subr.bf16.mxu1 %v5398_v5  ;;  %v5444_v5 = vld [vmem:[#allocation14 + $0x20] ss:$16 sps:$4 sm:$0xff]   ;;  %2434 = vmatpush1.bf16.msra.mxu0 %v5450_v3  ;;  %v5524_v3 = vld [vmem:[#allocation12 + $0xc4] ss:$8 sps:$4 sm:$0xff]  }
 0x5e0   : > { %v5519_v4 = vld [vmem:[#allocation14 + $0x1c0] ss:$16 sps:$4 sm:$0xff]  }
 0x5e2   : > { %2058 = vmatpush1.bf16.msra.mxu1 %v5396_v6  ;;  %v5458_v6 = vld [vmem:[#allocation12 + $0x14] ss:$8 sps:$4 sm:$0xff]  }
 0x5e3   : > { %2059 = vmatprep.subr.bf16.mxu1 %v5401_v7  ;;  %v5449_v7 = vld [vmem:[#allocation14 + $0x44] ss:$16 sps:$4 sm:$0xff]   ;;  %2435 = vmatprep.subr.bf16.mxu0 %v5458_v6  ;;  %v819_v6 = vld [vmem:[%s6864_s16 + $0x8] sm:$0xff] }
 0x5e6   : > { %2060 = vmatpush1.bf16.msra.mxu1 %v5399_v8  ;;  %v5456_v8 = vld [vmem:[#allocation12 + $0x10] ss:$8 sps:$4 sm:$0xff]  }
 0x5e7   : > { %2061 = vmatprep.subr.bf16.mxu1 %v5404_v9  ;;  %v5464_v9 = vld [vmem:[#allocation12 + $0x24] ss:$8 sps:$4 sm:$0xff]   ;;  %2436 = vmatpush1.bf16.msra.mxu0 %v5456_v8  ;;  %v5522_v8 = vld [vmem:[#allocation12 + $0xc0] ss:$8 sps:$4 sm:$0xff]  }
 0x5e8   : > { %2437 = vmatprep.subr.bf16.mxu0 %v5464_v9 }
 0x5ea   : > { %2062 = vmatpush1.bf16.msra.mxu1 %v5402_v10  ;;  %v5447_v10 = vld [vmem:[#allocation14 + $0x40] ss:$16 sps:$4 sm:$0xff]  }
 0x5eb   : > { %2063 = vmatprep.subr.bf16.mxu1 %v5407_v11  ;;  %v5455_v11 = vld [vmem:[#allocation14 + $0x64] ss:$16 sps:$4 sm:$0xff]  }
 0x5ee   : > { %2064 = vmatpush1.bf16.msra.mxu1 %v5405_v12  ;;  %v5462_v12 = vld [vmem:[#allocation12 + $0x20] ss:$8 sps:$4 sm:$0xff]  }
 0x5ef   : > { %2065 = vmatprep.subr.bf16.mxu1 %v5410_v13  ;;  %v5470_v13 = vld [vmem:[#allocation12 + $0x34] ss:$8 sps:$4 sm:$0xff]   ;;  %2438 = vmatpush1.bf16.msra.mxu0 %v5462_v12  ;;  %v818_v12 = vld [vmem:[%s6864_s16] sm:$0xff] }
 0x5f0   : > { %2439 = vmatprep.subr.bf16.mxu0 %v5470_v13  ;;  %v820_v13 = vld [vmem:[%s6864_s16 + $0x10] sm:$0xff] }
 0x5f2   : > { %2066 = vmatpush1.bf16.msra.mxu1 %v5408_v35  ;;  %v5453_v35 = vld [vmem:[#allocation14 + $0x60] ss:$16 sps:$4 sm:$0xff]  }
 0x5f3   : > { %2067 = vmatprep.subr.bf16.mxu1 %v5413_v14  ;;  %v5461_v14 = vld [vmem:[#allocation14 + $0x84] ss:$16 sps:$4 sm:$0xff]  }
 0x5f6   : > { %2068 = vmatpush1.bf16.msra.mxu1 %v5411_v36  ;;  %v5468_v36 = vld [vmem:[#allocation12 + $0x30] ss:$8 sps:$4 sm:$0xff]  }
 0x5f7   : > { %2069 = vmatprep.subr.bf16.mxu1 %v5416_v15  ;;  %v5476_v15 = vld [vmem:[#allocation12 + $0x44] ss:$8 sps:$4 sm:$0xff]   ;;  %2440 = vmatpush1.bf16.msra.mxu0 %v5468_v36 }
 0x5f8   : > { %2441 = vmatprep.subr.bf16.mxu0 %v5476_v15  ;;  %v5533_v36 = vld [vmem:[#allocation12 + $0xe4] ss:$8 sps:$4 sm:$0xff]   ;;  %v5531_v15 = vld [vmem:[#allocation12 + $0xe0] ss:$8 sps:$4 sm:$0xff]  }
 0x5fa   : > { %2070 = vmatpush1.bf16.msra.mxu1 %v5414_v43  ;;  %v5459_v43 = vld [vmem:[#allocation14 + $0x80] ss:$16 sps:$4 sm:$0xff]  }
 0x5fb   : > { %2071 = vmatprep.subr.bf16.mxu1 %v5419_v16  ;;  %v5467_v16 = vld [vmem:[#allocation14 + $0xa4] ss:$16 sps:$4 sm:$0xff]  }
 0x5fe   : > { %2072 = vmatpush1.bf16.msra.mxu1 %v5417_v44  ;;  %v5474_v44 = vld [vmem:[#allocation12 + $0x40] ss:$8 sps:$4 sm:$0xff]  }
 0x5ff   : > { %2073 = vmatprep.subr.bf16.mxu1 %v5422_v17  ;;  %v5482_v17 = vld [vmem:[#allocation12 + $0x54] ss:$8 sps:$4 sm:$0xff]   ;;  %2442 = vmatpush1.bf16.msra.mxu0 %v5474_v44 }
 0x600   : > { %2443 = vmatprep.subr.bf16.mxu0 %v5482_v17 }
 0x602   : > { %2074 = vmatpush1.bf16.msra.mxu1 %v5420_v45  ;;  %v5465_v45 = vld [vmem:[#allocation14 + $0xa0] ss:$16 sps:$4 sm:$0xff]  }
 0x603   : > { %2075 = vmatprep.subr.bf16.mxu1 %v5425_v20  ;;  %v5473_v20 = vld [vmem:[#allocation14 + $0xc4] ss:$16 sps:$4 sm:$0xff]  }
 0x606   : > { %2076 = vmatpush1.bf16.msra.mxu1 %v5423_v46  ;;  %v5480_v46 = vld [vmem:[#allocation12 + $0x50] ss:$8 sps:$4 sm:$0xff]  }
 0x607   : > { %2077 = vmatprep.subr.bf16.mxu1 %v5428_v21  ;;  %v5488_v21 = vld [vmem:[#allocation12 + $0x64] ss:$8 sps:$4 sm:$0xff]   ;;  %2444 = vmatpush1.bf16.msra.mxu0 %v5480_v46 }
 0x608   : > { %2445 = vmatprep.subr.bf16.mxu0 %v5488_v21 }
 0x60a   : > { %2078 = vmatpush1.bf16.msra.mxu1 %v5426_v22  ;;  %v5471_v22 = vld [vmem:[#allocation14 + $0xc0] ss:$16 sps:$4 sm:$0xff]  }
 0x60b   : > { %2079 = vmatprep.subr.bf16.mxu1 %v5431_v23  ;;  %v5479_v23 = vld [vmem:[#allocation14 + $0xe4] ss:$16 sps:$4 sm:$0xff]  }
 0x60e   : > { %2080 = vmatpush1.bf16.msra.mxu1 %v5429_v24  ;;  %v5486_v24 = vld [vmem:[#allocation12 + $0x60] ss:$8 sps:$4 sm:$0xff]  }
 0x60f   : > { %2081 = vmatprep.subr.bf16.mxu1 %v5434_v25  ;;  %v5477_v25 = vld [vmem:[#allocation14 + $0xe0] ss:$16 sps:$4 sm:$0xff]   ;;  %2446 = vmatpush1.bf16.msra.mxu0 %v5486_v24  ;;  %v2119_v24 = vstv %s4710_s9  ;;  %s802_s9 = sand.u32 1, %s7312_s21  }
 0x612   : > { %2082 = vmatpush1.bf16.msra.mxu1 %v5432_v26  ;;  %v5485_v26 = vld [vmem:[#allocation14 + $0x104] ss:$16 sps:$4 sm:$0xff]  }
 0x613   : > { %2083 = vmatprep.subr.bf16.mxu1 %v5437_v28  ;;  %v5491_v28 = vld [vmem:[#allocation14 + $0x124] ss:$16 sps:$4 sm:$0xff]  }
 0x616   : > { %2084 = vmatpush1.bf16.msra.mxu1 %v5435_v27  ;;  %v5483_v27 = vld [vmem:[#allocation14 + $0x100] ss:$16 sps:$4 sm:$0xff]  }
 0x617   : > { %2085 = vmatprep.subr.bf16.mxu1 %v5440_v29  ;;  %v5489_v29 = vld [vmem:[#allocation14 + $0x120] ss:$16 sps:$4 sm:$0xff]  }
 0x61a   : > { %2086 = vmatpush1.bf16.msra.mxu1 %v5438_v30 }
 0x61b   : > { %2817 = vmatprep.subr.bf16.mxu1 %v5443_v1  ;;  %v5518_v1 = vld [vmem:[#allocation12 + $0xb4] ss:$8 sps:$4 sm:$0xff]  }
 0x6a8   : > { %v1833_v31 = vpop.f32.mrb[12].mxu1 }
 0x6a9   : > { %v5013_v32 = vpop.f32.mrb[13].mxu1  ;;  %v1882_v40 = vpack.c.bf16 %v1833_v31, %v1833_v31 }
 0x6aa   : > { %v1836_v33 = vpop.f32.mrb[14].mxu1 }
 0x6ab   : > { %v5014_v34 = vpop.f32.mrb[15].mxu1 }
 0x6b0   : > { %v1876_v37 = vpop.f32.mrb[16].mxu1 }
 0x6b1   : > { %v1883_v38 = vpack.c.bf16 %v1876_v37, %v1876_v37  ;;  %v5019_v39 = vpop.f32.mrb[17].mxu1 }
 0x6b2   : > { %v1879_v41 = vpop.f32.mrb[18].mxu1  ;;  %v5494_v39 = vld [vmem:[#allocation12 + $0x74] ss:$8 sps:$4 sm:$0xff]  }
 0x6b3   : > { %v5020_v42 = vpop.f32.mrb[19].mxu1  ;;  %2087 = vmatprep.mubr.bf16.mxu1 %v1883_v38  ;;  %2447 = vmatprep.subr.bf16.mxu0 %v5494_v39  ;;  %v5497_v41 = vld [vmem:[#allocation14 + $0x144] ss:$16 sps:$4 sm:$0xff]   ;;  %v7038_v39 = vld [vmem:[%s7308_s26] sm:$0xf] }
 0x6b4   : > { %2088 = vmatmul.mubr.bf16.vlgmr.msra.gmra.mrb[20].mxu1 %v1882_v40  ;;  %v5492_v40 = vld [vmem:[#allocation12 + $0x70] ss:$8 sps:$4 sm:$0xff]  }
 0x6b5   : > { %2818 = vmatpush1.bf16.msra.mxu1 %v5441_v0  ;;  %2448 = vmatpush1.bf16.msra.mxu0 %v5492_v40  ;;  %v5495_v42 = vld [vmem:[#allocation14 + $0x140] ss:$16 sps:$4 sm:$0xff]  }
 0x6b6   : > { %2819 = vmatprep.subr.bf16.mxu1 %v5446_v2  ;;  %2449 = vmatprep.subr.bf16.mxu0 %v5500_v47  ;;  %v5516_v0 = vld [vmem:[#allocation12 + $0xb0] ss:$8 sps:$4 sm:$0xff]   ;;  %v5521_v2 = vld [vmem:[#allocation14 + $0x1c4] ss:$16 sps:$4 sm:$0xff]  }
 0x6b9   : > { %2820 = vmatpush1.bf16.msra.mxu1 %v5444_v5  ;;  %v5527_v5 = vld [vmem:[#allocation14 + $0x1e4] ss:$16 sps:$4 sm:$0xff]  }
 0x6ba   : > { %2821 = vmatprep.subr.bf16.mxu1 %v5449_v7  ;;  %v821_v7 = vld [vmem:[%s6864_s16 + $0x18] sm:$0xff]  ;;  %s4973_s16 = sshll.u32 %s7304_s11, 1 }
 0x6bb   : > { %v2475_v9 = vpack.c.bf16 %v821_v7, %v819_v6 }
 0x6bd   : > { %2822 = vmatpush1.bf16.msra.mxu1 %v5447_v10  ;;  %v5530_v10 = vld [vmem:[#allocation12 + $0xd4] ss:$8 sps:$4 sm:$0xff]   ;;  %2849 = vmatprep.mubr.bf16.mxu1 %v2475_v9 }
 0x6be   : > { %2823 = vmatprep.subr.bf16.mxu1 %v5455_v11  ;;  %v5525_v11 = vld [vmem:[#allocation14 + $0x1e0] ss:$16 sps:$4 sm:$0xff]  }
 0x6c1   : > { %2824 = vmatpush1.bf16.msra.mxu1 %v5453_v35  ;;  %v5528_v35 = vld [vmem:[#allocation12 + $0xd0] ss:$8 sps:$4 sm:$0xff]  }
 0x6c2   : > { %2825 = vmatprep.subr.bf16.mxu1 %v5461_v14  ;;  %v7027_v14 = vpack.c.bf16 %v820_v13, %v818_v12  ;;  %v5545_v12 = vld [vmem:[#allocation14 + $0x4c] ss:$16 sps:$4 sm:$0xff]   ;;  %v5543_v13 = vld [vmem:[#allocation14 + $0x48] ss:$16 sps:$4 sm:$0xff]  }
 0x6c5   : > { %2826 = vmatpush1.bf16.msra.mxu1 %v5459_v43  ;;  %v5536_v43 = vld [vmem:[#allocation12 + $0xf4] ss:$8 sps:$4 sm:$0xff]  }
 0x6c6   : > { %2827 = vmatprep.subr.bf16.mxu1 %v5467_v16  ;;  %v5534_v16 = vld [vmem:[#allocation12 + $0xf0] ss:$8 sps:$4 sm:$0xff]  }
 0x6c9   : > { %2828 = vmatpush1.bf16.msra.mxu1 %v5465_v45 }
 0x6ca   : > { %2829 = vmatprep.subr.bf16.mxu1 %v5473_v20 }
 0x6cd   : > { %2830 = vmatpush1.bf16.msra.mxu1 %v5471_v22 }
 0x6ce   : > { %2831 = vmatprep.subr.bf16.mxu1 %v5479_v23 }
 0x6d1   : > { %2832 = vmatpush1.bf16.msra.mxu1 %v5477_v25 }
 0x6d2   : > { %2833 = vmatprep.subr.bf16.mxu1 %v5485_v26 }
 0x6d5   : > { %2834 = vmatpush1.bf16.msra.mxu1 %v5483_v27 }
 0x6d6   : > { %2835 = vmatprep.subr.bf16.mxu1 %v5491_v28  ;;  %v2126_v28 = vstv %s4711_s14  ;;  %s4575_s14 = sshll.u32 %s802_s9, 4 }
 0x6d7   : > { %s804_s17 = scalar_lea.vmem [#allocation21], %s4575_s14  ;;  %s6166_s14 = sshll.u32 %s6331_s4, 4  ;;  %s6167_s14 = int_to_ptr.vmem [resolvable:$false] %s6166_s14 }
 0x6d8   : > { %s4347_s7 = sshll.u32 %s804_s17, 4  ;;  %s7133_s7 = int_to_ptr.vmem [resolvable:$true] %s4347_s7 }
 0x6d9   : > { %2836 = vmatpush1.bf16.msra.mxu1 %v5489_v29  ;;  %s6162_s21 = scalar_lea.vmem %s7133_s7, 256  ;;  %p6169_p2 = scmp.lt.s32.totalorder %s7133_s7, %s6167_s14 }
 0x6da   : > { %2837 = vmatprep.subr.bf16.mxu1 %v5497_v41  ;;  %p6163_p12 = scmp.ne.s32.totalorder %s7133_s7, %s6162_s21 }
 0x6dc   : > { %p6164_p5 = pnand %p6163_p12, %p7317_p4 }
 0x6dd   : > { %2838 = vmatpush1.bf16.msra.mxu1 %v5495_v42 }
 0x6de   : > { %p6165_p6 = pneg %p6164_p5 }
 0x787   : > { %v2089_v50 = vpop.f32.mrb[20].mxu1 }
 0x788   : > { %v2090_v51 = vadd.f32 %v2089_v50, %v1888_v48  ;;  %v2091_v52 = vpop.f32.mrb[21].mxu1  ;;  %v5498_v48 = vld [vmem:[#allocation12 + $0x80] ss:$8 sps:$4 sm:$0xff]  }
 0x789   : > { %v2092_v53 = vadd.f32 %v2091_v52, %v1892_v49  ;;  %v2093_v54 = vpop.f32.mrb[22].mxu1  ;;  %v5503_v49 = vld [vmem:[#allocation14 + $0x164] ss:$16 sps:$4 sm:$0xff]   ;;  %2450 = vmatpush1.bf16.msra.mxu0 %v5498_v48  ;;  %v5501_v50 = vld [vmem:[#allocation14 + $0x160] ss:$16 sps:$4 sm:$0xff]  }
 0x78a   : > { %v7006_v57 = vadd.f32 %v5861_v56, %v2090_v51  ;;  %v2094_v59 = vpop.f32.mrb[23].mxu1  ;;  %2839 = vmatprep.subr.bf16.mxu1 %v5503_v49  ;;  %v5506_v51 = vld [vmem:[#allocation12 + $0x94] ss:$8 sps:$4 sm:$0xff]   ;;  %v5504_v52 = vld [vmem:[#allocation12 + $0x90] ss:$8 sps:$4 sm:$0xff]  }
 0x78b   : > { %v7009_v62 = vadd.f32 %v5862_v61, %v2092_v53  ;;  %2840 = vmatpush1.bf16.msra.mxu1 %v5501_v50  ;;  %2451 = vmatprep.subr.bf16.mxu0 %v5506_v51  ;;  %v5509_v53 = vld [vmem:[#allocation14 + $0x184] ss:$16 sps:$4 sm:$0xff]   ;;  %v5507_v54 = vld [vmem:[#allocation14 + $0x180] ss:$16 sps:$4 sm:$0xff]  }
 0x78c   : > { %2841 = vmatprep.subr.bf16.mxu1 %v5509_v53  ;;  %v5512_v56 = vld [vmem:[#allocation12 + $0xa4] ss:$8 sps:$4 sm:$0xff]   ;;  %v5510_v59 = vld [vmem:[#allocation12 + $0xa0] ss:$8 sps:$4 sm:$0xff]  }
 0x78d   : > { %v2100_v63 = vadd.f32 %v7009_v62, %v7006_v57  ;;  %2452 = vmatpush1.bf16.msra.mxu0 %v5504_v52  ;;  %v5513_v61 = vld [vmem:[#allocation14 + $0x1a0] ss:$16 sps:$4 sm:$0xff]  }
 0x78e   : > { %2453 = vmatprep.subr.bf16.mxu0 %v5512_v56 }
 0x78f   : > { %2101 = vadd.xlane.f32.xlu0 %v2100_v63  ;;  %2842 = vmatpush1.bf16.msra.mxu1 %v5507_v54  ;;  %v5515_v63 = vld [vmem:[#allocation14 + $0x1a4] ss:$16 sps:$4 sm:$0xff]   ;;  %v2161_v54 = vld [vmem:[%s7309_s12] sm:$0x3]  ;;  %s4343_s12 = sadd.s32 %s4974_s30, %s4973_s16  ;;  %s6168_s16 = scalar_lea.vmem %s6167_s14, 512 }
 0x790   : > { %2843 = vmatprep.subr.bf16.mxu1 %v5515_v63  ;;  %v2266_v56 = vrot.slane %v2161_v54, %v6965_v58  ;;  %v2270_v63 = vrot.slane %v2161_v54, %v6970_v60  ;;  %s4975_s11 = sshll.u32 %s4343_s12, 7  ;;  %p6170_p3 = scmp.lt.s32.totalorder %s6168_s16, %s6162_s21 }
 0x791   : > { %2454 = vmatpush1.bf16.msra.mxu0 %v5510_v59 }
 0x792   : > { %2455 = vmatprep.subr.bf16.mxu0 %v5518_v1  ;;  %p6171_p0 = por %p6170_p3, %p6169_p2 }
 0x793   : > { %2844 = vmatpush1.bf16.msra.mxu1 %v5513_v61 }
 0x794   : > { %2845 = vmatprep.subr.bf16.mxu1 %v5521_v2  ;;  %p6172_p8 = pnand %p6171_p0, %p6165_p6 }
 0x795   : > { %2456 = vmatpush1.bf16.msra.mxu0 %v5516_v0 }
 0x796   : > { %2457 = vmatprep.subr.bf16.mxu0 %v5524_v3 }
 0x797   : > { %2846 = vmatpush1.bf16.msra.mxu1 %v5519_v4 }
 0x798   : > { %2847 = vmatprep.subr.bf16.mxu1 %v5527_v5 }
 0x799   : > { %2458 = vmatpush1.bf16.msra.mxu0 %v5522_v8  ;;  %v5537_v8 = vld [vmem:[#allocation14 + $0x8] ss:$16 sps:$4 sm:$0xff]  }
 0x79a   : > { %2459 = vmatprep.subr.bf16.mxu0 %v5530_v10  ;;  %v5542_v10 = vld [vmem:[#allocation14 + $0x2c] ss:$16 sps:$4 sm:$0xff]  }
 0x79b   : > { %2848 = vmatpush1.bf16.msra.mxu1 %v5525_v11  ;;  %v5540_v11 = vld [vmem:[#allocation14 + $0x28] ss:$16 sps:$4 sm:$0xff]  }
 0x79c   : > { %5021 = vmatprep.subr.bf16.mxu1 %v6329_v55 }
 0x79d   : > { %2460 = vmatpush1.bf16.msra.mxu0 %v5528_v35  ;;  %v5548_v35 = vld [vmem:[#allocation14 + $0x6c] ss:$16 sps:$4 sm:$0xff]  }
 0x79e   : > { %2850 = vmatmul.mubr.bf16.vlgmr.msra.gmra.mrb[24].mxu1 %v7027_v14  ;;  %2461 = vmatprep.subr.bf16.mxu0 %v5533_v36  ;;  %v5546_v36 = vld [vmem:[#allocation14 + $0x68] ss:$16 sps:$4 sm:$0xff]  }
 0x79f   : > { %5023 = vmatprep.mubr.msk.bf16.mxu1 %vm6330_vm6, %v6329_v55 }
 0x7a1   : > { %2462 = vmatpush1.bf16.msra.mxu0 %v5531_v15  ;;  %v5551_v15 = vld [vmem:[#allocation14 + $0x8c] ss:$16 sps:$4 sm:$0xff]  }
 0x7a2   : > { %2463 = vmatprep.subr.bf16.mxu0 %v5536_v43  ;;  %v5549_v43 = vld [vmem:[#allocation14 + $0x88] ss:$16 sps:$4 sm:$0xff]  }
 0x7a5   : > { %2464 = vmatpush1.bf16.msra.mxu0 %v5534_v16  ;;  %v5554_v16 = vld [vmem:[#allocation14 + $0xac] ss:$16 sps:$4 sm:$0xff]  }
 0x81c   : > { %v2102_v30 = vpop.xlane.xlu0 %2101 }
 0x81d   : > { %v2103_v31 = vmul.f32 0.00390625, %v2102_v30 }
 0x81f   : > { %v7014_v32 = vsub.f32 %v7006_v57, %v2103_v31  ;;  %v7017_v33 = vsub.f32 %v7009_v62, %v2103_v31 }
 0x821   : > { %v2106_v34 = vmul.f32 %v7014_v32, %v7014_v32  ;;  %v2107_v37 = vmul.f32 %v7017_v33, %v7017_v33  ;;  %v2120_v25 = vmul.f32 %v2119_v24, %v7014_v32  ;;  %v2121_v26 = vmul.f32 %v2119_v24, %v7017_v33  ;;  %v5564_v24 = vld [vmem:[#allocation14 + $0x128] ss:$16 sps:$4 sm:$0xff]  }
 0x822   : > { %v2480_v32 = vrot.slane %v7038_v39, %v6965_v58  ;;  %v2484_v33 = vrot.slane %v7038_v39, %v6970_v60 }
 0x823   : > { %v2108_v38 = vadd.f32 %v2107_v37, %v2106_v34 }
 0x825   : > { %2109 = vadd.xlane.f32.xlu1 %v2108_v38 }
 0x871   : > { %v2851_v40 = vpop.f32.mrb[24].mxu1 }
 0x872   : > { %v2852_v41 = vadd.f32 %v2851_v40, %v2480_v32  ;;  %v2853_v42 = vpop.f32.mrb[25].mxu1 }
 0x873   : > { %v2854_v47 = vadd.f32 %v2853_v42, %v2484_v33  ;;  %v2855_v48 = vpop.f32.mrb[26].mxu1 }
 0x874   : > { %v2856_v49 = vadd.f32 %v2855_v48, %v2480_v32  ;;  %v2857_v50 = vpop.f32.mrb[27].mxu1  ;;  %v5584_v32 = vld [vmem:[#allocation14 + $0x1ec] ss:$16 sps:$4 sm:$0xff]  }
 0x875   : > { %v2858_v51 = vadd.f32 %v2857_v50, %v2484_v33  ;;  %v5582_v33 = vld [vmem:[#allocation14 + $0x1e8] ss:$16 sps:$4 sm:$0xff]  }
 0x876   : > { %v2907_v52 = vpack.c.bf16 %v2856_v49, %v2852_v41 }
 0x877   : > { %v2908_v53 = vpack.c.bf16 %v2858_v51, %v2854_v47 }
 0x878   : > { %5022 = vmatpush3.bf16.xpose.msra.mxu1 %v2907_v52 }
 0x879   : > { %5027 = vmatprep.subr.bf16.mxu1 %v6329_v55 }
 0x8b2   : > { %v2110_v44 = vpop.xlane.xlu1 %2109 }
 0x8b3   : > { %v2111_v17 = vmul.f32 0.003921569, %v2110_v44  ;;  %v5552_v44 = vld [vmem:[#allocation14 + $0xa8] ss:$16 sps:$4 sm:$0xff]  }
 0x8b5   : > { %5845 = vrsqrt.f32 %v2111_v17  ;;  %vm2114_vm8 = vcmp.eq.f32.partialorder %v2111_v17, inf  ;;  %v2117_v46 = vand.u32 2147483648, %v2111_v17  ;;  %vm2116_vm9 = vcmp.eq.f32.partialorder %v2111_v17, 0.0 }
 0x8bf   : > { %v5846_v45 = vpop.eup %5845 }
 0x8c0   : > { %v2113_v20 = vmul.f32 %v5846_v45, %v2111_v17  ;;  %v5555_v45 = vld [vmem:[#allocation14 + $0xc8] ss:$16 sps:$4 sm:$0xff]  }
 0x8c2   : > { %v2115_v21 = vsel %vm2114_vm8, %v2111_v17, %v2113_v20  ;;  %v5557_v17 = vld [vmem:[#allocation14 + $0xcc] ss:$16 sps:$4 sm:$0xff]  }
 0x8c3   : > { %v2118_v22 = vsel %vm2116_vm9, %v2117_v46, %v2115_v21  ;;  %v5560_v20 = vld [vmem:[#allocation14 + $0xec] ss:$16 sps:$4 sm:$0xff]   ;;  %v5558_v46 = vld [vmem:[#allocation14 + $0xe8] ss:$16 sps:$4 sm:$0xff]  }
 0x8c4   : > { %v2122_v23 = vadd.f32 1e-06, %v2118_v22  ;;  %v5563_v21 = vld [vmem:[#allocation14 + $0x10c] ss:$16 sps:$4 sm:$0xff]   ;;  %v5561_v22 = vld [vmem:[#allocation14 + $0x108] ss:$16 sps:$4 sm:$0xff]  }
 0x8c6   : > { %5847 = vrcp.f32 %v2122_v23  ;;  %v5566_v23 = vld [vmem:[#allocation14 + $0x12c] ss:$16 sps:$4 sm:$0xff]  }
 0x8d0   : > { %v5848_v27 = vpop.eup %5847 }
 0x8d1   : > { %v2124_v29 = vmul.f32 %v5848_v27, %v2120_v25  ;;  %v2125_v30 = vmul.f32 %v5848_v27, %v2121_v26  ;;  %v5569_v25 = vld [vmem:[#allocation14 + $0x14c] ss:$16 sps:$4 sm:$0xff]   ;;  %v5567_v26 = vld [vmem:[#allocation14 + $0x148] ss:$16 sps:$4 sm:$0xff]  }
 0x8d2   : > { %v5572_v27 = vld [vmem:[#allocation14 + $0x16c] ss:$16 sps:$4 sm:$0xff]  }
 0x8d3   : > { %v2127_v31 = vadd.f32 %v2126_v28, %v2124_v29  ;;  %v2128_v34 = vadd.f32 %v2126_v28, %v2125_v30  ;;  %v5570_v28 = vld [vmem:[#allocation14 + $0x168] ss:$16 sps:$4 sm:$0xff]   ;;  %v5575_v29 = vld [vmem:[#allocation14 + $0x18c] ss:$16 sps:$4 sm:$0xff]  }
 0x8d4   : > { %v5573_v30 = vld [vmem:[#allocation14 + $0x188] ss:$16 sps:$4 sm:$0xff]  }
 0x8d5   : > { %v2260_v37 = vpack.c.bf16 %v2127_v31, %v2127_v31  ;;  %v2261_v38 = vpack.c.bf16 %v2128_v34, %v2128_v34  ;;  %v5578_v31 = vld [vmem:[#allocation14 + $0x1ac] ss:$16 sps:$4 sm:$0xff]   ;;  %v5576_v34 = vld [vmem:[#allocation14 + $0x1a8] ss:$16 sps:$4 sm:$0xff]  }
 0x8d7   : > { %2465 = vmatprep.mubr.bf16.mxu0 %v2261_v38  ;;  %v5579_v38 = vld [vmem:[#allocation14 + $0x1c8] ss:$16 sps:$4 sm:$0xff]  }
 0x8d8   : > { %2466 = vmatmul.mubr.bf16.vlgmr.msra.gmra.mrb[8].mxu0 %v2260_v37  ;;  %v5581_v37 = vld [vmem:[#allocation14 + $0x1cc] ss:$16 sps:$4 sm:$0xff]  }
 0x8d9   : > { %2892 = vmatprep.mubr.bf16.mxu0 %v2475_v9  ;;  %v5539_v9 = vld [vmem:[#allocation14 + $0xc] ss:$16 sps:$4 sm:$0xff]  }
 0x8da   : > { %2860 = vmatprep.subr.bf16.mxu0 %v5539_v9 }
 0x8db   : > { %2861 = vmatpush1.bf16.msra.mxu0 %v5537_v8 }
 0x8dc   : > { %2862 = vmatprep.subr.bf16.mxu0 %v5542_v10 }
 0x8df   : > { %2863 = vmatpush1.bf16.msra.mxu0 %v5540_v11 }
 0x8e0   : > { %2864 = vmatprep.subr.bf16.mxu0 %v5545_v12 }
 0x8e3   : > { %2865 = vmatpush1.bf16.msra.mxu0 %v5543_v13 }
 0x8e4   : > { %2866 = vmatprep.subr.bf16.mxu0 %v5548_v35 }
 0x8e7   : > { %2867 = vmatpush1.bf16.msra.mxu0 %v5546_v36 }
 0x8e8   : > { %2868 = vmatprep.subr.bf16.mxu0 %v5551_v15  ;;  %v5585_v15 = vld [vmem:[#allocation15] ss:$8 sps:$4 sm:$0xff]  }
 0x8eb   : > { %2869 = vmatpush1.bf16.msra.mxu0 %v5549_v43  ;;  %v5587_v43 = vld [vmem:[#allocation15 + $0x4] ss:$8 sps:$4 sm:$0xff]  }
 0x8ec   : > { %2870 = vmatprep.subr.bf16.mxu0 %v5554_v16  ;;  %v5590_v16 = vld [vmem:[#allocation15 + $0x14] ss:$8 sps:$4 sm:$0xff]  }
 0x8ef   : > { %2871 = vmatpush1.bf16.msra.mxu0 %v5552_v44  ;;  %v5593_v44 = vld [vmem:[#allocation15 + $0x24] ss:$8 sps:$4 sm:$0xff]  }
 0x8f0   : > { %2872 = vmatprep.subr.bf16.mxu0 %v5557_v17  ;;  %v5591_v17 = vld [vmem:[#allocation15 + $0x20] ss:$8 sps:$4 sm:$0xff]  }
 0x8f3   : > { %2873 = vmatpush1.bf16.msra.mxu0 %v5555_v45  ;;  %v5596_v45 = vld [vmem:[#allocation15 + $0x34] ss:$8 sps:$4 sm:$0xff]  }
 0x8f4   : > { %2874 = vmatprep.subr.bf16.mxu0 %v5560_v20  ;;  %v5594_v20 = vld [vmem:[#allocation15 + $0x30] ss:$8 sps:$4 sm:$0xff]  }
 0x8f7   : > { %2875 = vmatpush1.bf16.msra.mxu0 %v5558_v46  ;;  %v5599_v46 = vld [vmem:[#allocation15 + $0x44] ss:$8 sps:$4 sm:$0xff]  }
 0x8f8   : > { %2876 = vmatprep.subr.bf16.mxu0 %v5563_v21  ;;  %v5597_v21 = vld [vmem:[#allocation15 + $0x40] ss:$8 sps:$4 sm:$0xff]  }
 0x8fb   : > { %2877 = vmatpush1.bf16.msra.mxu0 %v5561_v22  ;;  %v5602_v22 = vld [vmem:[#allocation15 + $0x54] ss:$8 sps:$4 sm:$0xff]  }
 0x8fc   : > { %2878 = vmatprep.subr.bf16.mxu0 %v5566_v23  ;;  %v5600_v23 = vld [vmem:[#allocation15 + $0x50] ss:$8 sps:$4 sm:$0xff]  }
 0x8ff   : > { %2879 = vmatpush1.bf16.msra.mxu0 %v5564_v24  ;;  %v5605_v24 = vld [vmem:[#allocation15 + $0x64] ss:$8 sps:$4 sm:$0xff]  }
 0x900   : > { %2880 = vmatprep.subr.bf16.mxu0 %v5569_v25  ;;  %v5603_v25 = vld [vmem:[#allocation15 + $0x60] ss:$8 sps:$4 sm:$0xff]  }
 0x903   : > { %2881 = vmatpush1.bf16.msra.mxu0 %v5567_v26  ;;  %v5608_v26 = vld [vmem:[#allocation15 + $0x74] ss:$8 sps:$4 sm:$0xff]  }
 0x904   : > { %2882 = vmatprep.subr.bf16.mxu0 %v5572_v27  ;;  %v5606_v27 = vld [vmem:[#allocation15 + $0x70] ss:$8 sps:$4 sm:$0xff]  }
 0x907   : > { %2883 = vmatpush1.bf16.msra.mxu0 %v5570_v28  ;;  %v5611_v28 = vld [vmem:[#allocation15 + $0x84] ss:$8 sps:$4 sm:$0xff]  }
 0x908   : > { %2884 = vmatprep.subr.bf16.mxu0 %v5575_v29  ;;  %v5609_v29 = vld [vmem:[#allocation15 + $0x80] ss:$8 sps:$4 sm:$0xff]  }
 0x90b   : > { %2885 = vmatpush1.bf16.msra.mxu0 %v5573_v30  ;;  %v5614_v30 = vld [vmem:[#allocation15 + $0x94] ss:$8 sps:$4 sm:$0xff]  }
 0x90c   : > { %2886 = vmatprep.subr.bf16.mxu0 %v5578_v31  ;;  %v5612_v31 = vld [vmem:[#allocation15 + $0x90] ss:$8 sps:$4 sm:$0xff]  }
 0x90f   : > { %2887 = vmatpush1.bf16.msra.mxu0 %v5576_v34  ;;  %v5617_v34 = vld [vmem:[#allocation15 + $0xa4] ss:$8 sps:$4 sm:$0xff]  }
 0x910   : > { %2888 = vmatprep.subr.bf16.mxu0 %v5581_v37  ;;  %v5615_v37 = vld [vmem:[#allocation15 + $0xa0] ss:$8 sps:$4 sm:$0xff]  }
 0x913   : > { %2889 = vmatpush1.bf16.msra.mxu0 %v5579_v38  ;;  %v5620_v38 = vld [vmem:[#allocation15 + $0xb4] ss:$8 sps:$4 sm:$0xff]  }
 0x914   : > { %2890 = vmatprep.subr.bf16.mxu0 %v5584_v32  ;;  %v5618_v32 = vld [vmem:[#allocation15 + $0xb0] ss:$8 sps:$4 sm:$0xff]  }
 0x917   : > { %2891 = vmatpush1.bf16.msra.mxu0 %v5582_v33  ;;  %v5623_v33 = vld [vmem:[#allocation15 + $0xc4] ss:$8 sps:$4 sm:$0xff]  }
 0x918   : > { %3274 = vmatprep.subr.bf16.mxu0 %v5587_v43 }
 0x91a   : > { %2893 = vmatmul.mubr.bf16.vlgmr.msra.gmra.mrb[12].mxu0 %v7027_v14 }
 0x91b   : > { %3275 = vmatpush1.bf16.msra.mxu0 %v5585_v15 }
 0x91c   : > { %3276 = vmatprep.subr.bf16.mxu0 %v5590_v16 }
 0x9ab   : > { %v2467_v59 = vpop.f32.mrb[8].mxu0 }
 0x9ac   : > { %v2468_v61 = vadd.f32 %v2467_v59, %v2266_v56  ;;  %v2469_v0 = vpop.f32.mrb[9].mxu0 }
 0x9ad   : > { %v2471_v1 = vpop.f32.mrb[10].mxu0  ;;  %v2470_v5 = vadd.f32 %v2469_v0, %v2270_v63 }
 0x9ae   : > { %v2903_v2 = vmul.f32 0.088388346, %v2468_v61  ;;  %v2472_v3 = vpop.f32.mrb[11].mxu0 }
 0x9af   : > { %v2904_v6 = vmul.f32 0.088388346, %v2470_v5 }
 0x9b0   : > { %v2905_v4 = vpack.c.bf16 %v2903_v2, %v2903_v2 }
 0x9b1   : > { %v2906_v7 = vpack.c.bf16 %v2904_v6, %v2904_v6  ;;  %v2488_v6 = vrot.slane %v7038_v39, %v6985_v18 }
 0x9b2   : > { %5024 = vmatmul.mubr.bf16.vlgmr.msra.gmra.mrb[28].mxu1 %v2905_v4 }
 0x9b3   : > { %5028 = vmatpush3.bf16.xpose.msra.mxu1 %v2908_v53  ;;  %5029 = vmatprep.mubr.msk.bf16.mxu1 %vm6330_vm6, %v6329_v55 }
 0x9b4   : > { %5033 = vmatprep.subr.bf16.mxu1 %v6329_v55 }
 0x9ba   : > { %5030 = vmatmul.mubr.bf16.vlgmr.msra.gmra.mrb[32].mxu1 %v2906_v7  ;;  %v2492_v7 = vrot.slane %v7038_v39, %v6987_v19  ;;  %v5588_v39 = vld [vmem:[#allocation15 + $0x10] ss:$8 sps:$4 sm:$0xff]  }
 0x9bb   : > { %5035 = vmatprep.mubr.msk.bf16.mxu1 %vm6330_vm6, %v6329_v55  ;;  %3277 = vmatpush1.bf16.msra.mxu0 %v5588_v39 }
 0x9bc   : > { %3278 = vmatprep.subr.bf16.mxu0 %v5593_v44  ;;  %v5633_v44 = vld [vmem:[#allocation17] ss:$16 sps:$4 sm:$0xff]  }
 0x9bf   : > { %3279 = vmatpush1.bf16.msra.mxu0 %v5591_v17  ;;  %v5635_v17 = vld [vmem:[#allocation17 + $0x4] ss:$16 sps:$4 sm:$0xff]  }
 0x9c0   : > { %3280 = vmatprep.subr.bf16.mxu0 %v5596_v45  ;;  %v5636_v45 = vld [vmem:[#allocation17 + $0x8] ss:$16 sps:$4 sm:$0xff]  }
 0x9c3   : > { %3281 = vmatpush1.bf16.msra.mxu0 %v5594_v20  ;;  %v5638_v20 = vld [vmem:[#allocation17 + $0xc] ss:$16 sps:$4 sm:$0xff]  }
 0x9c4   : > { %3282 = vmatprep.subr.bf16.mxu0 %v5599_v46  ;;  %v5641_v46 = vld [vmem:[#allocation17 + $0x24] ss:$16 sps:$4 sm:$0xff]  }
 0x9c7   : > { %3283 = vmatpush1.bf16.msra.mxu0 %v5597_v21  ;;  %v5644_v21 = vld [vmem:[#allocation17 + $0x2c] ss:$16 sps:$4 sm:$0xff]  }
 0x9c8   : > { %3284 = vmatprep.subr.bf16.mxu0 %v5602_v22  ;;  %v5639_v22 = vld [vmem:[#allocation17 + $0x20] ss:$16 sps:$4 sm:$0xff]  }
 0x9cb   : > { %3285 = vmatpush1.bf16.msra.mxu0 %v5600_v23  ;;  %v5647_v23 = vld [vmem:[#allocation17 + $0x44] ss:$16 sps:$4 sm:$0xff]  }
 0x9cc   : > { %3286 = vmatprep.subr.bf16.mxu0 %v5605_v24  ;;  %v5645_v24 = vld [vmem:[#allocation17 + $0x40] ss:$16 sps:$4 sm:$0xff]  }
 0x9cf   : > { %3287 = vmatpush1.bf16.msra.mxu0 %v5603_v25  ;;  %v5648_v25 = vld [vmem:[#allocation17 + $0x48] ss:$16 sps:$4 sm:$0xff]  }
 0x9d0   : > { %3288 = vmatprep.subr.bf16.mxu0 %v5608_v26  ;;  %v5653_v26 = vld [vmem:[#allocation17 + $0x64] ss:$16 sps:$4 sm:$0xff]  }
 0x9d3   : > { %3289 = vmatpush1.bf16.msra.mxu0 %v5606_v27  ;;  %v5656_v27 = vld [vmem:[#allocation17 + $0x6c] ss:$16 sps:$4 sm:$0xff]  }
 0x9d4   : > { %3290 = vmatprep.subr.bf16.mxu0 %v5611_v28  ;;  %v5651_v28 = vld [vmem:[#allocation17 + $0x60] ss:$16 sps:$4 sm:$0xff]  }
 0x9d7   : > { %3291 = vmatpush1.bf16.msra.mxu0 %v5609_v29  ;;  %v5654_v29 = vld [vmem:[#allocation17 + $0x68] ss:$16 sps:$4 sm:$0xff]  }
 0x9d8   : > { %3292 = vmatprep.subr.bf16.mxu0 %v5614_v30  ;;  %v5659_v30 = vld [vmem:[#allocation17 + $0x84] ss:$16 sps:$4 sm:$0xff]  }
 0x9db   : > { %3293 = vmatpush1.bf16.msra.mxu0 %v5612_v31  ;;  %v5662_v31 = vld [vmem:[#allocation17 + $0x8c] ss:$16 sps:$4 sm:$0xff]  }
 0x9dc   : > { %3294 = vmatprep.subr.bf16.mxu0 %v5617_v34  ;;  %v5657_v34 = vld [vmem:[#allocation17 + $0x80] ss:$16 sps:$4 sm:$0xff]  }
 0x9df   : > { %3295 = vmatpush1.bf16.msra.mxu0 %v5615_v37  ;;  %v5660_v37 = vld [vmem:[#allocation17 + $0x88] ss:$16 sps:$4 sm:$0xff]  }
 0x9e0   : > { %3296 = vmatprep.subr.bf16.mxu0 %v5620_v38  ;;  %v5665_v38 = vld [vmem:[#allocation17 + $0xa4] ss:$16 sps:$4 sm:$0xff]  }
 0x9e3   : > { %3297 = vmatpush1.bf16.msra.mxu0 %v5618_v32  ;;  %v5668_v32 = vld [vmem:[#allocation17 + $0xac] ss:$16 sps:$4 sm:$0xff]  }
 0x9e4   : > { %3298 = vmatprep.subr.bf16.mxu0 %v5623_v33  ;;  %v5663_v33 = vld [vmem:[#allocation17 + $0xa0] ss:$16 sps:$4 sm:$0xff]  }
 0x9ed   : > { %v2894_v2 = vpop.f32.mrb[12].mxu0 }
 0x9ee   : > { %v2896_v3 = vpop.f32.mrb[13].mxu0  ;;  %v2895_v8 = vadd.f32 %v2894_v2, %v2488_v6 }
 0x9ef   : > { %v7070_v9 = vadd.f32 %v2896_v3, %v2492_v7  ;;  %v2898_v10 = vpop.f32.mrb[14].mxu0 }
 0x9f0   : > { %v2900_v11 = vpop.f32.mrb[15].mxu0  ;;  %v2899_v12 = vadd.f32 %v2898_v10, %v2488_v6 }
 0x9f1   : > { %v7072_v13 = vadd.f32 %v2900_v11, %v2492_v7 }
 0x9f2   : > { %v2909_v35 = vpack.c.bf16 %v2899_v12, %v2895_v8  ;;  %v2259_v8 = vld [vmem:[%s7310_s6] sm:$0x3] }
 0x9f3   : > { %v2910_v36 = vpack.c.bf16 %v7072_v13, %v7070_v9  ;;  %v3107_v9 = vrot.slane %v2259_v8, %v6965_v58  ;;  %v3111_v10 = vrot.slane %v2259_v8, %v6970_v60  ;;  %v5698_v8 = vld [vmem:[#allocation17 + $0x14c] ss:$16 sps:$4 sm:$0xff]  }
 0x9f4   : > { %5034 = vmatpush3.bf16.msra.mxu1 %v2909_v35 }
 0x9f5   : > { %5039 = vmatprep.subr.bf16.mxu1 %v6329_v55 }
 0xa85   : > { %v2945_v40 = vpop.f32.mrb[28].mxu1 }
 0xa86   : > { %v5025_v41 = vpop.f32.mrb[29].mxu1  ;;  %v2991_v42 = vsel %vm1771_vm7, %v2945_v40, -inf }
 0xa87   : > { %2992 = vmax.xlane.f32.xlu0 %v2991_v42  ;;  %v2948_v47 = vpop.f32.mrb[30].mxu1 }
 0xa88   : > { %v5026_v48 = vpop.f32.mrb[31].mxu1 }
 0xa8d   : > { %v2985_v49 = vpop.f32.mrb[32].mxu1 }
 0xa8e   : > { %v5031_v50 = vpop.f32.mrb[33].mxu1  ;;  %v2994_v51 = vsel %vm1771_vm7, %v2985_v49, -inf }
 0xa8f   : > { %2995 = vmax.xlane.f32.xlu1 %v2994_v51  ;;  %v2988_v52 = vpop.f32.mrb[34].mxu1 }
 0xa90   : > { %v5032_v53 = vpop.f32.mrb[35].mxu1 }
 0xa91   : > { %v5626_v53 = vld [vmem:[#allocation15 + $0xd4] ss:$8 sps:$4 sm:$0xff]  }
 0xb14   : > { %v2993_v54 = vpop.xlane.xlu0 %2992 }
 0xb15   : > { %v2997_v56 = vsub.f32 %v2945_v40, %v2993_v54  ;;  %v5621_v40 = vld [vmem:[#allocation15 + $0xc0] ss:$8 sps:$4 sm:$0xff]   ;;  %v5624_v54 = vld [vmem:[#allocation15 + $0xd0] ss:$8 sps:$4 sm:$0xff]  }
 0xb16   : > { %3299 = vmatpush1.bf16.msra.mxu0 %v5621_v40  ;;  %v5666_v40 = vld [vmem:[#allocation17 + $0xa8] ss:$16 sps:$4 sm:$0xff]  }
 0xb17   : > { %v2999_v59 = vmul.f32 1.442695, %v2997_v56  ;;  %3300 = vmatprep.subr.bf16.mxu0 %v5626_v53  ;;  %v5627_v56 = vld [vmem:[#allocation15 + $0xe0] ss:$8 sps:$4 sm:$0xff]  }
 0xb19   : > { %5849 = vpow2.f32 %v2999_v59  ;;  %v5629_v59 = vld [vmem:[#allocation15 + $0xe4] ss:$8 sps:$4 sm:$0xff]  }
 0xb1a   : > { %3301 = vmatpush1.bf16.msra.mxu0 %v5624_v54 }
 0xb1b   : > { %3302 = vmatprep.subr.bf16.mxu0 %v5629_v59  ;;  %v5677_v59 = vld [vmem:[#allocation17 + $0xe4] ss:$16 sps:$4 sm:$0xff]  }
 0xb1c   : > { %v2996_v61 = vpop.xlane.xlu1 %2995 }
 0xb1d   : > { %v2998_v14 = vsub.f32 %v2985_v49, %v2996_v61  ;;  %v5632_v61 = vld [vmem:[#allocation15 + $0xf4] ss:$8 sps:$4 sm:$0xff]  }
 0xb1e   : > { %3303 = vmatpush1.bf16.msra.mxu0 %v5627_v56 }
 0xb1f   : > { %v3001_v63 = vmul.f32 1.442695, %v2998_v14  ;;  %v5630_v14 = vld [vmem:[#allocation15 + $0xf0] ss:$8 sps:$4 sm:$0xff]   ;;  %3304 = vmatprep.subr.bf16.mxu0 %v5632_v61  ;;  %v5680_v61 = vld [vmem:[#allocation17 + $0xec] ss:$16 sps:$4 sm:$0xff]  }
 0xb21   : > { %5851 = vpow2.f32 %v3001_v63 }
 0xb22   : > { %3305 = vmatpush1.bf16.msra.mxu0 %v5630_v14  ;;  %v5675_v14 = vld [vmem:[#allocation17 + $0xe0] ss:$16 sps:$4 sm:$0xff]  }
 0xb23   : > { %v7058_v0 = vpop.eup %5849  ;;  %3797 = vmatprep.subr.bf16.mxu0 %v5638_v20  ;;  %v5711_v20 = vld [vmem:[#allocation17 + $0x1a0] ss:$16 sps:$4 sm:$0xff]  }
 0xb24   : > { %v3003_v1 = vsel %vm1771_vm7, %v7058_v0, 0.0 }
 0xb25   : > { %3004 = vadd.xlane.f32.xlu0 %v3003_v1 }
 0xb2b   : > { %v7062_v4 = vpop.eup %5851 }
 0xb2c   : > { %v3006_v5 = vsel %vm1771_vm7, %v7062_v4, 0.0 }
 0xb2d   : > { %3007 = vadd.xlane.f32.xlu1 %v3006_v5 }
 0xbb2   : > { %v3005_v41 = vpop.xlane.xlu0 %3004 }
 0xbb3   : > { %5853 = vrcp.f32 %v3005_v41  ;;  %v5671_v41 = vld [vmem:[#allocation17 + $0xc4] ss:$16 sps:$4 sm:$0xff]  }
 0xbba   : > { %v3008_v42 = vpop.xlane.xlu1 %3007 }
 0xbbb   : > { %5855 = vrcp.f32 %v3008_v42  ;;  %v5674_v42 = vld [vmem:[#allocation17 + $0xcc] ss:$16 sps:$4 sm:$0xff]  }
 0xbbd   : > { %v5854_v47 = vpop.eup %5853 }
 0xbbe   : > { %v3011_v48 = vmul.f32 %v5854_v47, %v7058_v0  ;;  %v5669_v47 = vld [vmem:[#allocation17 + $0xc0] ss:$16 sps:$4 sm:$0xff]  }
 0xbc0   : > { %v3013_v49 = vpack.c.bf16 %v3011_v48, %v3011_v48  ;;  %v5672_v48 = vld [vmem:[#allocation17 + $0xc8] ss:$16 sps:$4 sm:$0xff]  }
 0xbc2   : > { %5036 = vmatmul.mubr.msk.bf16.vlgmr.msra.gmra.mrb[36].mxu1 %vm1771_vm7, %v3013_v49 }
 0xbc3   : > { %5040 = vmatpush3.bf16.msra.mxu1 %v2910_v36  ;;  %5041 = vmatprep.mubr.msk.bf16.mxu1 %vm6330_vm6, %v6329_v55 }
 0xbc4   : > { %3756 = vmatprep.subr.bf16.mxu1 %v5635_v17  ;;  %v5713_v17 = vld [vmem:[#allocation17 + $0x1a4] ss:$16 sps:$4 sm:$0xff]  }
 0xbc5   : > { %v5856_v50 = vpop.eup %5855 }
 0xbc6   : > { %v3012_v51 = vmul.f32 %v5856_v50, %v7062_v4 }
 0xbc8   : > { %v3014_v52 = vpack.c.bf16 %v3012_v51, %v3012_v51 }
 0xbca   : > { %5042 = vmatmul.mubr.msk.bf16.vlgmr.msra.gmra.mrb[40].mxu1 %vm1771_vm7, %v3014_v52 }
 0xbcb   : > { %3757 = vmatpush1.bf16.msra.mxu1 %v5633_v44  ;;  %v5708_v44 = vld [vmem:[#allocation17 + $0x188] ss:$16 sps:$4 sm:$0xff]  }
 0xbcc   : > { %3758 = vmatprep.subr.bf16.mxu1 %v5641_v46  ;;  %v5714_v46 = vld [vmem:[#allocation17 + $0x1a8] ss:$16 sps:$4 sm:$0xff]  }
 0xbcf   : > { %3759 = vmatpush1.bf16.msra.mxu1 %v5639_v22  ;;  %v5722_v22 = vld [vmem:[#allocation17 + $0x1cc] ss:$16 sps:$4 sm:$0xff]  }
 0xbd0   : > { %3760 = vmatprep.subr.bf16.mxu1 %v5647_v23  ;;  %v5720_v23 = vld [vmem:[#allocation17 + $0x1c8] ss:$16 sps:$4 sm:$0xff]  }
 0xbd3   : > { %3761 = vmatpush1.bf16.msra.mxu1 %v5645_v24  ;;  %v5728_v24 = vld [vmem:[#allocation17 + $0x1ec] ss:$16 sps:$4 sm:$0xff]  }
 0xbd4   : > { %3762 = vmatprep.subr.bf16.mxu1 %v5653_v26  ;;  %v5726_v26 = vld [vmem:[#allocation17 + $0x1e8] ss:$16 sps:$4 sm:$0xff]  }
 0xbd7   : > { %3763 = vmatpush1.bf16.msra.mxu1 %v5651_v28  ;;  %v5734_v28 = vld [vmem:[#allocation18 + $0x104] ss:$8 sps:$4 sm:$0xff]  }
 0xbd8   : > { %3764 = vmatprep.subr.bf16.mxu1 %v5659_v30 }
 0xbdb   : > { %3765 = vmatpush1.bf16.msra.mxu1 %v5657_v34 }
 0xbdc   : > { %3766 = vmatprep.subr.bf16.mxu1 %v5665_v38 }
 0xbdf   : > { %3767 = vmatpush1.bf16.msra.mxu1 %v5663_v33 }
 0xbe0   : > { %3768 = vmatprep.subr.bf16.mxu1 %v5671_v41 }
 0xbe3   : > { %3769 = vmatpush1.bf16.msra.mxu1 %v5669_v47 }
 0xbe4   : > { %3770 = vmatprep.subr.bf16.mxu1 %v5677_v59 }
 0xbe7   : > { %3771 = vmatpush1.bf16.msra.mxu1 %v5675_v14  ;;  %v5732_v14 = vld [vmem:[#allocation18 + $0x100] ss:$8 sps:$4 sm:$0xff]  }
 0xc95   : > { %v3052_v63 = vpop.f32.mrb[36].mxu1 }
 0xc96   : > { %v5037_v55 = vpop.f32.mrb[37].mxu1  ;;  %v3101_v5 = vpack.c.bf16 %v3052_v63, %v3052_v63  ;;  %v5678_v63 = vld [vmem:[#allocation17 + $0xe8] ss:$16 sps:$4 sm:$0xff]  }
 0xc97   : > { %v3055_v0 = vpop.f32.mrb[38].mxu1  ;;  %v5683_v55 = vld [vmem:[#allocation17 + $0x104] ss:$16 sps:$4 sm:$0xff]  }
 0xc98   : > { %v5038_v1 = vpop.f32.mrb[39].mxu1  ;;  %v5686_v0 = vld [vmem:[#allocation17 + $0x10c] ss:$16 sps:$4 sm:$0xff]   ;;  %3772 = vmatprep.subr.bf16.mxu1 %v5683_v55 }
 0xc99   : > { %v5681_v1 = vld [vmem:[#allocation17 + $0x100] ss:$16 sps:$4 sm:$0xff]   ;;  %v5740_v55 = vld [vmem:[#allocation18 + $0x114] ss:$8 sps:$4 sm:$0xff]  }
 0xc9a   : > { %3773 = vmatpush1.bf16.msra.mxu1 %v5681_v1  ;;  %v5746_v1 = vld [vmem:[#allocation18 + $0x124] ss:$8 sps:$4 sm:$0xff]  }
 0xc9d   : > { %v3095_v2 = vpop.f32.mrb[40].mxu1 }
 0xc9e   : > { %v3102_v3 = vpack.c.bf16 %v3095_v2, %v3095_v2  ;;  %v5043_v4 = vpop.f32.mrb[41].mxu1  ;;  %v5684_v2 = vld [vmem:[#allocation17 + $0x108] ss:$16 sps:$4 sm:$0xff]  }
 0xc9f   : > { %v3098_v6 = vpop.f32.mrb[42].mxu1  ;;  %v5692_v4 = vld [vmem:[#allocation17 + $0x12c] ss:$16 sps:$4 sm:$0xff]  }
 0xca0   : > { %v5044_v7 = vpop.f32.mrb[43].mxu1  ;;  %3306 = vmatprep.mubr.bf16.mxu0 %v3102_v3  ;;  %v5689_v3 = vld [vmem:[#allocation17 + $0x124] ss:$16 sps:$4 sm:$0xff]   ;;  %v5690_v6 = vld [vmem:[#allocation17 + $0x128] ss:$16 sps:$4 sm:$0xff]  }
 0xca1   : > { %3307 = vmatmul.mubr.bf16.vlgmr.msra.gmra.mrb[16].mxu0 %v3101_v5  ;;  %v5687_v5 = vld [vmem:[#allocation17 + $0x120] ss:$16 sps:$4 sm:$0xff]   ;;  %3774 = vmatprep.subr.bf16.mxu1 %v5689_v3  ;;  %v5695_v7 = vld [vmem:[#allocation17 + $0x144] ss:$16 sps:$4 sm:$0xff]  }
 0xca2   : > { %3798 = vmatpush1.bf16.msra.mxu0 %v5636_v45  ;;  %3775 = vmatpush1.bf16.msra.mxu1 %v5687_v5  ;;  %v5716_v45 = vld [vmem:[#allocation17 + $0x1ac] ss:$16 sps:$4 sm:$0xff]   ;;  %v5744_v3 = vld [vmem:[#allocation18 + $0x120] ss:$8 sps:$4 sm:$0xff]  }
 0xca3   : > { %3799 = vmatprep.subr.bf16.mxu0 %v5644_v21  ;;  %3776 = vmatprep.subr.bf16.mxu1 %v5695_v7  ;;  %v5719_v21 = vld [vmem:[#allocation17 + $0x1c4] ss:$16 sps:$4 sm:$0xff]   ;;  %v5750_v7 = vld [vmem:[#allocation18 + $0x130] ss:$8 sps:$4 sm:$0xff]  }
 0xca4   : > { %v5752_v5 = vld [vmem:[#allocation18 + $0x134] ss:$8 sps:$4 sm:$0xff]  }
 0xd74   : > { %v3308_v11 = vpop.f32.mrb[16].mxu0 }
 0xd75   : > { %v3309_v12 = vadd.f32 %v3308_v11, %v3107_v9  ;;  %v3310_v13 = vpop.f32.mrb[17].mxu0  ;;  %v5693_v9 = vld [vmem:[#allocation17 + $0x140] ss:$16 sps:$4 sm:$0xff]   ;;  %v5701_v11 = vld [vmem:[#allocation17 + $0x164] ss:$16 sps:$4 sm:$0xff]  }
 0xd76   : > { %v3311_v35 = vadd.f32 %v3310_v13, %v3111_v10  ;;  %v3312_v36 = vpop.f32.mrb[18].mxu0  ;;  %v5696_v10 = vld [vmem:[#allocation17 + $0x148] ss:$16 sps:$4 sm:$0xff]   ;;  %3777 = vmatpush1.bf16.msra.mxu1 %v5693_v9  ;;  %v5758_v9 = vld [vmem:[#allocation18 + $0x144] ss:$8 sps:$4 sm:$0xff]  }
 0xd77   : > { %v7092_v15 = vadd.f32 %v3309_v12, %v7006_v57  ;;  %v3313_v43 = vpop.f32.mrb[19].mxu0  ;;  %v5642_v57 = vld [vmem:[#allocation17 + $0x28] ss:$16 sps:$4 sm:$0xff]   ;;  %v5699_v12 = vld [vmem:[#allocation17 + $0x160] ss:$16 sps:$4 sm:$0xff]   ;;  %3778 = vmatprep.subr.bf16.mxu1 %v5701_v11 }
 0xd78   : > { %v7095_v16 = vadd.f32 %v3311_v35, %v7009_v62  ;;  %v5650_v62 = vld [vmem:[#allocation17 + $0x4c] ss:$16 sps:$4 sm:$0xff]   ;;  %3800 = vmatpush1.bf16.msra.mxu0 %v5642_v57  ;;  %v5702_v13 = vld [vmem:[#allocation17 + $0x168] ss:$16 sps:$4 sm:$0xff]   ;;  %v5707_v36 = vld [vmem:[#allocation17 + $0x184] ss:$16 sps:$4 sm:$0xff]  }
 0xd79   : > { %3801 = vmatprep.subr.bf16.mxu0 %v5650_v62  ;;  %v5704_v35 = vld [vmem:[#allocation17 + $0x16c] ss:$16 sps:$4 sm:$0xff]   ;;  %v5717_v57 = vld [vmem:[#allocation17 + $0x1c0] ss:$16 sps:$4 sm:$0xff]   ;;  %v5725_v62 = vld [vmem:[#allocation17 + $0x1e4] ss:$16 sps:$4 sm:$0xff]  }
 0xd7a   : > { %v3319_v39 = vadd.f32 %v7095_v16, %v7092_v15  ;;  %v5710_v43 = vld [vmem:[#allocation17 + $0x18c] ss:$16 sps:$4 sm:$0xff]   ;;  %3779 = vmatpush1.bf16.msra.mxu1 %v5699_v12  ;;  %v5756_v11 = vld [vmem:[#allocation18 + $0x140] ss:$8 sps:$4 sm:$0xff]  }
 0xd7b   : > { %3780 = vmatprep.subr.bf16.mxu1 %v5707_v36  ;;  %v5761_v12 = vld [vmem:[#allocation18 + $0x54] ss:$8 sps:$4 sm:$0xff]   ;;  %v5762_v36 = vld [vmem:[#allocation18 + $0x150] ss:$8 sps:$4 sm:$0xff]  }
 0xd7c   : > { %3320 = vadd.xlane.f32.xlu0 %v3319_v39  ;;  %3802 = vmatpush1.bf16.msra.mxu0 %v5648_v25  ;;  %v5705_v39 = vld [vmem:[#allocation17 + $0x180] ss:$16 sps:$4 sm:$0xff]  }
 0xd7d   : > { %3803 = vmatprep.subr.bf16.mxu0 %v5656_v27  ;;  %v5723_v25 = vld [vmem:[#allocation17 + $0x1e0] ss:$16 sps:$4 sm:$0xff]   ;;  %v5731_v27 = vld [vmem:[#allocation18 + $0x4] ss:$8 sps:$4 sm:$0xff]  }
 0xd7e   : > { %3781 = vmatpush1.bf16.msra.mxu1 %v5705_v39  ;;  %v5770_v39 = vld [vmem:[#allocation18 + $0x164] ss:$8 sps:$4 sm:$0xff]  }
 0xd7f   : > { %3782 = vmatprep.subr.bf16.mxu1 %v5713_v17  ;;  %v5768_v17 = vld [vmem:[#allocation18 + $0x160] ss:$8 sps:$4 sm:$0xff]  }
 0xd80   : > { %3804 = vmatpush1.bf16.msra.mxu0 %v5654_v29 }
 0xd81   : > { %3805 = vmatprep.subr.bf16.mxu0 %v5662_v31 }
 0xd82   : > { %3783 = vmatpush1.bf16.msra.mxu1 %v5711_v20  ;;  %v5776_v20 = vld [vmem:[#allocation18 + $0x174] ss:$8 sps:$4 sm:$0xff]  }
 0xd83   : > { %3784 = vmatprep.subr.bf16.mxu1 %v5719_v21  ;;  %v5774_v21 = vld [vmem:[#allocation18 + $0x170] ss:$8 sps:$4 sm:$0xff]  }
 0xd84   : > { %3806 = vmatpush1.bf16.msra.mxu0 %v5660_v37 }
 0xd85   : > { %3807 = vmatprep.subr.bf16.mxu0 %v5668_v32 }
 0xd86   : > { %3785 = vmatpush1.bf16.msra.mxu1 %v5717_v57  ;;  %v5782_v57 = vld [vmem:[#allocation18 + $0x184] ss:$8 sps:$4 sm:$0xff]  }
 0xd87   : > { %3786 = vmatprep.subr.bf16.mxu1 %v5725_v62  ;;  %v5780_v62 = vld [vmem:[#allocation18 + $0x180] ss:$8 sps:$4 sm:$0xff]  }
 0xd88   : > { %3808 = vmatpush1.bf16.msra.mxu0 %v5666_v40  ;;  %v3338_v40 = vstv %s4842_s2 }
 0xd89   : > { %3809 = vmatprep.subr.bf16.mxu0 %v5674_v42 }
 0xd8a   : > { %3787 = vmatpush1.bf16.msra.mxu1 %v5723_v25  ;;  %v5788_v25 = vld [vmem:[#allocation18 + $0x194] ss:$8 sps:$4 sm:$0xff]  }
 0xd8b   : > { %4230 = vmatprep.subr.bf16.mxu1 %v5731_v27  ;;  %v5786_v27 = vld [vmem:[#allocation18 + $0x190] ss:$8 sps:$4 sm:$0xff]  }
 0xd8c   : > { %3810 = vmatpush1.bf16.msra.mxu0 %v5672_v48  ;;  %v3345_v48 = vstv %s4843_s23  ;;  %s7315_s23 = sld [smem:[#allocation56_spill]] }
 0xd8d   : > { %3811 = vmatprep.subr.bf16.mxu0 %v5680_v61  ;;  %v5729_v61 = vld [vmem:[#allocation18] ss:$8 sps:$4 sm:$0xff]  }
 0xd90   : > { %3812 = vmatpush1.bf16.msra.mxu0 %v5678_v63  ;;  %v5737_v63 = vld [vmem:[#allocation18 + $0x14] ss:$8 sps:$4 sm:$0xff]  }
 0xd91   : > { %3813 = vmatprep.subr.bf16.mxu0 %v5686_v0  ;;  %v5743_v0 = vld [vmem:[#allocation18 + $0x24] ss:$8 sps:$4 sm:$0xff]  }
 0xd92   : > { %s7316_s18 = smov %s7315_s23  ;;  %s7131_s29 = scalar_lea.hbm %s7315_s23, %s4975_s11 }
 0xd94   : > { %3814 = vmatpush1.bf16.msra.mxu0 %v5684_v2  ;;  %v5741_v2 = vld [vmem:[#allocation18 + $0x20] ss:$8 sps:$4 sm:$0xff]  }
 0xd95   : > { %3815 = vmatprep.subr.bf16.mxu0 %v5692_v4  ;;  %v5749_v4 = vld [vmem:[#allocation18 + $0x34] ss:$8 sps:$4 sm:$0xff]  }
 0xd98   : > { %3816 = vmatpush1.bf16.msra.mxu0 %v5690_v6  ;;  %v5747_v6 = vld [vmem:[#allocation18 + $0x30] ss:$8 sps:$4 sm:$0xff]  }
 0xd99   : > { %3817 = vmatprep.subr.bf16.mxu0 %v5698_v8  ;;  %v5755_v8 = vld [vmem:[#allocation18 + $0x44] ss:$8 sps:$4 sm:$0xff]  }
 0xd9c   : > { %3818 = vmatpush1.bf16.msra.mxu0 %v5696_v10  ;;  %v5753_v10 = vld [vmem:[#allocation18 + $0x40] ss:$8 sps:$4 sm:$0xff]  }
 0xd9d   : > { %3819 = vmatprep.subr.bf16.mxu0 %v5704_v35  ;;  %v5759_v35 = vld [vmem:[#allocation18 + $0x50] ss:$8 sps:$4 sm:$0xff]  }
 0xda0   : > { %3820 = vmatpush1.bf16.msra.mxu0 %v5702_v13  ;;  %v5764_v13 = vld [vmem:[#allocation18 + $0x154] ss:$8 sps:$4 sm:$0xff]  }
 0xda1   : > { %3821 = vmatprep.subr.bf16.mxu0 %v5710_v43  ;;  %v5767_v43 = vld [vmem:[#allocation18 + $0x64] ss:$8 sps:$4 sm:$0xff]  }
 0xda4   : > { %3822 = vmatpush1.bf16.msra.mxu0 %v5708_v44  ;;  %v5765_v44 = vld [vmem:[#allocation18 + $0x60] ss:$8 sps:$4 sm:$0xff]  }
 0xda5   : > { %3823 = vmatprep.subr.bf16.mxu0 %v5716_v45  ;;  %v5773_v45 = vld [vmem:[#allocation18 + $0x74] ss:$8 sps:$4 sm:$0xff]  }
 0xda8   : > { %3824 = vmatpush1.bf16.msra.mxu0 %v5714_v46  ;;  %v5771_v46 = vld [vmem:[#allocation18 + $0x70] ss:$8 sps:$4 sm:$0xff]  }
 0xda9   : > { %3825 = vmatprep.subr.bf16.mxu0 %v5722_v22  ;;  %v5779_v22 = vld [vmem:[#allocation18 + $0x84] ss:$8 sps:$4 sm:$0xff]  }
 0xdac   : > { %3826 = vmatpush1.bf16.msra.mxu0 %v5720_v23  ;;  %v5777_v23 = vld [vmem:[#allocation18 + $0x80] ss:$8 sps:$4 sm:$0xff]  }
 0xdad   : > { %3827 = vmatprep.subr.bf16.mxu0 %v5728_v24  ;;  %v5785_v24 = vld [vmem:[#allocation18 + $0x94] ss:$8 sps:$4 sm:$0xff]  }
 0xdb0   : > { %3828 = vmatpush1.bf16.msra.mxu0 %v5726_v26  ;;  %v5783_v26 = vld [vmem:[#allocation18 + $0x90] ss:$8 sps:$4 sm:$0xff]  }
 0xdb1   : > { %4271 = vmatprep.subr.bf16.mxu0 %v5734_v28  ;;  %v5791_v28 = vld [vmem:[#allocation18 + $0xa4] ss:$8 sps:$4 sm:$0xff]  }
 0xe09   : > { %v3321_v49 = vpop.xlane.xlu0 %3320 }
 0xe0a   : > { %v3322_v50 = vmul.f32 0.00390625, %v3321_v49 }
 0xe0c   : > { %v7100_v51 = vsub.f32 %v7092_v15, %v3322_v50  ;;  %v7103_v52 = vsub.f32 %v7095_v16, %v3322_v50 }
 0xe0e   : > { %v3325_v53 = vmul.f32 %v7100_v51, %v7100_v51  ;;  %v3326_v54 = vmul.f32 %v7103_v52, %v7103_v52  ;;  %v3339_v41 = vmul.f32 %v3338_v40, %v7100_v51  ;;  %v3340_v42 = vmul.f32 %v3338_v40, %v7103_v52  ;;  %v5735_v51 = vld [vmem:[#allocation18 + $0x10] ss:$8 sps:$4 sm:$0xff]   ;;  %v5806_v40 = vld [vmem:[#allocation18 + $0x1c4] ss:$8 sps:$4 sm:$0xff]  }
 0xe0f   : > { %v5738_v52 = vld [vmem:[#allocation18 + $0x110] ss:$8 sps:$4 sm:$0xff]  }
 0xe10   : > { %v3327_v56 = vadd.f32 %v3326_v54, %v3325_v53 }
 0xe12   : > { %3328 = vadd.xlane.f32.xlu1 %v3327_v56 }
 0xe9f   : > { %v3329_v29 = vpop.xlane.xlu1 %3328 }
 0xea0   : > { %v3330_v30 = vmul.f32 0.003921569, %v3329_v29  ;;  %v5794_v29 = vld [vmem:[#allocation18 + $0x1a4] ss:$8 sps:$4 sm:$0xff]  }
 0xea2   : > { %5857 = vrsqrt.f32 %v3330_v30  ;;  %vm3333_vm10 = vcmp.eq.f32.partialorder %v3330_v30, inf  ;;  %v3336_v37 = vand.u32 2147483648, %v3330_v30  ;;  %vm3335_vm11 = vcmp.eq.f32.partialorder %v3330_v30, 0.0 }
 0xeac   : > { %v5858_v31 = vpop.eup %5857 }
 0xead   : > { %v3332_v34 = vmul.f32 %v5858_v31, %v3330_v30  ;;  %v5792_v31 = vld [vmem:[#allocation18 + $0x1a0] ss:$8 sps:$4 sm:$0xff]  }
 0xeaf   : > { %v3334_v38 = vsel %vm3333_vm10, %v3330_v30, %v3332_v34  ;;  %v5789_v30 = vld [vmem:[#allocation18 + $0xa0] ss:$8 sps:$4 sm:$0xff]   ;;  %v5797_v34 = vld [vmem:[#allocation18 + $0xb4] ss:$8 sps:$4 sm:$0xff]  }
 0xeb0   : > { %v3337_v32 = vsel %vm3335_vm11, %v3336_v37, %v3334_v38  ;;  %v5800_v37 = vld [vmem:[#allocation18 + $0x1b4] ss:$8 sps:$4 sm:$0xff]   ;;  %v5795_v38 = vld [vmem:[#allocation18 + $0xb0] ss:$8 sps:$4 sm:$0xff]  }
 0xeb1   : > { %v3341_v33 = vadd.f32 1e-06, %v3337_v32  ;;  %v5798_v32 = vld [vmem:[#allocation18 + $0x1b0] ss:$8 sps:$4 sm:$0xff]  }
 0xeb3   : > { %5859 = vrcp.f32 %v3341_v33  ;;  %v5803_v33 = vld [vmem:[#allocation18 + $0xc4] ss:$8 sps:$4 sm:$0xff]  }
 0xebd   : > { %v5860_v47 = vpop.eup %5859 }
 0xebe   : > { %v3343_v49 = vmul.f32 %v5860_v47, %v3339_v41  ;;  %v3344_v50 = vmul.f32 %v5860_v47, %v3340_v42  ;;  %v5801_v41 = vld [vmem:[#allocation18 + $0xc0] ss:$8 sps:$4 sm:$0xff]   ;;  %v5809_v47 = vld [vmem:[#allocation18 + $0xd4] ss:$8 sps:$4 sm:$0xff]  }
 0xebf   : > { %v5804_v42 = vld [vmem:[#allocation18 + $0x1c0] ss:$8 sps:$4 sm:$0xff]  }
 0xec0   : > { %v3346_v53 = vadd.f32 %v3345_v48, %v3343_v49  ;;  %v3347_v54 = vadd.f32 %v3345_v48, %v3344_v50  ;;  %v5812_v48 = vld [vmem:[#allocation18 + $0x1d4] ss:$8 sps:$4 sm:$0xff]   ;;  %v5807_v49 = vld [vmem:[#allocation18 + $0xd0] ss:$8 sps:$4 sm:$0xff]  }
 0xec1   : > { %v5810_v50 = vld [vmem:[#allocation18 + $0x1d0] ss:$8 sps:$4 sm:$0xff]  }
 0xec2   : > { %v3348_v56 = vpack.c.bf16 %v3346_v53, %v3346_v53  ;;  %v3349_v59 = vpack.c.bf16 %v3347_v54, %v3347_v54  ;;  %v5815_v53 = vld [vmem:[#allocation18 + $0xe4] ss:$8 sps:$4 sm:$0xff]  }
 0xec3   : > { %v5818_v54 = vld [vmem:[#allocation18 + $0x1e4] ss:$8 sps:$4 sm:$0xff]  }
 0xec4   : > { %3788 = vmatprep.mubr.bf16.mxu1 %v3349_v59  ;;  %3829 = vmatprep.mubr.bf16.mxu0 %v3349_v59  ;;  %v5816_v59 = vld [vmem:[#allocation18 + $0x1e0] ss:$8 sps:$4 sm:$0xff]  }
 0xec5   : > { %3789 = vmatmul.mubr.bf16.vlgmr.msra.gmra.mrb[44].mxu1 %v3348_v56  ;;  %3830 = vmatmul.mubr.bf16.vlgmr.msra.gmra.mrb[20].mxu0 %v3348_v56  ;;  %v5813_v56 = vld [vmem:[#allocation18 + $0xe0] ss:$8 sps:$4 sm:$0xff]  }
 0xec6   : > { %4231 = vmatpush1.bf16.msra.mxu1 %v5729_v61  ;;  %4272 = vmatpush1.bf16.msra.mxu0 %v5732_v14  ;;  %v5821_v61 = vld [vmem:[#allocation18 + $0xf4] ss:$8 sps:$4 sm:$0xff]  }
 0xec7   : > { %4232 = vmatprep.subr.bf16.mxu1 %v5737_v63  ;;  %4273 = vmatprep.subr.bf16.mxu0 %v5740_v55  ;;  %v5824_v14 = vld [vmem:[#allocation18 + $0x1f4] ss:$8 sps:$4 sm:$0xff]   ;;  %v5819_v63 = vld [vmem:[#allocation18 + $0xf0] ss:$8 sps:$4 sm:$0xff]  }
 0xec8   : > { %v5822_v55 = vld [vmem:[#allocation18 + $0x1f0] ss:$8 sps:$4 sm:$0xff]  }
 0xeca   : > { %4233 = vmatpush1.bf16.msra.mxu1 %v5735_v51  ;;  %4274 = vmatpush1.bf16.msra.mxu0 %v5738_v52  ;;  %v3414_v51 = vld [vmem:[%s7311_s10] sm:$0xf]  ;;  %s4331_s10 = scalar_lea.sflag [#allocation4], %s802_s9 }
 0xecb   : > { %4234 = vmatprep.subr.bf16.mxu1 %v5743_v0  ;;  %4275 = vmatprep.subr.bf16.mxu0 %v5746_v1  ;;  %v3419_v52 = vrot.slane %v3414_v51, %v6965_v58  ;;  %v3427_v0 = vrot.slane %v3414_v51, %v6985_v18  ;;  %v3423_v1 = vrot.slane %v3414_v51, %v6970_v60 }
 0xece   : > { %4235 = vmatpush1.bf16.msra.mxu1 %v5741_v2  ;;  %4276 = vmatpush1.bf16.msra.mxu0 %v5744_v3  ;;  %v3431_v2 = vrot.slane %v3414_v51, %v6987_v19 }
 0xecf   : > { %4236 = vmatprep.subr.bf16.mxu1 %v5749_v4  ;;  %4277 = vmatprep.subr.bf16.mxu0 %v5752_v5 }
 0xed2   : > { %4237 = vmatpush1.bf16.msra.mxu1 %v5747_v6  ;;  %4278 = vmatpush1.bf16.msra.mxu0 %v5750_v7 }
 0xed3   : > { %4238 = vmatprep.subr.bf16.mxu1 %v5755_v8  ;;  %4279 = vmatprep.subr.bf16.mxu0 %v5758_v9 }
 0xed6   : > { %4239 = vmatpush1.bf16.msra.mxu1 %v5753_v10  ;;  %4280 = vmatpush1.bf16.msra.mxu0 %v5756_v11 }
 0xed7   : > { %4240 = vmatprep.subr.bf16.mxu1 %v5761_v12  ;;  %4281 = vmatprep.subr.bf16.mxu0 %v5764_v13 }
 0xeda   : > { %4241 = vmatpush1.bf16.msra.mxu1 %v5759_v35  ;;  %4282 = vmatpush1.bf16.msra.mxu0 %v5762_v36 }
 0xedb   : > { %4242 = vmatprep.subr.bf16.mxu1 %v5767_v43  ;;  %4283 = vmatprep.subr.bf16.mxu0 %v5770_v39 }
 0xede   : > { %4243 = vmatpush1.bf16.msra.mxu1 %v5765_v44  ;;  %4284 = vmatpush1.bf16.msra.mxu0 %v5768_v17 }
 0xedf   : > { %4244 = vmatprep.subr.bf16.mxu1 %v5773_v45  ;;  %4285 = vmatprep.subr.bf16.mxu0 %v5776_v20  ;;  %v4314_v20 = vld [vmem:[%s7314_s0] sm:$0x3] }
 0xee2   : > { %4245 = vmatpush1.bf16.msra.mxu1 %v5771_v46  ;;  %4286 = vmatpush1.bf16.msra.mxu0 %v5774_v21 }
 0xee3   : > { %4246 = vmatprep.subr.bf16.mxu1 %v5779_v22  ;;  %4287 = vmatprep.subr.bf16.mxu0 %v5782_v57  ;;  %v4319_v57 = vrot.slane %v4314_v20, %v6965_v58 }
 0xee6   : > { %4247 = vmatpush1.bf16.msra.mxu1 %v5777_v23  ;;  %4288 = vmatpush1.bf16.msra.mxu0 %v5780_v62 }
 0xee7   : > { %4248 = vmatprep.subr.bf16.mxu1 %v5785_v24  ;;  %4289 = vmatprep.subr.bf16.mxu0 %v5788_v25  ;;  %v4323_v25 = vrot.slane %v4314_v20, %v6970_v60 }
 0xeea   : > { %4249 = vmatpush1.bf16.msra.mxu1 %v5783_v26  ;;  %4290 = vmatpush1.bf16.msra.mxu0 %v5786_v27 }
 0xeeb   : > { %4250 = vmatprep.subr.bf16.mxu1 %v5791_v28  ;;  %4291 = vmatprep.subr.bf16.mxu0 %v5794_v29 }
 0xeee   : > { %4251 = vmatpush1.bf16.msra.mxu1 %v5789_v30  ;;  %4292 = vmatpush1.bf16.msra.mxu0 %v5792_v31 }
 0xeef   : > { %4252 = vmatprep.subr.bf16.mxu1 %v5797_v34  ;;  %4293 = vmatprep.subr.bf16.mxu0 %v5800_v37 }
 0xef2   : > { %4253 = vmatpush1.bf16.msra.mxu1 %v5795_v38  ;;  %4294 = vmatpush1.bf16.msra.mxu0 %v5798_v32 }
 0xef3   : > { %4254 = vmatprep.subr.bf16.mxu1 %v5803_v33  ;;  %4295 = vmatprep.subr.bf16.mxu0 %v5806_v40 }
 0xef6   : > { %4255 = vmatpush1.bf16.msra.mxu1 %v5801_v41  ;;  %4296 = vmatpush1.bf16.msra.mxu0 %v5804_v42 }
 0xef7   : > { %4256 = vmatprep.subr.bf16.mxu1 %v5809_v47  ;;  %4297 = vmatprep.subr.bf16.mxu0 %v5812_v48 }
 0xefa   : > { %4257 = vmatpush1.bf16.msra.mxu1 %v5807_v49  ;;  %4298 = vmatpush1.bf16.msra.mxu0 %v5810_v50 }
 0xefb   : > { %4258 = vmatprep.subr.bf16.mxu1 %v5815_v53  ;;  %4299 = vmatprep.subr.bf16.mxu0 %v5818_v54 }
 0xefe   : > { %4259 = vmatpush1.bf16.msra.mxu1 %v5813_v56  ;;  %4300 = vmatpush1.bf16.msra.mxu0 %v5816_v59 }
 0xeff   : > { %4260 = vmatprep.subr.bf16.mxu1 %v5821_v61  ;;  %4301 = vmatprep.subr.bf16.mxu0 %v5824_v14 }
 0xf02   : > { %4261 = vmatpush1.bf16.msra.mxu1 %v5819_v63  ;;  %4302 = vmatpush1.bf16.msra.mxu0 %v5822_v55 }
 0xf98   : > { %v3790_v3 = vpop.f32.mrb[44].mxu1  ;;  %v3831_v4 = vpop.f32.mrb[20].mxu0 }
 0xf99   : > { %v3791_v5 = vadd.f32 %v3790_v3, %v3419_v52  ;;  %v3832_v6 = vadd.f32 %v3831_v4, %v3427_v0  ;;  %v3792_v7 = vpop.f32.mrb[45].mxu1  ;;  %v3833_v8 = vpop.f32.mrb[21].mxu0 }
 0xf9a   : > { %v3793_v9 = vadd.f32 %v3792_v7, %v3423_v1  ;;  %v3834_v10 = vadd.f32 %v3833_v8, %v3431_v2  ;;  %v3794_v11 = vpop.f32.mrb[46].mxu1  ;;  %v3835_v12 = vpop.f32.mrb[22].mxu0 }
 0xf9b   : > { %v3838_v13 = vmax.f32 %v3791_v5, 0.0  ;;  %v3840_v35 = vmax.f32 %v3832_v6, 0.0  ;;  %v3795_v18 = vpop.f32.mrb[47].mxu1  ;;  %v3836_v36 = vpop.f32.mrb[23].mxu0 }
 0xf9c   : > { %v3839_v43 = vmax.f32 %v3793_v9, 0.0  ;;  %v3841_v39 = vmax.f32 %v3834_v10, 0.0 }
 0xf9d   : > { %v3842_v17 = vpack.c.bf16 %v3838_v13, %v3838_v13  ;;  %v3844_v45 = vpack.c.bf16 %v3840_v35, %v3840_v35 }
 0xf9e   : > { %v3843_v19 = vpack.c.bf16 %v3839_v43, %v3839_v43  ;;  %v3845_v44 = vpack.c.bf16 %v3841_v39, %v3841_v39 }
 0xfa0   : > { %4262 = vmatprep.mubr.bf16.mxu1 %v3843_v19  ;;  %4303 = vmatprep.mubr.bf16.mxu0 %v3845_v44 }
 0xfa1   : > { %4263 = vmatmul.mubr.bf16.vlgmr.msra.gmra.mrb[48].mxu1 %v3842_v17  ;;  %4304 = vmatmul.mubr.bf16.vlgmr.msra.gmra.mrb[24].mxu0 %v3844_v45 }
0x1074   : > { %v4264_v46 = vpop.f32.mrb[48].mxu1  ;;  %v4305_v21 = vpop.f32.mrb[24].mxu0 }
0x1075   : > { %v4306_v22 = vadd.f32 %v4305_v21, %v4264_v46  ;;  %v4266_v23 = vpop.f32.mrb[49].mxu1  ;;  %v4307_v62 = vpop.f32.mrb[25].mxu0 }
0x1076   : > { %v4308_v24 = vadd.f32 %v4307_v62, %v4266_v23  ;;  %v4268_v26 = vpop.f32.mrb[50].mxu1  ;;  %v4309_v27 = vpop.f32.mrb[26].mxu0 }
0x1077   : > { %v4312_v28 = vadd.f32 %v4306_v22, %v7092_v15  ;;  %v4269_v29 = vpop.f32.mrb[51].mxu1  ;;  %v4310_v30 = vpop.f32.mrb[27].mxu0 }
0x1078   : > { %v4313_v31 = vadd.f32 %v4308_v24, %v7095_v16 }
0x1079   : > { %v4326_v34 = vadd.f32 %v4319_v57, %v4312_v28 }
0x107a   : > { %v4327_v37 = vadd.f32 %v4323_v25, %v4313_v31 }
0x107b   : > { %4328 = vst [vmem:[%s804_s17] sm:$0xff] %v4326_v34 }
0x107c   : > { %4329 = vst [vmem:[%s804_s17 + $0x8] sm:$0xff] %v4327_v37 }
0x107d   : > { %6175 = shalt.err (!%p6172_p8)
}
0x107e   : > { %s6176_s9 = scalar_lea.hbm %s7131_s29, 256  ;;  %s6180_s13 = scalar_lea.hbm %s7316_s18, 1024 }
0x107f   : > { %p6177_p1 = scmp.ne.s32.totalorder %s7131_s29, %s6176_s9  ;;  %p6181_p13 = scmp.lt.u32.totalorder %s7131_s29, %s7316_s18 }
0x1080   : > { %p6182_p10 = scmp.lt.u32.totalorder %s6180_s13, %s6176_s9  ;;  %p6184_p12 = scmp.lt.u32.totalorder %s6176_s9, %s7131_s29 }
0x1081   : > { %p6178_p9 = pnand %p6177_p1, %p7317_p4 }
0x1082   : > { %p6183_p7 = por %p6182_p10, %p6181_p13 }
0x1083   : > { %p6179_p11 = pneg %p6178_p9 }
0x1084   : > { %p6185_p5 = por %p6184_p12, %p6183_p7 }
0x1086   : > { %p6186_p6 = pnand %p6185_p5, %p6179_p11 }
0x1088   : > { %6189 = shalt.err (!%p6186_p6)
}
0x1089   : > { %5085 = dma.vmem_to_hbm [thread:$0]  (%p7317_p4), %s7133_s7, 256, %s7131_s29, %s4331_s10  }
0x108a PF: > { %s7318_s11 = sld [smem:[#allocation31_spill]]  ;;  %p5145_p2 = scmp.ge.s32.totalorder %s6312_s3, 2 }
0x108b   : > { %p7319_p3 = scmp.ne.s32.totalorder %s7284_s8, 0 }
0x108d   : > { %p5123_p0 = pnand %p5145_p2, %p7319_p3 }
0x1090   : > { %s4359_s17 = sand.u32 1, %s7318_s11  }
0x1091   : > { %s4360_s6 = scalar_lea.sflag [#allocation4], %s4359_s17 }
0x1092   : > { %6267 = dma.done.wait (!%p5123_p0), %s4360_s6, 256  }
0x1093   : > { %6269 = vsyncadd (!%p5123_p0), %s4360_s6, 4294967040  ;;  %s43_s3 = sadd.s32 1, %s6312_s3   ;;  %s7320_s0 = sld [smem:[#allocation32_spill]] }
0x1094   : > { %p40_p8 = scmp.ge.s32.totalorder %s43_s3, 6   ;;  %s7321_s30 = sld [smem:[#allocation33_spill]] }
0x1095   : > { %s7322_s20 = smov %s7337_s28  ;;  %s7323_s21 = smov %s6288_s1 }
0x1096   : > { %s7324_s1 = smov %s6292_s22  ;;  %s7325_s22 = smov %s6753_s27 }
0x1097   : > { %s7326_s2 = smov %s6304_s24  ;;  %s7327_s23 = smov %s6308_s25 }
0x1098   : > { %s7328_s24 = smov %s7331_s15  ;;  %s7329_s25 = smov %s7335_s19 }
0x1099   :  { %42 = sbr.rel (!%p40_p8) target bundleno = 37 (0x25), region = 192 }
0x10a0   :  { %4365 = vsyncpa [#allocation3], 1 }
0x10a1   :  { %4367 = vsyncpa [#allocation3 + $0x1], 1 }
0x10a2   :  { %4368 = vsyncpa [#allocation7], 1 }
0x10a3   :  { %4370 = vsyncpa [#allocation7 + $0x1], 1 }
0x10a4   :  { %4371 = vsyncpa [#allocation10], 1 }
0x10a5   :  { %4372 = vsyncpa [#allocation13], 1 }
0x10a6   :  { %4373 = vsyncpa [#allocation16], 1 }
0x10a7   :  { %4374 = vsyncpa [#allocation19], 1 }
0x10a8   :  { %4375 = vsyncpa [#allocation4], 1 }
0x10a9   :  { %4377 = vsyncpa [#allocation4 + $0x1], 1 }
0x10aa   :  { %4378 = vsyncpa [#allocation5], 1 }
0x10ab   :  { %4380 = vsyncpa [#allocation5 + $0x1], 1 }

</bundles_post_ra>
